<compile_context>
chip_gen: v7x
topology: tpu7x:2x2x1
jax: 0.10.0
libtpu: 0.0.40
codegen_flags: <defaults>
</compile_context>

<pallas_src>
import numpy as np
import jax
import jax.numpy as jnp
from jax import lax
from jax.experimental import pallas as pl
from jax.experimental.pallas import tpu as pltpu

KW = 4                    # conv kernel size
PAD = 2                   # int(np.ceil((kw - 1) / 2)) = 2  (pix2pixHD variant)
NEG_SLOPE = 0.2           # LeakyReLU slope
BN_EPS = 1e-5             # nn.BatchNorm2d default eps
MXU_DTYPE = jnp.bfloat16  # matmul operand dtype (accumulation stays f32)
LANE = 128                # lane padding target (TODO(synk): 256 on v6e/v7x MXU)
EXTRA_ROWS = 8            # trailing zero rows per slab (absorb overscan reads)


def _round_up(x, m):
    return ((x + m - 1) // m) * m


# ---------------------------------------------------------------------------
# static per-layer plan (geometry + flags), mirroring the PyTorch constructor
# ---------------------------------------------------------------------------
def make_plan(input_nc, ndf, n_layers, height, width):
    layers = []

    def add(cin, cout, stride, has_bias, bn, lrelu):
        layers.append(dict(cin=cin, cout=cout, stride=stride,
                           has_bias=has_bias, bn=bn, lrelu=lrelu))

    add(input_nc, ndf, 2, True, False, True)            # Conv(s=2) + LReLU
    nf = 1
    for n in range(1, n_layers):                        # Conv(s=2) + BN + LReLU
        prev, nf = nf, min(2 ** n, 8)
        add(ndf * prev, ndf * nf, 2, False, True, True)
    prev, nf = nf, min(2 ** n_layers, 8)                # Conv(s=1) + BN + LReLU
    add(ndf * prev, ndf * nf, 1, False, True, True)
    add(ndf * nf, 1, 1, True, False, False)             # Conv(s=1) -> 1 channel

    h, w = height, width
    for cfg in layers:
        cfg["hin"], cfg["win"] = h, w
        s = cfg["stride"]
        cfg["ho"] = (h + 2 * PAD - KW) // s + 1
        cfg["wo"] = (w + 2 * PAD - KW) // s + 1
        cfg["lin"] = cfg["win"] * cfg["cin"]
        cfg["lout"] = cfg["wo"] * cfg["cout"]
        cfg["lin_pad"] = _round_up(cfg["lin"], LANE)
        cfg["lout_pad"] = _round_up(cfg["lout"], LANE)
        cfg["cpad"] = _round_up(cfg["cout"], LANE)
        # per-image padded height of this layer's INPUT slab; a multiple of the
        # stride so one strided read covers the whole batch (batch folded in M).
        cfg["in_hp"] = _round_up(s * (cfg["ho"] - 1) + KW, s)
        cfg["hq"] = cfg["in_hp"] // s      # rows read per image (>= ho, rest junk)
        assert cfg["in_hp"] >= PAD + cfg["hin"]
        h, w = cfg["ho"], cfg["wo"]
    for a, b in zip(layers[:-1], layers[1:]):
        assert a["lout_pad"] == b["lin_pad"]
    return layers


# ---------------------------------------------------------------------------
# parameters (PyTorch layouts), GAN-style N(0, 0.02) init
# ---------------------------------------------------------------------------
def init_params(key, plan):
    params = []
    for cfg in plan:
        key, kw_key, kb_key = jax.random.split(key, 3)
        p = dict(w=jax.random.normal(
            kw_key, (cfg["cout"], cfg["cin"], KW, KW), jnp.float32) * 0.02)
        if cfg["has_bias"]:
            p["b"] = jax.random.normal(kb_key, (cfg["cout"],), jnp.float32) * 0.02
        if cfg["bn"]:
            p["gamma"] = jnp.ones((cfg["cout"],), jnp.float32)   # BN weight init
            p["beta"] = jnp.zeros((cfg["cout"],), jnp.float32)   # BN bias init
        params.append(p)
    return params


# ---------------------------------------------------------------------------
# repack parameters into the lane-padded matrices the fused kernel consumes
# ---------------------------------------------------------------------------
def _banded_weight(w_pt, win, wo, stride, lin_pad, lout_pad):
    """(Cout,Cin,KH,KW) torch weights -> (KW, lin_pad, lout_pad) banded matrices.

    Column block `o` of slice kh holds w[:, :, kh, kw].T at row block
    w = stride*o + kw - PAD; taps falling into the zero padding are omitted, so
    the matrix encodes the stride and the W-side 'same' padding.  Rows >= win*cin
    and columns >= wo*cout are zero (lane padding)."""
    cout, cin = w_pt.shape[0], w_pt.shape[1]
    wk = np.zeros((KW, lin_pad, lout_pad), np.float32)
    for kh in range(KW):
        for o in range(wo):
            for kw in range(KW):
                w = stride * o + kw - PAD
                if 0 <= w < win:
                    wk[kh, w * cin:(w + 1) * cin,
                       o * cout:(o + 1) * cout] = w_pt[:, :, kh, kw].T
    return wk


def prepare_kernel_params(plan, params):
    ops = []
    for cfg, p in zip(plan, params):
        w_pt = np.asarray(p["w"], np.float32)
        ops.append(jnp.asarray(
            _banded_weight(w_pt, cfg["win"], cfg["wo"], cfg["stride"],
                           cfg["lin_pad"], cfg["lout_pad"]), MXU_DTYPE))
        if cfg["has_bias"]:
            row = np.zeros((1, cfg["lout_pad"]), np.float32)
            row[0, :cfg["lout"]] = np.tile(np.asarray(p["b"], np.float32), cfg["wo"])
            ops.append(jnp.asarray(row))                           # (1, lout_pad)
        if cfg["bn"]:
            g = np.zeros((1, cfg["cpad"]), np.float32)
            g[0, :cfg["cout"]] = np.asarray(p["gamma"], np.float32)
            b = np.zeros((1, cfg["cpad"]), np.float32)
            b[0, :cfg["cout"]] = np.asarray(p["beta"], np.float32)
            ops.append(jnp.asarray(g))
            ops.append(jnp.asarray(b))
            # 0/1 matrices mapping the (wo-major, c-minor) lane layout to per-channel
            # vectors and back, so BN stats/normalise need no in-kernel reshape.
            ssum = np.zeros((cfg["lout_pad"], cfg["cpad"]), np.float32)
            for o in range(cfg["wo"]):
                for c in range(cfg["cout"]):
                    ssum[o * cfg["cout"] + c, c] = 1.0
            ops.append(jnp.asarray(ssum))                # lanes   -> channels
            ops.append(jnp.asarray(ssum.T.copy()))       # channel -> lanes
    return ops


# ---------------------------------------------------------------------------
# the fused kernel: all 5 conv layers + BN + LeakyReLU in one pallas_call
# ---------------------------------------------------------------------------
def _make_kernel(plan, batch):
    n_layers = len(plan)

    def kernel(*refs):
        it = iter(refs)
        x_ref = next(it)
        lrefs = []
        for cfg in plan:
            d = {"w": next(it)}
            if cfg["has_bias"]:
                d["bias"] = next(it)
            if cfg["bn"]:
                d["gamma"], d["beta"] = next(it), next(it)
                d["ssum"], d["stile"] = next(it), next(it)
            lrefs.append(d)
        out_ref = next(it)
        scratch = [next(it) for _ in range(n_layers - 1)]

        # Zero the inter-layer slabs once: their padding rows must read back as
        # the conv's zero padding (VMEM scratch is not zero-initialised).
        for s_ref in scratch:
            s_ref[...] = jnp.zeros_like(s_ref)

        srcs = [x_ref] + scratch          # activation chain (all VMEM-resident)

        for li, (cfg, prm) in enumerate(zip(plan, lrefs)):
            src = srcs[li]
            stride, ho, hq = cfg["stride"], cfg["ho"], cfg["hq"]
            m = batch * hq
            lout_pad = cfg["lout_pad"]

            # ---- conv: ONE strided batch-folded read + ONE MXU matmul per kh ----
            acc = None
            for kh in range(KW):
                if stride == 1:
                    rows = src[pl.ds(kh, m), :]
                else:
                    rows = src[pl.ds(kh, m, stride=stride), :]
                part = jnp.dot(rows.astype(MXU_DTYPE), prm["w"][kh],
                               preferred_element_type=jnp.float32)
                acc = part if acc is None else acc + part

            if cfg["has_bias"]:
                acc = acc + prm["bias"][...]

            # ---- fused training-mode BatchNorm (+ LeakyReLU), batch-folded ----
            if cfg["bn"]:
                # overscan (junk) rows must not pollute the batch statistics
                ridx = lax.broadcasted_iota(jnp.int32, (m, lout_pad), 0)
                valid = None
                for b in range(batch):
                    t = (ridx >= b * hq) & (ridx < b * hq + ho)
                    valid = t if valid is None else (valid | t)
                acc = jnp.where(valid, acc, 0.0)
                s1 = jnp.sum(acc, axis=0, keepdims=True)
                s2 = jnp.sum(acc * acc, axis=0, keepdims=True)
                stats_c = jnp.dot(jnp.concatenate([s1, s2], axis=0),
                                  prm["ssum"][...],
                                  preferred_element_type=jnp.float32)  # (2, cpad)
                cnt = float(batch * ho * cfg["wo"])
                mean = stats_c[0:1, :] / cnt
                var = jnp.maximum(stats_c[1:2, :] / cnt - mean * mean, 0.0)
                scale_c = prm["gamma"][...] * lax.rsqrt(var + BN_EPS)
                shift_c = prm["beta"][...] - mean * scale_c
                ss = jnp.dot(jnp.concatenate([scale_c, shift_c], axis=0),
                             prm["stile"][...],
                             preferred_element_type=jnp.float32)       # (2, lout_pad)
                acc = acc * ss[0:1, :] + ss[1:2, :]

            if cfg["lrelu"]:
                acc = jnp.where(acc > 0, acc, NEG_SLOPE * acc)

            # ---- write real rows only into the next layer's zero-padded slab ----
            if li == n_layers - 1:
                out_ref[...] = acc        # lane-dense; junk rows stripped in wrapper
            else:
                nxt = plan[li + 1]
                dst = scratch[li]
                for n in range(batch):
                    dst[pl.ds(n * nxt["in_hp"] + PAD, ho), :] = \
                        acc[n * hq:n * hq + ho, :]

    return kernel


def _full_block(shape):
    return pl.BlockSpec(shape, lambda: (0,) * len(shape))


def nlayer_discriminator_forward(x_nchw, plan, kernel_params):
    n, c, h, w = x_nchw.shape
    p0, last = plan[0], plan[-1]
    assert (c, h, w) == (p0["cin"], p0["hin"], p0["win"])

    # NCHW -> NHWC -> (N, H, W*C) (channels minor / lanes), zero-padded to the
    # slab layout: per image `in_hp` rows (PAD zero rows on top), lanes padded to
    # a multiple of 128, batch flattened into rows, + EXTRA_ROWS trailing zeros.
    x2d = jnp.transpose(x_nchw, (0, 2, 3, 1)).reshape(n, h, w * c).astype(jnp.float32)
    x2d = jnp.pad(x2d, ((0, 0), (PAD, p0["in_hp"] - PAD - h),
                        (0, p0["lin_pad"] - w * c)))
    x_slab = jnp.pad(x2d.reshape(n * p0["in_hp"], p0["lin_pad"]),
                     ((0, EXTRA_ROWS), (0, 0)))

    ops = [x_slab] + list(kernel_params)
    m_last = n * last["hq"]
    out_shape = jax.ShapeDtypeStruct((m_last, last["lout_pad"]), jnp.float32)

    # TODO(synk): bf16 scratch slabs + a spatially tiled "parallel" grid (halo
    # rows) are needed for v7x's second TensorCore / real resolutions.
    scratch = [pltpu.VMEM((n * plan[i + 1]["in_hp"] + EXTRA_ROWS,
                           plan[i + 1]["lin_pad"]), jnp.float32)
               for i in range(len(plan) - 1)]

    out = pl.pallas_call(
        _make_kernel(plan, n),
        out_shape=out_shape,
        in_specs=[_full_block(o.shape) for o in ops],
        out_specs=_full_block(out_shape.shape),
        scratch_shapes=scratch,
        compiler_params=pltpu.CompilerParams(vmem_limit_bytes=32 * 1024 * 1024),
    )(*ops)

    ho, wo, co = last["ho"], last["wo"], last["cout"]
    patch = out.reshape(n, last["hq"], last["lout_pad"])[:, :ho, :wo * co]
    return jnp.transpose(patch.reshape(n, ho, wo, co), (0, 3, 1, 2))


# ---------------------------------------------------------------------------
# pure-JAX reference (same semantics) used as an in-script correctness check
# ---------------------------------------------------------------------------
def reference_forward(x_nchw, plan, params):
    x = jnp.transpose(x_nchw, (0, 2, 3, 1)).astype(jnp.float32)   # NHWC
    for cfg, p in zip(plan, params):
        w = jnp.transpose(p["w"], (2, 3, 1, 0))                   # HWIO
        x = lax.conv_general_dilated(
            x, w, window_strides=(cfg["stride"],) * 2,
            padding=[(PAD, PAD), (PAD, PAD)],
            dimension_numbers=("NHWC", "HWIO", "NHWC"),
            precision=lax.Precision.HIGHEST)
        if cfg["has_bias"]:
            x = x + p["b"][None, None, None, :]
        if cfg["bn"]:
            mean = jnp.mean(x, axis=(0, 1, 2), keepdims=True)
            var = jnp.mean(jnp.square(x - mean), axis=(0, 1, 2), keepdims=True)
            x = (x - mean) * lax.rsqrt(var + BN_EPS) * p["gamma"] + p["beta"]
        if cfg["lrelu"]:
            x = jnp.where(x > 0, x, NEG_SLOPE * x)
    return jnp.transpose(x, (0, 3, 1, 2))


# ---------------------------------------------------------------------------
if __name__ == "__main__":
    key = jax.random.PRNGKey(0)
    k_x, k_p = jax.random.split(key)

    # Small, module-consistent shapes: batch=2, input_nc=4, spatial=16, ndf=8.
    N, C, H, W = 2, 4, 16, 16
    ndf, n_layers = 8, 3

    x = jax.random.normal(k_x, (N, C, H, W), jnp.float32)   # NCHW like PyTorch

    plan = make_plan(C, ndf, n_layers, H, W)
    params = init_params(k_p, plan)
    kernel_params = prepare_kernel_params(plan, params)

    fwd = jax.jit(lambda inp, kp: nlayer_discriminator_forward(inp, plan, kp))
    out = fwd(x, kernel_params)
    jax.block_until_ready(out)

    # 16 -> 9 -> 5 -> 3 -> 4 -> 5 spatially; 1 output channel (PatchGAN map).
    assert out.shape == (N, 1, 5, 5), out.shape

    # numerics check vs. pure-JAX reference (bf16 MXU operands -> loose tolerance)
    ref = reference_forward(x, plan, params)
    err = float(jnp.max(jnp.abs(out - ref)))
    assert err < 1e-1, f"kernel/reference mismatch: max abs err = {err}"

    print("KERNEL_OK")
</pallas_src>

<mosaic_0001>
module attributes {stable_mosaic.version = 11 : i64} {
  func.func @kernel(%arg0: memref<48x128xf32, #tpu.memory_space<vmem>>, %arg1: memref<4x128x128xbf16, #tpu.memory_space<vmem>>, %arg2: memref<1x128xf32, #tpu.memory_space<vmem>>, %arg3: memref<4x128x128xbf16, #tpu.memory_space<vmem>>, %arg4: memref<1x128xf32, #tpu.memory_space<vmem>>, %arg5: memref<1x128xf32, #tpu.memory_space<vmem>>, %arg6: memref<128x128xf32, #tpu.memory_space<vmem>>, %arg7: memref<128x128xf32, #tpu.memory_space<vmem>>, %arg8: memref<4x128x128xbf16, #tpu.memory_space<vmem>>, %arg9: memref<1x128xf32, #tpu.memory_space<vmem>>, %arg10: memref<1x128xf32, #tpu.memory_space<vmem>>, %arg11: memref<128x128xf32, #tpu.memory_space<vmem>>, %arg12: memref<128x128xf32, #tpu.memory_space<vmem>>, %arg13: memref<4x128x256xbf16, #tpu.memory_space<vmem>>, %arg14: memref<1x128xf32, #tpu.memory_space<vmem>>, %arg15: memref<1x128xf32, #tpu.memory_space<vmem>>, %arg16: memref<256x128xf32, #tpu.memory_space<vmem>>, %arg17: memref<128x256xf32, #tpu.memory_space<vmem>>, %arg18: memref<4x256x128xbf16, #tpu.memory_space<vmem>>, %arg19: memref<1x128xf32, #tpu.memory_space<vmem>>, %arg20: memref<16x128xf32, #tpu.memory_space<vmem>>, %arg21: memref<32x128xf32, #tpu.memory_space<vmem>>, %arg22: memref<24x128xf32, #tpu.memory_space<vmem>>, %arg23: memref<22x128xf32, #tpu.memory_space<vmem>>, %arg24: memref<24x256xf32, #tpu.memory_space<vmem>>) attributes {dimension_semantics = [], scalar_prefetch = 0 : i64, scratch_operands = 4 : i64, tpu.core_type = #tpu.core_type<tc>} {
    %cst = arith.constant 0.000000e+00 : f32
    %0 = vector.broadcast %cst : f32 to vector<32x128xf32>
    %c0 = arith.constant 0 : index
    %c0_0 = arith.constant 0 : index
    %1 = vector.load %arg21[%c0, %c0_0] : memref<32x128xf32, #tpu.memory_space<vmem>>, vector<32x128xf32>
    tpu.vector_store %arg21[%c0, %c0_0], %0 {strides = array<i32>} : memref<32x128xf32, #tpu.memory_space<vmem>>, vector<32x128xf32>,
    %cst_1 = arith.constant 0.000000e+00 : f32
    %2 = vector.broadcast %cst_1 : f32 to vector<24x128xf32>
    %c0_2 = arith.constant 0 : index
    %c0_3 = arith.constant 0 : index
    %3 = vector.load %arg22[%c0_2, %c0_3] : memref<24x128xf32, #tpu.memory_space<vmem>>, vector<24x128xf32>
    tpu.vector_store %arg22[%c0_2, %c0_3], %2 {strides = array<i32>} : memref<24x128xf32, #tpu.memory_space<vmem>>, vector<24x128xf32>,
    %cst_4 = arith.constant 0.000000e+00 : f32
    %4 = vector.broadcast %cst_4 : f32 to vector<22x128xf32>
    %c0_5 = arith.constant 0 : index
    %c0_6 = arith.constant 0 : index
    %5 = vector.load %arg23[%c0_5, %c0_6] : memref<22x128xf32, #tpu.memory_space<vmem>>, vector<22x128xf32>
    tpu.vector_store %arg23[%c0_5, %c0_6], %4 {strides = array<i32>} : memref<22x128xf32, #tpu.memory_space<vmem>>, vector<22x128xf32>,
    %cst_7 = arith.constant 0.000000e+00 : f32
    %6 = vector.broadcast %cst_7 : f32 to vector<24x256xf32>
    %c0_8 = arith.constant 0 : index
    %c0_9 = arith.constant 0 : index
    %7 = vector.load %arg24[%c0_8, %c0_9] : memref<24x256xf32, #tpu.memory_space<vmem>>, vector<24x256xf32>
    tpu.vector_store %arg24[%c0_8, %c0_9], %6 {strides = array<i32>} : memref<24x256xf32, #tpu.memory_space<vmem>>, vector<24x256xf32>,
    %c0_10 = arith.constant 0 : index
    %c0_11 = arith.constant 0 : index
    %8 = tpu.strided_load %arg0[%c0_10, %c0_11] {strides = array<i32: 2, 1>} : memref<48x128xf32, #tpu.memory_space<vmem>>, vector<20x128xf32>
    %9 = arith.truncf %8 : vector<20x128xf32> to vector<20x128xbf16>
    %c0_12 = arith.constant 0 : index
    %c0_13 = arith.constant 0 : index
    %c0_14 = arith.constant 0 : index
    %10 = vector.load %arg1[%c0_12, %c0_13, %c0_14] : memref<4x128x128xbf16, #tpu.memory_space<vmem>>, vector<1x128x128xbf16>
    %11 = vector.shape_cast %10 : vector<1x128x128xbf16> to vector<128x128xbf16>
    %cst_15 = arith.constant dense<0.000000e+00> : vector<20x128xf32>
    %12 = tpu.matmul %9, %11, %cst_15 {dimension_numbers = #tpu.dot_dimension_numbers<[1], [0], [0], [1], [0, 0, 1, 1], [], []>} : vector<20x128xbf16>, vector<128x128xbf16>, vector<20x128xf32> -> vector<20x128xf32>
    %c1 = arith.constant 1 : index
    %c0_16 = arith.constant 0 : index
    %13 = tpu.strided_load %arg0[%c1, %c0_16] {strides = array<i32: 2, 1>} : memref<48x128xf32, #tpu.memory_space<vmem>>, vector<20x128xf32>
    %14 = arith.truncf %13 : vector<20x128xf32> to vector<20x128xbf16>
    %c1_17 = arith.constant 1 : index
    %c0_18 = arith.constant 0 : index
    %c0_19 = arith.constant 0 : index
    %15 = vector.load %arg1[%c1_17, %c0_18, %c0_19] : memref<4x128x128xbf16, #tpu.memory_space<vmem>>, vector<1x128x128xbf16>
    %16 = vector.shape_cast %15 : vector<1x128x128xbf16> to vector<128x128xbf16>
    %cst_20 = arith.constant dense<0.000000e+00> : vector<20x128xf32>
    %17 = tpu.matmul %14, %16, %cst_20 {dimension_numbers = #tpu.dot_dimension_numbers<[1], [0], [0], [1], [0, 0, 1, 1], [], []>} : vector<20x128xbf16>, vector<128x128xbf16>, vector<20x128xf32> -> vector<20x128xf32>
    %18 = arith.addf %12, %17 : vector<20x128xf32>
    %c2 = arith.constant 2 : index
    %c0_21 = arith.constant 0 : index
    %19 = tpu.strided_load %arg0[%c2, %c0_21] {strides = array<i32: 2, 1>} : memref<48x128xf32, #tpu.memory_space<vmem>>, vector<20x128xf32>
    %20 = arith.truncf %19 : vector<20x128xf32> to vector<20x128xbf16>
    %c2_22 = arith.constant 2 : index
    %c0_23 = arith.constant 0 : index
    %c0_24 = arith.constant 0 : index
    %21 = vector.load %arg1[%c2_22, %c0_23, %c0_24] : memref<4x128x128xbf16, #tpu.memory_space<vmem>>, vector<1x128x128xbf16>
    %22 = vector.shape_cast %21 : vector<1x128x128xbf16> to vector<128x128xbf16>
    %cst_25 = arith.constant dense<0.000000e+00> : vector<20x128xf32>
    %23 = tpu.matmul %20, %22, %cst_25 {dimension_numbers = #tpu.dot_dimension_numbers<[1], [0], [0], [1], [0, 0, 1, 1], [], []>} : vector<20x128xbf16>, vector<128x128xbf16>, vector<20x128xf32> -> vector<20x128xf32>
    %24 = arith.addf %18, %23 : vector<20x128xf32>
    %c3 = arith.constant 3 : index
    %c0_26 = arith.constant 0 : index
    %25 = tpu.strided_load %arg0[%c3, %c0_26] {strides = array<i32: 2, 1>} : memref<48x128xf32, #tpu.memory_space<vmem>>, vector<20x128xf32>
    %26 = arith.truncf %25 : vector<20x128xf32> to vector<20x128xbf16>
    %c3_27 = arith.constant 3 : index
    %c0_28 = arith.constant 0 : index
    %c0_29 = arith.constant 0 : index
    %27 = vector.load %arg1[%c3_27, %c0_28, %c0_29] : memref<4x128x128xbf16, #tpu.memory_space<vmem>>, vector<1x128x128xbf16>
    %28 = vector.shape_cast %27 : vector<1x128x128xbf16> to vector<128x128xbf16>
    %cst_30 = arith.constant dense<0.000000e+00> : vector<20x128xf32>
    %29 = tpu.matmul %26, %28, %cst_30 {dimension_numbers = #tpu.dot_dimension_numbers<[1], [0], [0], [1], [0, 0, 1, 1], [], []>} : vector<20x128xbf16>, vector<128x128xbf16>, vector<20x128xf32> -> vector<20x128xf32>
    %30 = arith.addf %24, %29 : vector<20x128xf32>
    %c0_31 = arith.constant 0 : index
    %c0_32 = arith.constant 0 : index
    %31 = vector.load %arg2[%c0_31, %c0_32] : memref<1x128xf32, #tpu.memory_space<vmem>>, vector<1x128xf32>
    %32 = vector.broadcast %31 : vector<1x128xf32> to vector<20x128xf32>
    %33 = arith.addf %30, %32 : vector<20x128xf32>
    %cst_33 = arith.constant 0.000000e+00 : f32
    %34 = vector.broadcast %cst_33 : f32 to vector<20x128xf32>
    %35 = arith.cmpf ogt, %33, %34 : vector<20x128xf32>
    %cst_34 = arith.constant 2.000000e-01 : f32
    %36 = vector.broadcast %cst_34 : f32 to vector<20x128xf32>
    %37 = arith.mulf %36, %33 : vector<20x128xf32>
    %38 = arith.select %35, %33, %37 : vector<20x128xi1>, vector<20x128xf32>
    %39 = vector.extract_strided_slice %38 {offsets = [0, 0], sizes = [9, 128], strides = [1, 1]} : vector<20x128xf32> to vector<9x128xf32>
    %c2_35 = arith.constant 2 : index
    %c0_36 = arith.constant 0 : index
    %40 = vector.load %arg21[%c2_35, %c0_36] : memref<32x128xf32, #tpu.memory_space<vmem>>, vector<9x128xf32>
    tpu.vector_store %arg21[%c2_35, %c0_36], %39 {strides = array<i32>} : memref<32x128xf32, #tpu.memory_space<vmem>>, vector<9x128xf32>,
    %41 = vector.extract_strided_slice %38 {offsets = [10, 0], sizes = [9, 128], strides = [1, 1]} : vector<20x128xf32> to vector<9x128xf32>
    %c14 = arith.constant 14 : index
    %c0_37 = arith.constant 0 : index
    %42 = vector.load %arg21[%c14, %c0_37] : memref<32x128xf32, #tpu.memory_space<vmem>>, vector<9x128xf32>
    tpu.vector_store %arg21[%c14, %c0_37], %41 {strides = array<i32>} : memref<32x128xf32, #tpu.memory_space<vmem>>, vector<9x128xf32>,
    %c0_38 = arith.constant 0 : index
    %c0_39 = arith.constant 0 : index
    %43 = tpu.strided_load %arg21[%c0_38, %c0_39] {strides = array<i32: 2, 1>} : memref<32x128xf32, #tpu.memory_space<vmem>>, vector<12x128xf32>
    %44 = arith.truncf %43 : vector<12x128xf32> to vector<12x128xbf16>
    %c0_40 = arith.constant 0 : index
    %c0_41 = arith.constant 0 : index
    %c0_42 = arith.constant 0 : index
    %45 = vector.load %arg3[%c0_40, %c0_41, %c0_42] : memref<4x128x128xbf16, #tpu.memory_space<vmem>>, vector<1x128x128xbf16>
    %46 = vector.shape_cast %45 : vector<1x128x128xbf16> to vector<128x128xbf16>
    %cst_43 = arith.constant dense<0.000000e+00> : vector<12x128xf32>
    %47 = tpu.matmul %44, %46, %cst_43 {dimension_numbers = #tpu.dot_dimension_numbers<[1], [0], [0], [1], [0, 0, 1, 1], [], []>} : vector<12x128xbf16>, vector<128x128xbf16>, vector<12x128xf32> -> vector<12x128xf32>
    %c1_44 = arith.constant 1 : index
    %c0_45 = arith.constant 0 : index
    %48 = tpu.strided_load %arg21[%c1_44, %c0_45] {strides = array<i32: 2, 1>} : memref<32x128xf32, #tpu.memory_space<vmem>>, vector<12x128xf32>
    %49 = arith.truncf %48 : vector<12x128xf32> to vector<12x128xbf16>
    %c1_46 = arith.constant 1 : index
    %c0_47 = arith.constant 0 : index
    %c0_48 = arith.constant 0 : index
    %50 = vector.load %arg3[%c1_46, %c0_47, %c0_48] : memref<4x128x128xbf16, #tpu.memory_space<vmem>>, vector<1x128x128xbf16>
    %51 = vector.shape_cast %50 : vector<1x128x128xbf16> to vector<128x128xbf16>
    %cst_49 = arith.constant dense<0.000000e+00> : vector<12x128xf32>
    %52 = tpu.matmul %49, %51, %cst_49 {dimension_numbers = #tpu.dot_dimension_numbers<[1], [0], [0], [1], [0, 0, 1, 1], [], []>} : vector<12x128xbf16>, vector<128x128xbf16>, vector<12x128xf32> -> vector<12x128xf32>
    %53 = arith.addf %47, %52 : vector<12x128xf32>
    %c2_50 = arith.constant 2 : index
    %c0_51 = arith.constant 0 : index
    %54 = tpu.strided_load %arg21[%c2_50, %c0_51] {strides = array<i32: 2, 1>} : memref<32x128xf32, #tpu.memory_space<vmem>>, vector<12x128xf32>
    %55 = arith.truncf %54 : vector<12x128xf32> to vector<12x128xbf16>
    %c2_52 = arith.constant 2 : index
    %c0_53 = arith.constant 0 : index
    %c0_54 = arith.constant 0 : index
    %56 = vector.load %arg3[%c2_52, %c0_53, %c0_54] : memref<4x128x128xbf16, #tpu.memory_space<vmem>>, vector<1x128x128xbf16>
    %57 = vector.shape_cast %56 : vector<1x128x128xbf16> to vector<128x128xbf16>
    %cst_55 = arith.constant dense<0.000000e+00> : vector<12x128xf32>
    %58 = tpu.matmul %55, %57, %cst_55 {dimension_numbers = #tpu.dot_dimension_numbers<[1], [0], [0], [1], [0, 0, 1, 1], [], []>} : vector<12x128xbf16>, vector<128x128xbf16>, vector<12x128xf32> -> vector<12x128xf32>
    %59 = arith.addf %53, %58 : vector<12x128xf32>
    %c3_56 = arith.constant 3 : index
    %c0_57 = arith.constant 0 : index
    %60 = tpu.strided_load %arg21[%c3_56, %c0_57] {strides = array<i32: 2, 1>} : memref<32x128xf32, #tpu.memory_space<vmem>>, vector<12x128xf32>
    %61 = arith.truncf %60 : vector<12x128xf32> to vector<12x128xbf16>
    %c3_58 = arith.constant 3 : index
    %c0_59 = arith.constant 0 : index
    %c0_60 = arith.constant 0 : index
    %62 = vector.load %arg3[%c3_58, %c0_59, %c0_60] : memref<4x128x128xbf16, #tpu.memory_space<vmem>>, vector<1x128x128xbf16>
    %63 = vector.shape_cast %62 : vector<1x128x128xbf16> to vector<128x128xbf16>
    %cst_61 = arith.constant dense<0.000000e+00> : vector<12x128xf32>
    %64 = tpu.matmul %61, %63, %cst_61 {dimension_numbers = #tpu.dot_dimension_numbers<[1], [0], [0], [1], [0, 0, 1, 1], [], []>} : vector<12x128xbf16>, vector<128x128xbf16>, vector<12x128xf32> -> vector<12x128xf32>
    %65 = arith.addf %59, %64 : vector<12x128xf32>
    %66 = tpu.iota {dimensions = array<i32: 0>} : vector<12x128xi32>
    %c0_i32 = arith.constant 0 : i32
    %67 = vector.broadcast %c0_i32 : i32 to vector<12x128xi32>
    %68 = arith.cmpi sge, %66, %67 : vector<12x128xi32>
    %c5_i32 = arith.constant 5 : i32
    %69 = vector.broadcast %c5_i32 : i32 to vector<12x128xi32>
    %70 = arith.cmpi slt, %66, %69 : vector<12x128xi32>
    %71 = arith.andi %68, %70 : vector<12x128xi1>
    %c6_i32 = arith.constant 6 : i32
    %72 = vector.broadcast %c6_i32 : i32 to vector<12x128xi32>
    %73 = arith.cmpi sge, %66, %72 : vector<12x128xi32>
    %c11_i32 = arith.constant 11 : i32
    %74 = vector.broadcast %c11_i32 : i32 to vector<12x128xi32>
    %75 = arith.cmpi slt, %66, %74 : vector<12x128xi32>
    %76 = arith.andi %73, %75 : vector<12x128xi1>
    %77 = arith.ori %71, %76 : vector<12x128xi1>
    %cst_62 = arith.constant 0.000000e+00 : f32
    %78 = vector.broadcast %cst_62 : f32 to vector<12x128xf32>
    %79 = arith.select %77, %65, %78 : vector<12x128xi1>, vector<12x128xf32>
    %cst_63 = arith.constant dense<0.000000e+00> : vector<128xf32>
    %80 = vector.multi_reduction <add>, %79, %cst_63 [0] : vector<12x128xf32> to vector<128xf32>
    %81 = vector.shape_cast %80 : vector<128xf32> to vector<1x128xf32>
    %82 = arith.mulf %79, %79 : vector<12x128xf32>
    %cst_64 = arith.constant dense<0.000000e+00> : vector<128xf32>
    %83 = vector.multi_reduction <add>, %82, %cst_64 [0] : vector<12x128xf32> to vector<128xf32>
    %84 = vector.shape_cast %83 : vector<128xf32> to vector<1x128xf32>
    %85 = tpu.concatenate %81, %84 in 0 : vector<1x128xf32>, vector<1x128xf32> -> vector<2x128xf32>
    %c0_65 = arith.constant 0 : index
    %c0_66 = arith.constant 0 : index
    %86 = vector.load %arg6[%c0_65, %c0_66] : memref<128x128xf32, #tpu.memory_space<vmem>>, vector<128x128xf32>
    %cst_67 = arith.constant dense<0.000000e+00> : vector<2x128xf32>
    %87 = tpu.matmul %85, %86, %cst_67 {dimension_numbers = #tpu.dot_dimension_numbers<[1], [0], [0], [1], [0, 0, 1, 1], [], []>} : vector<2x128xf32>, vector<128x128xf32>, vector<2x128xf32> -> vector<2x128xf32>
    %88 = vector.extract_strided_slice %87 {offsets = [0, 0], sizes = [1, 128], strides = [1, 1]} : vector<2x128xf32> to vector<1x128xf32>
    %cst_68 = arith.constant 5.000000e+01 : f32
    %89 = vector.broadcast %cst_68 : f32 to vector<1x128xf32>
    %90 = arith.divf %88, %89 : vector<1x128xf32>
    %91 = vector.extract_strided_slice %87 {offsets = [1, 0], sizes = [1, 128], strides = [1, 1]} : vector<2x128xf32> to vector<1x128xf32>
    %cst_69 = arith.constant 5.000000e+01 : f32
    %92 = vector.broadcast %cst_69 : f32 to vector<1x128xf32>
    %93 = arith.divf %91, %92 : vector<1x128xf32>
    %94 = arith.mulf %90, %90 : vector<1x128xf32>
    %95 = arith.subf %93, %94 : vector<1x128xf32>
    %cst_70 = arith.constant 0.000000e+00 : f32
    %96 = vector.broadcast %cst_70 : f32 to vector<1x128xf32>
    %97 = arith.maximumf %95, %96 : vector<1x128xf32>
    %c0_71 = arith.constant 0 : index
    %c0_72 = arith.constant 0 : index
    %98 = vector.load %arg4[%c0_71, %c0_72] : memref<1x128xf32, #tpu.memory_space<vmem>>, vector<1x128xf32>
    %cst_73 = arith.constant 9.99999974E-6 : f32
    %99 = vector.broadcast %cst_73 : f32 to vector<1x128xf32>
    %100 = arith.addf %97, %99 : vector<1x128xf32>
    %101 = math.rsqrt %100 : vector<1x128xf32>
    %102 = arith.mulf %98, %101 : vector<1x128xf32>
    %c0_74 = arith.constant 0 : index
    %c0_75 = arith.constant 0 : index
    %103 = vector.load %arg5[%c0_74, %c0_75] : memref<1x128xf32, #tpu.memory_space<vmem>>, vector<1x128xf32>
    %104 = arith.mulf %90, %102 : vector<1x128xf32>
    %105 = arith.subf %103, %104 : vector<1x128xf32>
    %106 = tpu.concatenate %102, %105 in 0 : vector<1x128xf32>, vector<1x128xf32> -> vector<2x128xf32>
    %c0_76 = arith.constant 0 : index
    %c0_77 = arith.constant 0 : index
    %107 = vector.load %arg7[%c0_76, %c0_77] : memref<128x128xf32, #tpu.memory_space<vmem>>, vector<128x128xf32>
    %cst_78 = arith.constant dense<0.000000e+00> : vector<2x128xf32>
    %108 = tpu.matmul %106, %107, %cst_78 {dimension_numbers = #tpu.dot_dimension_numbers<[1], [0], [0], [1], [0, 0, 1, 1], [], []>} : vector<2x128xf32>, vector<128x128xf32>, vector<2x128xf32> -> vector<2x128xf32>
    %109 = vector.extract_strided_slice %108 {offsets = [0, 0], sizes = [1, 128], strides = [1, 1]} : vector<2x128xf32> to vector<1x128xf32>
    %110 = vector.broadcast %109 : vector<1x128xf32> to vector<12x128xf32>
    %111 = arith.mulf %79, %110 : vector<12x128xf32>
    %112 = vector.extract_strided_slice %108 {offsets = [1, 0], sizes = [1, 128], strides = [1, 1]} : vector<2x128xf32> to vector<1x128xf32>
    %113 = vector.broadcast %112 : vector<1x128xf32> to vector<12x128xf32>
    %114 = arith.addf %111, %113 : vector<12x128xf32>
    %cst_79 = arith.constant 0.000000e+00 : f32
    %115 = vector.broadcast %cst_79 : f32 to vector<12x128xf32>
    %116 = arith.cmpf ogt, %114, %115 : vector<12x128xf32>
    %cst_80 = arith.constant 2.000000e-01 : f32
    %117 = vector.broadcast %cst_80 : f32 to vector<12x128xf32>
    %118 = arith.mulf %117, %114 : vector<12x128xf32>
    %119 = arith.select %116, %114, %118 : vector<12x128xi1>, vector<12x128xf32>
    %120 = vector.extract_strided_slice %119 {offsets = [0, 0], sizes = [5, 128], strides = [1, 1]} : vector<12x128xf32> to vector<5x128xf32>
    %c2_81 = arith.constant 2 : index
    %c0_82 = arith.constant 0 : index
    %121 = vector.load %arg22[%c2_81, %c0_82] : memref<24x128xf32, #tpu.memory_space<vmem>>, vector<5x128xf32>
    tpu.vector_store %arg22[%c2_81, %c0_82], %120 {strides = array<i32>} : memref<24x128xf32, #tpu.memory_space<vmem>>, vector<5x128xf32>,
    %122 = vector.extract_strided_slice %119 {offsets = [6, 0], sizes = [5, 128], strides = [1, 1]} : vector<12x128xf32> to vector<5x128xf32>
    %c10 = arith.constant 10 : index
    %c0_83 = arith.constant 0 : index
    %123 = vector.load %arg22[%c10, %c0_83] : memref<24x128xf32, #tpu.memory_space<vmem>>, vector<5x128xf32>
    tpu.vector_store %arg22[%c10, %c0_83], %122 {strides = array<i32>} : memref<24x128xf32, #tpu.memory_space<vmem>>, vector<5x128xf32>,
    %c0_84 = arith.constant 0 : index
    %c0_85 = arith.constant 0 : index
    %124 = tpu.strided_load %arg22[%c0_84, %c0_85] {strides = array<i32: 2, 1>} : memref<24x128xf32, #tpu.memory_space<vmem>>, vector<8x128xf32>
    %125 = arith.truncf %124 : vector<8x128xf32> to vector<8x128xbf16>
    %c0_86 = arith.constant 0 : index
    %c0_87 = arith.constant 0 : index
    %c0_88 = arith.constant 0 : index
    %126 = vector.load %arg8[%c0_86, %c0_87, %c0_88] : memref<4x128x128xbf16, #tpu.memory_space<vmem>>, vector<1x128x128xbf16>
    %127 = vector.shape_cast %126 : vector<1x128x128xbf16> to vector<128x128xbf16>
    %cst_89 = arith.constant dense<0.000000e+00> : vector<8x128xf32>
    %128 = tpu.matmul %125, %127, %cst_89 {dimension_numbers = #tpu.dot_dimension_numbers<[1], [0], [0], [1], [0, 0, 1, 1], [], []>} : vector<8x128xbf16>, vector<128x128xbf16>, vector<8x128xf32> -> vector<8x128xf32>
    %c1_90 = arith.constant 1 : index
    %c0_91 = arith.constant 0 : index
    %129 = tpu.strided_load %arg22[%c1_90, %c0_91] {strides = array<i32: 2, 1>} : memref<24x128xf32, #tpu.memory_space<vmem>>, vector<8x128xf32>
    %130 = arith.truncf %129 : vector<8x128xf32> to vector<8x128xbf16>
    %c1_92 = arith.constant 1 : index
    %c0_93 = arith.constant 0 : index
    %c0_94 = arith.constant 0 : index
    %131 = vector.load %arg8[%c1_92, %c0_93, %c0_94] : memref<4x128x128xbf16, #tpu.memory_space<vmem>>, vector<1x128x128xbf16>
    %132 = vector.shape_cast %131 : vector<1x128x128xbf16> to vector<128x128xbf16>
    %cst_95 = arith.constant dense<0.000000e+00> : vector<8x128xf32>
    %133 = tpu.matmul %130, %132, %cst_95 {dimension_numbers = #tpu.dot_dimension_numbers<[1], [0], [0], [1], [0, 0, 1, 1], [], []>} : vector<8x128xbf16>, vector<128x128xbf16>, vector<8x128xf32> -> vector<8x128xf32>
    %134 = arith.addf %128, %133 : vector<8x128xf32>
    %c2_96 = arith.constant 2 : index
    %c0_97 = arith.constant 0 : index
    %135 = tpu.strided_load %arg22[%c2_96, %c0_97] {strides = array<i32: 2, 1>} : memref<24x128xf32, #tpu.memory_space<vmem>>, vector<8x128xf32>
    %136 = arith.truncf %135 : vector<8x128xf32> to vector<8x128xbf16>
    %c2_98 = arith.constant 2 : index
    %c0_99 = arith.constant 0 : index
    %c0_100 = arith.constant 0 : index
    %137 = vector.load %arg8[%c2_98, %c0_99, %c0_100] : memref<4x128x128xbf16, #tpu.memory_space<vmem>>, vector<1x128x128xbf16>
    %138 = vector.shape_cast %137 : vector<1x128x128xbf16> to vector<128x128xbf16>
    %cst_101 = arith.constant dense<0.000000e+00> : vector<8x128xf32>
    %139 = tpu.matmul %136, %138, %cst_101 {dimension_numbers = #tpu.dot_dimension_numbers<[1], [0], [0], [1], [0, 0, 1, 1], [], []>} : vector<8x128xbf16>, vector<128x128xbf16>, vector<8x128xf32> -> vector<8x128xf32>
    %140 = arith.addf %134, %139 : vector<8x128xf32>
    %c3_102 = arith.constant 3 : index
    %c0_103 = arith.constant 0 : index
    %141 = tpu.strided_load %arg22[%c3_102, %c0_103] {strides = array<i32: 2, 1>} : memref<24x128xf32, #tpu.memory_space<vmem>>, vector<8x128xf32>
    %142 = arith.truncf %141 : vector<8x128xf32> to vector<8x128xbf16>
    %c3_104 = arith.constant 3 : index
    %c0_105 = arith.constant 0 : index
    %c0_106 = arith.constant 0 : index
    %143 = vector.load %arg8[%c3_104, %c0_105, %c0_106] : memref<4x128x128xbf16, #tpu.memory_space<vmem>>, vector<1x128x128xbf16>
    %144 = vector.shape_cast %143 : vector<1x128x128xbf16> to vector<128x128xbf16>
    %cst_107 = arith.constant dense<0.000000e+00> : vector<8x128xf32>
    %145 = tpu.matmul %142, %144, %cst_107 {dimension_numbers = #tpu.dot_dimension_numbers<[1], [0], [0], [1], [0, 0, 1, 1], [], []>} : vector<8x128xbf16>, vector<128x128xbf16>, vector<8x128xf32> -> vector<8x128xf32>
    %146 = arith.addf %140, %145 : vector<8x128xf32>
    %147 = tpu.iota {dimensions = array<i32: 0>} : vector<8x128xi32>
    %c0_i32_108 = arith.constant 0 : i32
    %148 = vector.broadcast %c0_i32_108 : i32 to vector<8x128xi32>
    %149 = arith.cmpi sge, %147, %148 : vector<8x128xi32>
    %c3_i32 = arith.constant 3 : i32
    %150 = vector.broadcast %c3_i32 : i32 to vector<8x128xi32>
    %151 = arith.cmpi slt, %147, %150 : vector<8x128xi32>
    %152 = arith.andi %149, %151 : vector<8x128xi1>
    %c4_i32 = arith.constant 4 : i32
    %153 = vector.broadcast %c4_i32 : i32 to vector<8x128xi32>
    %154 = arith.cmpi sge, %147, %153 : vector<8x128xi32>
    %c7_i32 = arith.constant 7 : i32
    %155 = vector.broadcast %c7_i32 : i32 to vector<8x128xi32>
    %156 = arith.cmpi slt, %147, %155 : vector<8x128xi32>
    %157 = arith.andi %154, %156 : vector<8x128xi1>
    %158 = arith.ori %152, %157 : vector<8x128xi1>
    %cst_109 = arith.constant 0.000000e+00 : f32
    %159 = vector.broadcast %cst_109 : f32 to vector<8x128xf32>
    %160 = arith.select %158, %146, %159 : vector<8x128xi1>, vector<8x128xf32>
    %cst_110 = arith.constant dense<0.000000e+00> : vector<128xf32>
    %161 = vector.multi_reduction <add>, %160, %cst_110 [0] : vector<8x128xf32> to vector<128xf32>
    %162 = vector.shape_cast %161 : vector<128xf32> to vector<1x128xf32>
    %163 = arith.mulf %160, %160 : vector<8x128xf32>
    %cst_111 = arith.constant dense<0.000000e+00> : vector<128xf32>
    %164 = vector.multi_reduction <add>, %163, %cst_111 [0] : vector<8x128xf32> to vector<128xf32>
    %165 = vector.shape_cast %164 : vector<128xf32> to vector<1x128xf32>
    %166 = tpu.concatenate %162, %165 in 0 : vector<1x128xf32>, vector<1x128xf32> -> vector<2x128xf32>
    %c0_112 = arith.constant 0 : index
    %c0_113 = arith.constant 0 : index
    %167 = vector.load %arg11[%c0_112, %c0_113] : memref<128x128xf32, #tpu.memory_space<vmem>>, vector<128x128xf32>
    %cst_114 = arith.constant dense<0.000000e+00> : vector<2x128xf32>
    %168 = tpu.matmul %166, %167, %cst_114 {dimension_numbers = #tpu.dot_dimension_numbers<[1], [0], [0], [1], [0, 0, 1, 1], [], []>} : vector<2x128xf32>, vector<128x128xf32>, vector<2x128xf32> -> vector<2x128xf32>
    %169 = vector.extract_strided_slice %168 {offsets = [0, 0], sizes = [1, 128], strides = [1, 1]} : vector<2x128xf32> to vector<1x128xf32>
    %cst_115 = arith.constant 1.800000e+01 : f32
    %170 = vector.broadcast %cst_115 : f32 to vector<1x128xf32>
    %171 = arith.divf %169, %170 : vector<1x128xf32>
    %172 = vector.extract_strided_slice %168 {offsets = [1, 0], sizes = [1, 128], strides = [1, 1]} : vector<2x128xf32> to vector<1x128xf32>
    %cst_116 = arith.constant 1.800000e+01 : f32
    %173 = vector.broadcast %cst_116 : f32 to vector<1x128xf32>
    %174 = arith.divf %172, %173 : vector<1x128xf32>
    %175 = arith.mulf %171, %171 : vector<1x128xf32>
    %176 = arith.subf %174, %175 : vector<1x128xf32>
    %cst_117 = arith.constant 0.000000e+00 : f32
    %177 = vector.broadcast %cst_117 : f32 to vector<1x128xf32>
    %178 = arith.maximumf %176, %177 : vector<1x128xf32>
    %c0_118 = arith.constant 0 : index
    %c0_119 = arith.constant 0 : index
    %179 = vector.load %arg9[%c0_118, %c0_119] : memref<1x128xf32, #tpu.memory_space<vmem>>, vector<1x128xf32>
    %cst_120 = arith.constant 9.99999974E-6 : f32
    %180 = vector.broadcast %cst_120 : f32 to vector<1x128xf32>
    %181 = arith.addf %178, %180 : vector<1x128xf32>
    %182 = math.rsqrt %181 : vector<1x128xf32>
    %183 = arith.mulf %179, %182 : vector<1x128xf32>
    %c0_121 = arith.constant 0 : index
    %c0_122 = arith.constant 0 : index
    %184 = vector.load %arg10[%c0_121, %c0_122] : memref<1x128xf32, #tpu.memory_space<vmem>>, vector<1x128xf32>
    %185 = arith.mulf %171, %183 : vector<1x128xf32>
    %186 = arith.subf %184, %185 : vector<1x128xf32>
    %187 = tpu.concatenate %183, %186 in 0 : vector<1x128xf32>, vector<1x128xf32> -> vector<2x128xf32>
    %c0_123 = arith.constant 0 : index
    %c0_124 = arith.constant 0 : index
    %188 = vector.load %arg12[%c0_123, %c0_124] : memref<128x128xf32, #tpu.memory_space<vmem>>, vector<128x128xf32>
    %cst_125 = arith.constant dense<0.000000e+00> : vector<2x128xf32>
    %189 = tpu.matmul %187, %188, %cst_125 {dimension_numbers = #tpu.dot_dimension_numbers<[1], [0], [0], [1], [0, 0, 1, 1], [], []>} : vector<2x128xf32>, vector<128x128xf32>, vector<2x128xf32> -> vector<2x128xf32>
    %190 = vector.extract_strided_slice %189 {offsets = [0, 0], sizes = [1, 128], strides = [1, 1]} : vector<2x128xf32> to vector<1x128xf32>
    %191 = vector.broadcast %190 : vector<1x128xf32> to vector<8x128xf32>
    %192 = arith.mulf %160, %191 : vector<8x128xf32>
    %193 = vector.extract_strided_slice %189 {offsets = [1, 0], sizes = [1, 128], strides = [1, 1]} : vector<2x128xf32> to vector<1x128xf32>
    %194 = vector.broadcast %193 : vector<1x128xf32> to vector<8x128xf32>
    %195 = arith.addf %192, %194 : vector<8x128xf32>
    %cst_126 = arith.constant 0.000000e+00 : f32
    %196 = vector.broadcast %cst_126 : f32 to vector<8x128xf32>
    %197 = arith.cmpf ogt, %195, %196 : vector<8x128xf32>
    %cst_127 = arith.constant 2.000000e-01 : f32
    %198 = vector.broadcast %cst_127 : f32 to vector<8x128xf32>
    %199 = arith.mulf %198, %195 : vector<8x128xf32>
    %200 = arith.select %197, %195, %199 : vector<8x128xi1>, vector<8x128xf32>
    %201 = vector.extract_strided_slice %200 {offsets = [0, 0], sizes = [3, 128], strides = [1, 1]} : vector<8x128xf32> to vector<3x128xf32>
    %c2_128 = arith.constant 2 : index
    %c0_129 = arith.constant 0 : index
    %202 = vector.load %arg23[%c2_128, %c0_129] : memref<22x128xf32, #tpu.memory_space<vmem>>, vector<3x128xf32>
    tpu.vector_store %arg23[%c2_128, %c0_129], %201 {strides = array<i32>} : memref<22x128xf32, #tpu.memory_space<vmem>>, vector<3x128xf32>,
    %203 = vector.extract_strided_slice %200 {offsets = [4, 0], sizes = [3, 128], strides = [1, 1]} : vector<8x128xf32> to vector<3x128xf32>
    %c9 = arith.constant 9 : index
    %c0_130 = arith.constant 0 : index
    %204 = vector.load %arg23[%c9, %c0_130] : memref<22x128xf32, #tpu.memory_space<vmem>>, vector<3x128xf32>
    tpu.vector_store %arg23[%c9, %c0_130], %203 {strides = array<i32>} : memref<22x128xf32, #tpu.memory_space<vmem>>, vector<3x128xf32>,
    %c0_131 = arith.constant 0 : index
    %c0_132 = arith.constant 0 : index
    %205 = vector.load %arg23[%c0_131, %c0_132] : memref<22x128xf32, #tpu.memory_space<vmem>>, vector<14x128xf32>
    %206 = arith.truncf %205 : vector<14x128xf32> to vector<14x128xbf16>
    %c0_133 = arith.constant 0 : index
    %c0_134 = arith.constant 0 : index
    %c0_135 = arith.constant 0 : index
    %207 = vector.load %arg13[%c0_133, %c0_134, %c0_135] : memref<4x128x256xbf16, #tpu.memory_space<vmem>>, vector<1x128x256xbf16>
    %208 = vector.shape_cast %207 : vector<1x128x256xbf16> to vector<128x256xbf16>
    %cst_136 = arith.constant dense<0.000000e+00> : vector<14x256xf32>
    %209 = tpu.matmul %206, %208, %cst_136 {dimension_numbers = #tpu.dot_dimension_numbers<[1], [0], [0], [1], [0, 0, 1, 1], [], []>} : vector<14x128xbf16>, vector<128x256xbf16>, vector<14x256xf32> -> vector<14x256xf32>
    %c1_137 = arith.constant 1 : index
    %c0_138 = arith.constant 0 : index
    %210 = vector.load %arg23[%c1_137, %c0_138] : memref<22x128xf32, #tpu.memory_space<vmem>>, vector<14x128xf32>
    %211 = arith.truncf %210 : vector<14x128xf32> to vector<14x128xbf16>
    %c1_139 = arith.constant 1 : index
    %c0_140 = arith.constant 0 : index
    %c0_141 = arith.constant 0 : index
    %212 = vector.load %arg13[%c1_139, %c0_140, %c0_141] : memref<4x128x256xbf16, #tpu.memory_space<vmem>>, vector<1x128x256xbf16>
    %213 = vector.shape_cast %212 : vector<1x128x256xbf16> to vector<128x256xbf16>
    %cst_142 = arith.constant dense<0.000000e+00> : vector<14x256xf32>
    %214 = tpu.matmul %211, %213, %cst_142 {dimension_numbers = #tpu.dot_dimension_numbers<[1], [0], [0], [1], [0, 0, 1, 1], [], []>} : vector<14x128xbf16>, vector<128x256xbf16>, vector<14x256xf32> -> vector<14x256xf32>
    %215 = arith.addf %209, %214 : vector<14x256xf32>
    %c2_143 = arith.constant 2 : index
    %c0_144 = arith.constant 0 : index
    %216 = vector.load %arg23[%c2_143, %c0_144] : memref<22x128xf32, #tpu.memory_space<vmem>>, vector<14x128xf32>
    %217 = arith.truncf %216 : vector<14x128xf32> to vector<14x128xbf16>
    %c2_145 = arith.constant 2 : index
    %c0_146 = arith.constant 0 : index
    %c0_147 = arith.constant 0 : index
    %218 = vector.load %arg13[%c2_145, %c0_146, %c0_147] : memref<4x128x256xbf16, #tpu.memory_space<vmem>>, vector<1x128x256xbf16>
    %219 = vector.shape_cast %218 : vector<1x128x256xbf16> to vector<128x256xbf16>
    %cst_148 = arith.constant dense<0.000000e+00> : vector<14x256xf32>
    %220 = tpu.matmul %217, %219, %cst_148 {dimension_numbers = #tpu.dot_dimension_numbers<[1], [0], [0], [1], [0, 0, 1, 1], [], []>} : vector<14x128xbf16>, vector<128x256xbf16>, vector<14x256xf32> -> vector<14x256xf32>
    %221 = arith.addf %215, %220 : vector<14x256xf32>
    %c3_149 = arith.constant 3 : index
    %c0_150 = arith.constant 0 : index
    %222 = vector.load %arg23[%c3_149, %c0_150] : memref<22x128xf32, #tpu.memory_space<vmem>>, vector<14x128xf32>
    %223 = arith.truncf %222 : vector<14x128xf32> to vector<14x128xbf16>
    %c3_151 = arith.constant 3 : index
    %c0_152 = arith.constant 0 : index
    %c0_153 = arith.constant 0 : index
    %224 = vector.load %arg13[%c3_151, %c0_152, %c0_153] : memref<4x128x256xbf16, #tpu.memory_space<vmem>>, vector<1x128x256xbf16>
    %225 = vector.shape_cast %224 : vector<1x128x256xbf16> to vector<128x256xbf16>
    %cst_154 = arith.constant dense<0.000000e+00> : vector<14x256xf32>
    %226 = tpu.matmul %223, %225, %cst_154 {dimension_numbers = #tpu.dot_dimension_numbers<[1], [0], [0], [1], [0, 0, 1, 1], [], []>} : vector<14x128xbf16>, vector<128x256xbf16>, vector<14x256xf32> -> vector<14x256xf32>
    %227 = arith.addf %221, %226 : vector<14x256xf32>
    %228 = tpu.iota {dimensions = array<i32: 0>} : vector<14x256xi32>
    %c0_i32_155 = arith.constant 0 : i32
    %229 = vector.broadcast %c0_i32_155 : i32 to vector<14x256xi32>
    %230 = arith.cmpi sge, %228, %229 : vector<14x256xi32>
    %c4_i32_156 = arith.constant 4 : i32
    %231 = vector.broadcast %c4_i32_156 : i32 to vector<14x256xi32>
    %232 = arith.cmpi slt, %228, %231 : vector<14x256xi32>
    %233 = arith.andi %230, %232 : vector<14x256xi1>
    %c7_i32_157 = arith.constant 7 : i32
    %234 = vector.broadcast %c7_i32_157 : i32 to vector<14x256xi32>
    %235 = arith.cmpi sge, %228, %234 : vector<14x256xi32>
    %c11_i32_158 = arith.constant 11 : i32
    %236 = vector.broadcast %c11_i32_158 : i32 to vector<14x256xi32>
    %237 = arith.cmpi slt, %228, %236 : vector<14x256xi32>
    %238 = arith.andi %235, %237 : vector<14x256xi1>
    %239 = arith.ori %233, %238 : vector<14x256xi1>
    %cst_159 = arith.constant 0.000000e+00 : f32
    %240 = vector.broadcast %cst_159 : f32 to vector<14x256xf32>
    %241 = arith.select %239, %227, %240 : vector<14x256xi1>, vector<14x256xf32>
    %cst_160 = arith.constant dense<0.000000e+00> : vector<256xf32>
    %242 = vector.multi_reduction <add>, %241, %cst_160 [0] : vector<14x256xf32> to vector<256xf32>
    %243 = vector.shape_cast %242 : vector<256xf32> to vector<1x256xf32>
    %244 = arith.mulf %241, %241 : vector<14x256xf32>
    %cst_161 = arith.constant dense<0.000000e+00> : vector<256xf32>
    %245 = vector.multi_reduction <add>, %244, %cst_161 [0] : vector<14x256xf32> to vector<256xf32>
    %246 = vector.shape_cast %245 : vector<256xf32> to vector<1x256xf32>
    %247 = tpu.concatenate %243, %246 in 0 : vector<1x256xf32>, vector<1x256xf32> -> vector<2x256xf32>
    %c0_162 = arith.constant 0 : index
    %c0_163 = arith.constant 0 : index
    %248 = vector.load %arg16[%c0_162, %c0_163] : memref<256x128xf32, #tpu.memory_space<vmem>>, vector<256x128xf32>
    %cst_164 = arith.constant dense<0.000000e+00> : vector<2x128xf32>
    %249 = tpu.matmul %247, %248, %cst_164 {dimension_numbers = #tpu.dot_dimension_numbers<[1], [0], [0], [1], [0, 0, 1, 1], [], []>} : vector<2x256xf32>, vector<256x128xf32>, vector<2x128xf32> -> vector<2x128xf32>
    %250 = vector.extract_strided_slice %249 {offsets = [0, 0], sizes = [1, 128], strides = [1, 1]} : vector<2x128xf32> to vector<1x128xf32>
    %cst_165 = arith.constant 3.200000e+01 : f32
    %251 = vector.broadcast %cst_165 : f32 to vector<1x128xf32>
    %252 = arith.divf %250, %251 : vector<1x128xf32>
    %253 = vector.extract_strided_slice %249 {offsets = [1, 0], sizes = [1, 128], strides = [1, 1]} : vector<2x128xf32> to vector<1x128xf32>
    %cst_166 = arith.constant 3.200000e+01 : f32
    %254 = vector.broadcast %cst_166 : f32 to vector<1x128xf32>
    %255 = arith.divf %253, %254 : vector<1x128xf32>
    %256 = arith.mulf %252, %252 : vector<1x128xf32>
    %257 = arith.subf %255, %256 : vector<1x128xf32>
    %cst_167 = arith.constant 0.000000e+00 : f32
    %258 = vector.broadcast %cst_167 : f32 to vector<1x128xf32>
    %259 = arith.maximumf %257, %258 : vector<1x128xf32>
    %c0_168 = arith.constant 0 : index
    %c0_169 = arith.constant 0 : index
    %260 = vector.load %arg14[%c0_168, %c0_169] : memref<1x128xf32, #tpu.memory_space<vmem>>, vector<1x128xf32>
    %cst_170 = arith.constant 9.99999974E-6 : f32
    %261 = vector.broadcast %cst_170 : f32 to vector<1x128xf32>
    %262 = arith.addf %259, %261 : vector<1x128xf32>
    %263 = math.rsqrt %262 : vector<1x128xf32>
    %264 = arith.mulf %260, %263 : vector<1x128xf32>
    %c0_171 = arith.constant 0 : index
    %c0_172 = arith.constant 0 : index
    %265 = vector.load %arg15[%c0_171, %c0_172] : memref<1x128xf32, #tpu.memory_space<vmem>>, vector<1x128xf32>
    %266 = arith.mulf %252, %264 : vector<1x128xf32>
    %267 = arith.subf %265, %266 : vector<1x128xf32>
    %268 = tpu.concatenate %264, %267 in 0 : vector<1x128xf32>, vector<1x128xf32> -> vector<2x128xf32>
    %c0_173 = arith.constant 0 : index
    %c0_174 = arith.constant 0 : index
    %269 = vector.load %arg17[%c0_173, %c0_174] : memref<128x256xf32, #tpu.memory_space<vmem>>, vector<128x256xf32>
    %cst_175 = arith.constant dense<0.000000e+00> : vector<2x256xf32>
    %270 = tpu.matmul %268, %269, %cst_175 {dimension_numbers = #tpu.dot_dimension_numbers<[1], [0], [0], [1], [0, 0, 1, 1], [], []>} : vector<2x128xf32>, vector<128x256xf32>, vector<2x256xf32> -> vector<2x256xf32>
    %271 = vector.extract_strided_slice %270 {offsets = [0, 0], sizes = [1, 256], strides = [1, 1]} : vector<2x256xf32> to vector<1x256xf32>
    %272 = vector.broadcast %271 : vector<1x256xf32> to vector<14x256xf32>
    %273 = arith.mulf %241, %272 : vector<14x256xf32>
    %274 = vector.extract_strided_slice %270 {offsets = [1, 0], sizes = [1, 256], strides = [1, 1]} : vector<2x256xf32> to vector<1x256xf32>
    %275 = vector.broadcast %274 : vector<1x256xf32> to vector<14x256xf32>
    %276 = arith.addf %273, %275 : vector<14x256xf32>
    %cst_176 = arith.constant 0.000000e+00 : f32
    %277 = vector.broadcast %cst_176 : f32 to vector<14x256xf32>
    %278 = arith.cmpf ogt, %276, %277 : vector<14x256xf32>
    %cst_177 = arith.constant 2.000000e-01 : f32
    %279 = vector.broadcast %cst_177 : f32 to vector<14x256xf32>
    %280 = arith.mulf %279, %276 : vector<14x256xf32>
    %281 = arith.select %278, %276, %280 : vector<14x256xi1>, vector<14x256xf32>
    %282 = vector.extract_strided_slice %281 {offsets = [0, 0], sizes = [4, 256], strides = [1, 1]} : vector<14x256xf32> to vector<4x256xf32>
    %c2_178 = arith.constant 2 : index
    %c0_179 = arith.constant 0 : index
    %283 = vector.load %arg24[%c2_178, %c0_179] : memref<24x256xf32, #tpu.memory_space<vmem>>, vector<4x256xf32>
    tpu.vector_store %arg24[%c2_178, %c0_179], %282 {strides = array<i32>} : memref<24x256xf32, #tpu.memory_space<vmem>>, vector<4x256xf32>,
    %284 = vector.extract_strided_slice %281 {offsets = [7, 0], sizes = [4, 256], strides = [1, 1]} : vector<14x256xf32> to vector<4x256xf32>
    %c10_180 = arith.constant 10 : index
    %c0_181 = arith.constant 0 : index
    %285 = vector.load %arg24[%c10_180, %c0_181] : memref<24x256xf32, #tpu.memory_space<vmem>>, vector<4x256xf32>
    tpu.vector_store %arg24[%c10_180, %c0_181], %284 {strides = array<i32>} : memref<24x256xf32, #tpu.memory_space<vmem>>, vector<4x256xf32>,
    %c0_182 = arith.constant 0 : index
    %c0_183 = arith.constant 0 : index
    %286 = vector.load %arg24[%c0_182, %c0_183] : memref<24x256xf32, #tpu.memory_space<vmem>>, vector<16x256xf32>
    %287 = arith.truncf %286 : vector<16x256xf32> to vector<16x256xbf16>
    %c0_184 = arith.constant 0 : index
    %c0_185 = arith.constant 0 : index
    %c0_186 = arith.constant 0 : index
    %288 = vector.load %arg18[%c0_184, %c0_185, %c0_186] : memref<4x256x128xbf16, #tpu.memory_space<vmem>>, vector<1x256x128xbf16>
    %289 = vector.shape_cast %288 : vector<1x256x128xbf16> to vector<256x128xbf16>
    %cst_187 = arith.constant dense<0.000000e+00> : vector<16x128xf32>
    %290 = tpu.matmul %287, %289, %cst_187 {dimension_numbers = #tpu.dot_dimension_numbers<[1], [0], [0], [1], [0, 0, 1, 1], [], []>} : vector<16x256xbf16>, vector<256x128xbf16>, vector<16x128xf32> -> vector<16x128xf32>
    %c1_188 = arith.constant 1 : index
    %c0_189 = arith.constant 0 : index
    %291 = vector.load %arg24[%c1_188, %c0_189] : memref<24x256xf32, #tpu.memory_space<vmem>>, vector<16x256xf32>
    %292 = arith.truncf %291 : vector<16x256xf32> to vector<16x256xbf16>
    %c1_190 = arith.constant 1 : index
    %c0_191 = arith.constant 0 : index
    %c0_192 = arith.constant 0 : index
    %293 = vector.load %arg18[%c1_190, %c0_191, %c0_192] : memref<4x256x128xbf16, #tpu.memory_space<vmem>>, vector<1x256x128xbf16>
    %294 = vector.shape_cast %293 : vector<1x256x128xbf16> to vector<256x128xbf16>
    %cst_193 = arith.constant dense<0.000000e+00> : vector<16x128xf32>
    %295 = tpu.matmul %292, %294, %cst_193 {dimension_numbers = #tpu.dot_dimension_numbers<[1], [0], [0], [1], [0, 0, 1, 1], [], []>} : vector<16x256xbf16>, vector<256x128xbf16>, vector<16x128xf32> -> vector<16x128xf32>
    %296 = arith.addf %290, %295 : vector<16x128xf32>
    %c2_194 = arith.constant 2 : index
    %c0_195 = arith.constant 0 : index
    %297 = vector.load %arg24[%c2_194, %c0_195] : memref<24x256xf32, #tpu.memory_space<vmem>>, vector<16x256xf32>
    %298 = arith.truncf %297 : vector<16x256xf32> to vector<16x256xbf16>
    %c2_196 = arith.constant 2 : index
    %c0_197 = arith.constant 0 : index
    %c0_198 = arith.constant 0 : index
    %299 = vector.load %arg18[%c2_196, %c0_197, %c0_198] : memref<4x256x128xbf16, #tpu.memory_space<vmem>>, vector<1x256x128xbf16>
    %300 = vector.shape_cast %299 : vector<1x256x128xbf16> to vector<256x128xbf16>
    %cst_199 = arith.constant dense<0.000000e+00> : vector<16x128xf32>
    %301 = tpu.matmul %298, %300, %cst_199 {dimension_numbers = #tpu.dot_dimension_numbers<[1], [0], [0], [1], [0, 0, 1, 1], [], []>} : vector<16x256xbf16>, vector<256x128xbf16>, vector<16x128xf32> -> vector<16x128xf32>
    %302 = arith.addf %296, %301 : vector<16x128xf32>
    %c3_200 = arith.constant 3 : index
    %c0_201 = arith.constant 0 : index
    %303 = vector.load %arg24[%c3_200, %c0_201] : memref<24x256xf32, #tpu.memory_space<vmem>>, vector<16x256xf32>
    %304 = arith.truncf %303 : vector<16x256xf32> to vector<16x256xbf16>
    %c3_202 = arith.constant 3 : index
    %c0_203 = arith.constant 0 : index
    %c0_204 = arith.constant 0 : index
    %305 = vector.load %arg18[%c3_202, %c0_203, %c0_204] : memref<4x256x128xbf16, #tpu.memory_space<vmem>>, vector<1x256x128xbf16>
    %306 = vector.shape_cast %305 : vector<1x256x128xbf16> to vector<256x128xbf16>
    %cst_205 = arith.constant dense<0.000000e+00> : vector<16x128xf32>
    %307 = tpu.matmul %304, %306, %cst_205 {dimension_numbers = #tpu.dot_dimension_numbers<[1], [0], [0], [1], [0, 0, 1, 1], [], []>} : vector<16x256xbf16>, vector<256x128xbf16>, vector<16x128xf32> -> vector<16x128xf32>
    %308 = arith.addf %302, %307 : vector<16x128xf32>
    %c0_206 = arith.constant 0 : index
    %c0_207 = arith.constant 0 : index
    %309 = vector.load %arg19[%c0_206, %c0_207] : memref<1x128xf32, #tpu.memory_space<vmem>>, vector<1x128xf32>
    %310 = vector.broadcast %309 : vector<1x128xf32> to vector<16x128xf32>
    %311 = arith.addf %308, %310 : vector<16x128xf32>
    %c0_208 = arith.constant 0 : index
    %c0_209 = arith.constant 0 : index
    %312 = vector.load %arg20[%c0_208, %c0_209] : memref<16x128xf32, #tpu.memory_space<vmem>>, vector<16x128xf32>
    tpu.vector_store %arg20[%c0_208, %c0_209], %311 {strides = array<i32>} : memref<16x128xf32, #tpu.memory_space<vmem>>, vector<16x128xf32>,
    return
  }
}

</mosaic_0001>

<bundles_post_ra>
// kernel: _lambda_.1
= control target key start
LH: loop header
LB: loop body
LE: loop exit
PB: predicated region body
PF: predicated region fallthrough
CT: control target
= control target key end

     0   :  { %s6355_s0 = inlined_call_operand.vmem [shape: f32[48,128], index: 0, kind: input, shape index: {}]   ;;  %s6356_s1 = inlined_call_operand.hbm [shape: bf16[4,128,128], index: 1, kind: input, shape index: {}]   ;;  %s6357_s2 = inlined_call_operand.vmem [shape: f32[1,128], index: 2, kind: input, shape index: {}]   ;;  %s6358_s3 = inlined_call_operand.hbm [shape: bf16[4,128,128], index: 3, kind: input, shape index: {}]   ;;  %s6359_s4 = inlined_call_operand.vmem [shape: f32[1,128], index: 4, kind: input, shape index: {}]   ;;  %s6360_s5 = inlined_call_operand.vmem [shape: f32[1,128], index: 5, kind: input, shape index: {}]   ;;  %s6361_s6 = inlined_call_operand.vmem [shape: f32[128,128], index: 6, kind: input, shape index: {}]   ;;  %s6362_s7 = inlined_call_operand.hbm [shape: f32[128,128], index: 7, kind: input, shape index: {}]   ;;  %s6363_s8 = inlined_call_operand.hbm [shape: bf16[4,128,128], index: 8, kind: input, shape index: {}]   ;;  %s6364_s9 = inlined_call_operand.vmem [shape: f32[1,128], index: 9, kind: input, shape index: {}]   ;;  %s6365_s10 = inlined_call_operand.vmem [shape: f32[1,128], index: 10, kind: input, shape index: {}]   ;;  %s6366_s11 = inlined_call_operand.hbm [shape: f32[128,128], index: 11, kind: input, shape index: {}]   ;;  %s6367_s12 = inlined_call_operand.hbm [shape: f32[128,128], index: 12, kind: input, shape index: {}]   ;;  %s6368_s13 = inlined_call_operand.vmem [shape: bf16[4,128,256], index: 13, kind: input, shape index: {}]   ;;  %s6369_s14 = inlined_call_operand.vmem [shape: f32[1,128], index: 14, kind: input, shape index: {}]   ;;  %s6370_s15 = inlined_call_operand.vmem [shape: f32[1,128], index: 15, kind: input, shape index: {}]   ;;  %s6371_s16 = inlined_call_operand.hbm [shape: f32[256,128], index: 16, kind: input, shape index: {}]   ;;  %s6372_s17 = inlined_call_operand.hbm [shape: f32[128,256], index: 17, kind: input, shape index: {}]   ;;  %s6373_s18 = inlined_call_operand.hbm [shape: bf16[4,256,128], index: 18, kind: input, shape index: {}]   ;;  %s6374_s19 = inlined_call_operand.vmem [shape: f32[1,128], index: 19, kind: input, shape index: {}]   ;;  %s6375_s20 = inlined_call_operand.vmem [shape: f32[16,128], index: 20, kind: output, shape index: {}]  }
   0x1   :  { %6386 = sst [smem:[#allocation25_spill]] %s6355_s0 }
   0x2   :  { %6387 = sst [smem:[#allocation26_spill]] %s6356_s1 }
   0x3   :  { %6388 = sst [smem:[#allocation27_spill]] %s6357_s2 }
   0x4   :  { %6389 = sst [smem:[#allocation28_spill]] %s6358_s3 }
   0x5   :  { %6390 = sst [smem:[#allocation29_spill]] %s6359_s4 }
   0x6   :  { %6391 = sst [smem:[#allocation30_spill]] %s6375_s20 }
   0x7   :  { %25 = vsyncpa [#allocation7], 0 }
   0x8   :  { %26 = vsyncpa [#allocation9], 0 }
   0x9   :  { %27 = vsyncpa [#allocation12], 0 }
   0xa   :  { %28 = vsyncpa [#allocation15], 0 }
   0xb   :  { %29 = vsyncpa [#allocation18], 0  ;;  %s5512_s1 = smov [#allocation8]   ;;  %s5513_s23 = smov [#allocation11]  }
   0xc   :  { %s51_s22 = sshll.u32 %s5512_s1, 4  ;;  %s81_s24 = sshll.u32 %s5513_s23, 4  ;;  %s52_s22 = int_to_ptr.vmem [resolvable:$true] %s51_s22  ;;  %s5637_s24 = int_to_ptr.vmem [resolvable:$true] %s81_s24 }
   0xd   :  { %s6392_s3 = sld [smem:[#allocation28_spill]] }
  0x13   :  { %s5304_s26 = scalar_lea.hbm %s6392_s3, 4096 }
  0x14   :  { %p5305_p0 = scmp.ne.s32.totalorder %s6392_s3, %s5304_s26  ;;  %p5308_p1 = scmp.lt.u32.totalorder %s5304_s26, %s6392_s3 }
  0x16   :  { %p5310_p2 = pnand %p5308_p1, %p5305_p0 }
  0x18   :  { %5313 = shalt.err (!%p5310_p2)
}
  0x19   :  { %s5314_s30 = scalar_lea.vmem %s52_s22, 4096  ;;  %p5319_p4 = scmp.lt.s32.totalorder %s52_s22, %s52_s22 }
  0x1a   :  { %p5315_p3 = scmp.ne.s32.totalorder %s52_s22, %s5314_s30  ;;  %p5320_p5 = scmp.lt.s32.totalorder %s5314_s30, %s5314_s30 }
  0x1c   :  { %p5321_p6 = por %p5320_p5, %p5319_p4 }
  0x1e   :  { %p5322_p7 = pnand %p5321_p6, %p5315_p3 }
  0x20   :  { %5325 = shalt.err (!%p5322_p7)
}
  0x21   :  { %s6384_s0 = smov 64   ;;  %s5515_s21 = smov 4  }
  0x22   :  { %57 = dma.hbm_to_vmem [thread:$0]  %s6392_s3, 4096, %s52_s22, [#allocation9], %s6384_s0, %s6384_s0, %s5515_s21  }
  0x23   :  { %s5326_s26 = scalar_lea.hbm %s6363_s8, 4096 }
  0x24   :  { %p5327_p8 = scmp.ne.s32.totalorder %s6363_s8, %s5326_s26  ;;  %p5330_p9 = scmp.lt.u32.totalorder %s5326_s26, %s6363_s8 }
  0x26   :  { %p5332_p10 = pnand %p5330_p9, %p5327_p8 }
  0x28   :  { %5335 = shalt.err (!%p5332_p10)
}
  0x29   :  { %s5336_s30 = scalar_lea.vmem %s5637_s24, 4096  ;;  %p5341_p12 = scmp.lt.s32.totalorder %s5637_s24, %s5637_s24 }
  0x2a   :  { %p5337_p11 = scmp.ne.s32.totalorder %s5637_s24, %s5336_s30  ;;  %p5342_p13 = scmp.lt.s32.totalorder %s5336_s30, %s5336_s30 }
  0x2c   :  { %p5343_p0 = por %p5342_p13, %p5341_p12 }
  0x2e   :  { %p5344_p1 = pnand %p5343_p0, %p5337_p11 }
  0x30   :  { %5347 = shalt.err (!%p5344_p1)
}
  0x31   :  { %87 = dma.hbm_to_vmem [thread:$0]  %s6363_s8, 4096, %s5637_s24, [#allocation12], %s6384_s0, %s6384_s0, %s5515_s21  }
  0x32   :  { %s5516_s1 = smov [#allocation14]   ;;  %s5517_s2 = smov [#allocation17]  }
  0x33   :  { %s109_s23 = sshll.u32 %s5516_s1, 4  ;;  %s139_s25 = sshll.u32 %s5517_s2, 4  ;;  %s110_s23 = int_to_ptr.vmem [resolvable:$true] %s109_s23  ;;  %s5674_s25 = int_to_ptr.vmem [resolvable:$true] %s139_s25 }
  0x34   :  { %s5348_s28 = scalar_lea.hbm %s6367_s12, 2048 }
  0x35   :  { %p5349_p2 = scmp.ne.s32.totalorder %s6367_s12, %s5348_s28  ;;  %p5352_p3 = scmp.lt.u32.totalorder %s5348_s28, %s6367_s12 }
  0x37   :  { %p5354_p4 = pnand %p5352_p3, %p5349_p2 }
  0x39   :  { %5357 = shalt.err (!%p5354_p4)
}
  0x3a   :  { %s5358_s8 = scalar_lea.vmem %s110_s23, 2048  ;;  %p5363_p6 = scmp.lt.s32.totalorder %s110_s23, %s110_s23 }
  0x3b   :  { %p5359_p5 = scmp.ne.s32.totalorder %s110_s23, %s5358_s8  ;;  %p5364_p7 = scmp.lt.s32.totalorder %s5358_s8, %s5358_s8 }
  0x3d   :  { %p5365_p8 = por %p5364_p7, %p5363_p6 }
  0x3f   :  { %p5366_p9 = pnand %p5365_p8, %p5359_p5 }
  0x41   :  { %5369 = shalt.err (!%p5366_p9)
}
  0x42   :  { %s6380_s24 = smov 128   ;;  %s6382_s22 = smov 8  }
  0x43   :  { %115 = dma.hbm_to_vmem [thread:$0]  %s6367_s12, 2048, %s110_s23, [#allocation15], %s6380_s24, %s6380_s24, %s6382_s22  }
  0x44   :  { %s5370_s26 = scalar_lea.hbm %s6372_s17, 4096 }
  0x45   :  { %p5371_p10 = scmp.ne.s32.totalorder %s6372_s17, %s5370_s26  ;;  %p5374_p11 = scmp.lt.u32.totalorder %s5370_s26, %s6372_s17 }
  0x47   :  { %p5376_p12 = pnand %p5374_p11, %p5371_p10 }
  0x49   :  { %5379 = shalt.err (!%p5376_p12)
}
  0x4a   :  { %s5380_s30 = scalar_lea.vmem %s5674_s25, 4096  ;;  %p5385_p0 = scmp.lt.s32.totalorder %s5674_s25, %s5674_s25 }
  0x4b   :  { %p5381_p13 = scmp.ne.s32.totalorder %s5674_s25, %s5380_s30  ;;  %p5386_p1 = scmp.lt.s32.totalorder %s5380_s30, %s5380_s30 }
  0x4d   :  { %p5387_p2 = por %p5386_p1, %p5385_p0 }
  0x4f   :  { %p5388_p3 = pnand %p5387_p2, %p5381_p13 }
  0x51   :  { %5391 = shalt.err (!%p5388_p3)
}
  0x52   :  { %s5520_s12 = smov 256   ;;  %s5521_s23 = smov 16  }
  0x53   :  { %145 = dma.hbm_to_vmem [thread:$0]  %s6372_s17, 4096, %s5674_s25, [#allocation18], %s5520_s12, %s5520_s12, %s5521_s23  }
  0x54   :  { %s5522_s1 = smov [#allocation6]   ;;  %s5523_s2 = smov [#allocation10]  }
  0x55   :  { %s37_s20 = sshll.u32 %s5522_s1, 4  ;;  %s69_s26 = sshll.u32 %s5523_s2, 4  ;;  %s38_s20 = int_to_ptr.vmem [resolvable:$true] %s37_s20  ;;  %s5708_s26 = int_to_ptr.vmem [resolvable:$true] %s69_s26 }
  0x56   :  { %s6393_s4 = sld [smem:[#allocation26_spill]] }
  0x5c   :  { %s5392_s29 = scalar_lea.hbm %s6393_s4, 4096 }
  0x5d   :  { %p5393_p4 = scmp.ne.s32.totalorder %s6393_s4, %s5392_s29  ;;  %p5396_p5 = scmp.lt.u32.totalorder %s5392_s29, %s6393_s4 }
  0x5f   :  { %p5398_p6 = pnand %p5396_p5, %p5393_p4 }
  0x61   :  { %5401 = shalt.err (!%p5398_p6)
}
  0x62   :  { %s5402_s17 = scalar_lea.vmem %s38_s20, 4096  ;;  %p5407_p8 = scmp.lt.s32.totalorder %s38_s20, %s38_s20 }
  0x63   :  { %p5403_p7 = scmp.ne.s32.totalorder %s38_s20, %s5402_s17  ;;  %p5408_p9 = scmp.lt.s32.totalorder %s5402_s17, %s5402_s17 }
  0x65   :  { %p5409_p10 = por %p5408_p9, %p5407_p8 }
  0x67   :  { %p5410_p11 = pnand %p5409_p10, %p5403_p7 }
  0x69   :  { %5413 = shalt.err (!%p5410_p11)
}
  0x6a   :  { %s6394_s25 = smov 64   ;;  %s5414_s0 = scalar_lea.hbm %s6362_s7, 2048 }
  0x6b   :  { %43 = dma.hbm_to_vmem [thread:$0]  %s6393_s4, 4096, %s38_s20, [#allocation7], %s6394_s25, %s6394_s25, %s5515_s21  }
  0x6c   :  { %p5415_p12 = scmp.ne.s32.totalorder %s6362_s7, %s5414_s0  ;;  %p5418_p13 = scmp.lt.u32.totalorder %s5414_s0, %s6362_s7 }
  0x6e   :  { %p5420_p0 = pnand %p5418_p13, %p5415_p12 }
  0x70   :  { %5423 = shalt.err (!%p5420_p0)
}
  0x71   :  { %s5424_s27 = scalar_lea.vmem %s5708_s26, 2048  ;;  %p5429_p2 = scmp.lt.s32.totalorder %s5708_s26, %s5708_s26 }
  0x72   :  { %p5425_p1 = scmp.ne.s32.totalorder %s5708_s26, %s5424_s27  ;;  %p5430_p3 = scmp.lt.s32.totalorder %s5424_s27, %s5424_s27 }
  0x74   :  { %p5431_p4 = por %p5430_p3, %p5429_p2 }
  0x76   :  { %p5432_p5 = pnand %p5431_p4, %p5425_p1 }
  0x78   :  { %5435 = shalt.err (!%p5432_p5)
}
  0x79   :  { %s6395_s20 = smov 8   ;;  %s6396_s28 = smov 128  }
  0x7a   :  { %75 = dma.hbm_to_vmem [thread:$0]  %s6362_s7, 2048, %s5708_s26, [#allocation9], %s6396_s28, %s6396_s28, %s6395_s20  }
  0x7b   :  { %s5524_s30 = smov [#allocation13]   ;;  %s5525_s12 = smov [#allocation16]  }
  0x7c   :  { %s97_s17 = sshll.u32 %s5524_s30, 4  ;;  %s127_s23 = sshll.u32 %s5525_s12, 4  ;;  %s98_s17 = int_to_ptr.vmem [resolvable:$true] %s97_s17  ;;  %s5745_s23 = int_to_ptr.vmem [resolvable:$true] %s127_s23 }
  0x7d   :  { %s5436_s0 = scalar_lea.hbm %s6366_s11, 2048 }
  0x7e   :  { %p5437_p6 = scmp.ne.s32.totalorder %s6366_s11, %s5436_s0  ;;  %p5440_p7 = scmp.lt.u32.totalorder %s5436_s0, %s6366_s11 }
  0x80   :  { %p5442_p8 = pnand %p5440_p7, %p5437_p6 }
  0x82   :  { %5445 = shalt.err (!%p5442_p8)
}
  0x83   :  { %s5446_s7 = scalar_lea.vmem %s98_s17, 2048  ;;  %p5451_p10 = scmp.lt.s32.totalorder %s98_s17, %s98_s17 }
  0x84   :  { %p5447_p9 = scmp.ne.s32.totalorder %s98_s17, %s5446_s7  ;;  %p5452_p11 = scmp.lt.s32.totalorder %s5446_s7, %s5446_s7 }
  0x86   :  { %p5453_p12 = por %p5452_p11, %p5451_p10 }
  0x88   :  { %p5454_p13 = pnand %p5453_p12, %p5447_p9 }
  0x8a   :  { %5457 = shalt.err (!%p5454_p13)
}
  0x8b   :  { %103 = dma.hbm_to_vmem [thread:$0]  %s6366_s11, 2048, %s98_s17, [#allocation12], %s6396_s28, %s6396_s28, %s6395_s20  }
  0x8c   :  { %s5458_s30 = scalar_lea.hbm %s6371_s16, 4096 }
  0x8d   :  { %p5459_p0 = scmp.ne.s32.totalorder %s6371_s16, %s5458_s30  ;;  %p5462_p1 = scmp.lt.u32.totalorder %s5458_s30, %s6371_s16 }
  0x8f   :  { %p5464_p2 = pnand %p5462_p1, %p5459_p0 }
  0x91   :  { %5467 = shalt.err (!%p5464_p2)
}
  0x92   :  { %s5468_s22 = scalar_lea.vmem %s5745_s23, 4096  ;;  %p5473_p4 = scmp.lt.s32.totalorder %s5745_s23, %s5745_s23 }
  0x93   :  { %p5469_p3 = scmp.ne.s32.totalorder %s5745_s23, %s5468_s22  ;;  %p5474_p5 = scmp.lt.s32.totalorder %s5468_s22, %s5468_s22 }
  0x95   :  { %p5475_p6 = por %p5474_p5, %p5473_p4 }
  0x97   :  { %p5476_p7 = pnand %p5475_p6, %p5469_p3 }
  0x99   :  { %5479 = shalt.err (!%p5476_p7)
}
  0x9a   :  { %133 = dma.hbm_to_vmem [thread:$0]  %s6371_s16, 4096, %s5745_s23, [#allocation15], %s6396_s28, %s6396_s28, %s6395_s20  }
  0x9b   :  { %s5526_s3 = smov [#allocation19]   ;;  %s5480_s26 = scalar_lea.hbm %s6373_s18, 8192 }
  0x9c   :  { %s151_s1 = sshll.u32 %s5526_s3, 4  ;;  %p5481_p8 = scmp.ne.s32.totalorder %s6373_s18, %s5480_s26  ;;  %s152_s1 = int_to_ptr.vmem [resolvable:$true] %s151_s1 }
  0x9d   :  { %p5484_p9 = scmp.lt.u32.totalorder %s5480_s26, %s6373_s18 }
  0x9f   :  { %p5486_p10 = pnand %p5484_p9, %p5481_p8 }
  0xa1   :  { %5489 = shalt.err (!%p5486_p10)
}
  0xa2   :  { %s5490_s12 = scalar_lea.vmem %s152_s1, 8192  ;;  %p5495_p12 = scmp.lt.s32.totalorder %s152_s1, %s152_s1 }
  0xa3   :  { %p5491_p11 = scmp.ne.s32.totalorder %s152_s1, %s5490_s12  ;;  %p5496_p13 = scmp.lt.s32.totalorder %s5490_s12, %s5490_s12 }
  0xa5   :  { %p5497_p0 = por %p5496_p13, %p5495_p12 }
  0xa7   :  { %p5498_p1 = pnand %p5497_p0, %p5491_p11 }
  0xa9   :  { %5501 = shalt.err (!%p5498_p1)
}
  0xaa   :  { %157 = dma.hbm_to_vmem [thread:$0]  %s6373_s18, 8192, %s152_s1, [#allocation18], %s6394_s25, %s6394_s25, %s5515_s21  }
  0xab   :  { %5502 = dma.done.wait [#allocation7], 4096  }
  0xac   :  { %5503 = vsyncadd [#allocation7], 4294963200 }
  0xad   :  { %5504 = dma.done.wait [#allocation9], 6144  }
  0xae   :  { %5505 = vsyncadd [#allocation9], 4294961152 }
  0xaf   :  { %5506 = dma.done.wait [#allocation12], 6144  }
  0xb0   :  { %5507 = vsyncadd [#allocation12], 4294961152 }
  0xb1   :  { %5508 = dma.done.wait [#allocation15], 6144  }
  0xb2   :  { %5509 = vsyncadd [#allocation15], 4294961152 }
  0xb3   :  { %5510 = dma.done.wait [#allocation18], 12288  }
  0xb4   :  { %5511 = vsyncadd [#allocation18], 4294955008  ;;  %v5041_v0 = vld [vmem:[#allocation6 + $0x40] sm:$0xff]   ;;  %v5043_v2 = vld [vmem:[#allocation6 + $0x48] sm:$0xff]   ;;  %s6397_s25 = sld [smem:[#allocation25_spill]]  ;;  %v5527_v54 = vmov 0.0  }
  0xb5   :  { %v5042_v1 = vld [vmem:[#allocation6] sm:$0xff]   ;;  %4445 = vmatprep.subr.bf16.mxu0 %v5041_v0  ;;  %v5044_v3 = vld [vmem:[#allocation6 + $0x8] sm:$0xff]   ;;  %v5045_v4 = vld [vmem:[#allocation6 + $0x50] sm:$0xff]   ;;  %188 = vst [vmem:[#allocation2] sm:$0xff] %v5527_v54  ;;  %vm5528_vm0 = vmmov 0   ;;  %s6398_s27 = sld [smem:[#allocation27_spill]] }
  0xb6   :  { %4465 = vmatprep.subr.bf16.mxu1 %v5042_v1  ;;  %4446 = vmatpush3.bf16.msra.mxu0 %v5041_v0  ;;  %v5046_v5 = vld [vmem:[#allocation6 + $0x10] sm:$0xff]   ;;  %v5047_v6 = vld [vmem:[#allocation6 + $0x58] sm:$0xff]   ;;  %v5049_v8 = vld [vmem:[#allocation6 + $0x60] sm:$0xff]   ;;  %189 = vst [vmem:[#allocation2 + $0x8] sm:$0xff] %v5527_v54  ;;  %vm1180_vm8 = vcmask 1043456   ;;  %vm1199_vm9 = vcmask 1040384  }
  0xb7   :  { %4466 = vmatpush3.bf16.msra.mxu1 %v5042_v1  ;;  %4447 = vmatprep.subr.bf16.mxu0 %v5043_v2  ;;  %v5048_v7 = vld [vmem:[#allocation6 + $0x18] sm:$0xff]   ;;  %v5050_v9 = vld [vmem:[#allocation6 + $0x20] sm:$0xff]   ;;  %v5051_v10 = vld [vmem:[#allocation6 + $0x68] sm:$0xff]   ;;  %190 = vst [vmem:[#allocation2 + $0x10] sm:$0xff] %v5527_v54  ;;  %s6399_s26 = sld [smem:[#allocation29_spill]]  ;;  %s6400_s30 = sld [smem:[#allocation30_spill]] }
  0xb8   :  { %4467 = vmatprep.subr.bf16.mxu1 %v5044_v3  ;;  %v5052_v14 = vld [vmem:[#allocation6 + $0x28] sm:$0xff]   ;;  %v5053_v18 = vld [vmem:[#allocation6 + $0x70] sm:$0xff]   ;;  %v5055_v20 = vld [vmem:[#allocation6 + $0x78] sm:$0xff]   ;;  %191 = vst [vmem:[#allocation2 + $0x18] sm:$0xff] %v5527_v54 }
  0xb9   :  { %v5054_v19 = vld [vmem:[#allocation6 + $0x30] sm:$0xff]   ;;  %v5056_v21 = vld [vmem:[#allocation6 + $0x38] sm:$0xff]   ;;  %v5057_v24 = vld [vmem:[#allocation6 + $0x80] sm:$0xff]   ;;  %192 = vst [vmem:[#allocation3] sm:$0xff] %v5527_v54 }
  0xba   :  { %4448 = vmatpush3.bf16.msra.mxu0 %v5043_v2  ;;  %v3859_v11 = vld [vmem:[%s6397_s25 + $0x1] ss:$2 sm:$0xff]  ;;  %v3860_v12 = vld [vmem:[%s6397_s25 + $0x11] ss:$2 sm:$0xff]  ;;  %v204_v13 = vld [vmem:[%s6397_s25] ss:$2 sm:$0xff] }
  0xbb   :  { %4468 = vmatpush3.bf16.msra.mxu1 %v5044_v3  ;;  %4449 = vmatprep.subr.bf16.mxu0 %v5045_v4  ;;  %v233_v15 = vpack.c.bf16 %v3860_v12, %v3859_v11  ;;  %v3857_v16 = vld [vmem:[%s6397_s25 + $0x10] ss:$2 sm:$0xff]  ;;  %v3861_v22 = vld [vmem:[%s6397_s25 + $0x21] ss:$2 sm:$0xf]  ;;  %v5059_v28 = vld [vmem:[#allocation6 + $0x88] sm:$0xff]  }
  0xbc   :  { %4469 = vmatprep.subr.bf16.mxu1 %v5046_v5  ;;  %v209_v17 = vpack.c.bf16 %v3857_v16, %v204_v13  ;;  %v3858_v23 = vld [vmem:[%s6397_s25 + $0x20] ss:$2 sm:$0xf]  ;;  %v234_v26 = vpack.c.bf16 %v3861_v22, %v3861_v22  ;;  %v5060_v29 = vld [vmem:[#allocation6 + $0xc8] sm:$0xff]   ;;  %v5061_v33 = vld [vmem:[#allocation6 + $0x90] sm:$0xff]   ;;  %193 = vst [vmem:[#allocation3 + $0x8] sm:$0xff] %v5527_v54 }
  0xbd   :  { %4461 = vmatprep.mubr.bf16.mxu0 %v233_v15  ;;  %v5058_v25 = vld [vmem:[#allocation6 + $0xc0] sm:$0xff]   ;;  %v210_v27 = vpack.c.bf16 %v3858_v23, %v3858_v23  ;;  %v5062_v36 = vld [vmem:[#allocation6 + $0xd0] sm:$0xff]   ;;  %v5063_v38 = vld [vmem:[#allocation6 + $0x98] sm:$0xff]   ;;  %194 = vst [vmem:[#allocation3 + $0x10] sm:$0xff] %v5527_v54  ;;  %v5529_v11 = vmov 0.0|0.0  }
  0xbe   :  { %4450 = vmatpush3.bf16.msra.mxu0 %v5045_v4  ;;  %4481 = vmatprep.mubr.bf16.mxu1 %v209_v17  ;;  %v3878_v30 = vld [vmem:[%s6397_s25 + $0x2] ss:$2 sm:$0xff]  ;;  %v3879_v31 = vld [vmem:[%s6397_s25 + $0x12] ss:$2 sm:$0xff]  ;;  %v3889_v32 = vld [vmem:[%s6397_s25 + $0x3] ss:$2 sm:$0xff] }
  0xbf   :  { %4470 = vmatpush3.bf16.msra.mxu1 %v5046_v5  ;;  %4451 = vmatprep.subr.bf16.mxu0 %v5047_v6  ;;  %v450_v34 = vpack.c.bf16 %v3879_v31, %v3878_v30  ;;  %v3890_v35 = vld [vmem:[%s6397_s25 + $0x13] ss:$2 sm:$0xff]  ;;  %v5067_v42 = vld [vmem:[#allocation6 + $0xa8] sm:$0xff]   ;;  %195 = vst [vmem:[#allocation4] sm:$0xff] %v5527_v54  ;;  %196 = vst [vmem:[#allocation4 + $0x8] sm:$0xff] %v5527_v54 }
  0xc0   :  { %4471 = vmatprep.subr.bf16.mxu1 %v5048_v7  ;;  %v574_v37 = vpack.c.bf16 %v3890_v35, %v3889_v32  ;;  %v5064_v39 = vld [vmem:[#allocation6 + $0xd8] sm:$0xff]   ;;  %v5065_v40 = vld [vmem:[#allocation6 + $0xa0] sm:$0xff]   ;;  %v5068_v43 = vld [vmem:[#allocation6 + $0xe8] sm:$0xff]   ;;  %197 = vst [vmem:[#allocation4 + $0x10] sm:$0x3f] %v5527_v54 }
  0xc1   :  { %v5066_v41 = vld [vmem:[#allocation6 + $0xe0] sm:$0xff]   ;;  %v5069_v44 = vld [vmem:[#allocation6 + $0xb0] sm:$0xff]   ;;  %v5071_v46 = vld [vmem:[#allocation6 + $0xb8] sm:$0xff]   ;;  %198 = vst [vmem:[#allocation5] sm:$0xff] %v5527_v54 }
  0xc2   :  { %4452 = vmatpush3.bf16.msra.mxu0 %v5047_v6  ;;  %v5070_v45 = vld [vmem:[#allocation6 + $0xf0] sm:$0xff]   ;;  %v5072_v47 = vld [vmem:[#allocation6 + $0xf8] sm:$0xff]   ;;  %v3880_v48 = vld [vmem:[%s6397_s25 + $0x22] ss:$2 sm:$0xf]  ;;  %199 = vst [vmem:[#allocation5 + $0x8] sm:$0xff] %v5527_v54 }
  0xc3   :  { %4472 = vmatpush3.bf16.msra.mxu1 %v5048_v7  ;;  %4453 = vmatprep.subr.bf16.mxu0 %v5049_v8  ;;  %v3891_v49 = vld [vmem:[%s6397_s25 + $0x23] ss:$2 sm:$0xf]  ;;  %v451_v50 = vpack.c.bf16 %v3880_v48, %v3880_v48  ;;  %200 = vst [vmem:[#allocation5 + $0x10] sm:$0xff] %v5527_v54  ;;  %201 = vst [vmem:[#allocation5 + $0x18] sm:$0xff] %v5527_v54  ;;  %v5075_v55 = vld [vmem:[#allocation8 + $0x50] sm:$0xff]  }
  0xc4   :  { %4473 = vmatprep.subr.bf16.mxu1 %v5050_v9  ;;  %v575_v51 = vpack.c.bf16 %v3891_v49, %v3891_v49  ;;  %v5073_v52 = vld [vmem:[#allocation8 + $0x40] sm:$0xff]   ;;  %v5074_v53 = vld [vmem:[#allocation8 + $0x48] sm:$0xff]   ;;  %202 = vst [vmem:[#allocation5 + $0x20] sm:$0xff] %v5527_v54  ;;  %203 = vst [vmem:[#allocation5 + $0x28] sm:$0xff] %v5527_v54 }
  0xc5   :  { %v5076_v56 = vld [vmem:[#allocation8 + $0x58] sm:$0xff]   ;;  %v5077_v57 = vld [vmem:[#allocation8 + $0x60] sm:$0xff]   ;;  %v5078_v58 = vld [vmem:[#allocation8 + $0x68] sm:$0xff]  }
  0xc6   :  { %4454 = vmatpush3.bf16.msra.mxu0 %v5049_v8  ;;  %v5079_v59 = vld [vmem:[#allocation8 + $0x70] sm:$0xff]   ;;  %v5080_v60 = vld [vmem:[#allocation8 + $0x78] sm:$0xff]   ;;  %v1201_v8 = vld [vmem:[%s6361_s6] sm:$0xff] }
  0xc7   :  { %4474 = vmatpush3.bf16.msra.mxu1 %v5050_v9  ;;  %4455 = vmatprep.subr.bf16.mxu0 %v5051_v10  ;;  %v1202_v9 = vld [vmem:[%s6361_s6 + $0x8] sm:$0xff]  ;;  %v1204_v13 = vld [vmem:[%s6361_s6 + $0x18] sm:$0xff]  ;;  %v1205_v15 = vld [vmem:[%s6361_s6 + $0x20] sm:$0xff] }
  0xc8   :  { %4475 = vmatprep.subr.bf16.mxu1 %v5052_v14  ;;  %v4826_v12 = vpack.c.bf16 %v1202_v9, %v1201_v8  ;;  %v1206_v16 = vld [vmem:[%s6361_s6 + $0x28] sm:$0xff]  ;;  %v3900_v22 = vld [vmem:[%s6398_s27] ss:$0 sm:$0xff]  ;;  %v5084_v48 = vld [vmem:[#allocation8 + $0x18] sm:$0xff]  }
  0xc9   :  { %v4832_v17 = vpack.c.bf16 %v1206_v16, %v1205_v15  ;;  %v5085_v49 = vld [vmem:[#allocation8 + $0x20] sm:$0xff]   ;;  %v5102_v9 = vld [vmem:[#allocation8 + $0xe8] sm:$0xff]   ;;  %v1207_v16 = vld [vmem:[%s6361_s6 + $0x30] sm:$0xff] }
  0xca   :  { %4456 = vmatpush3.bf16.msra.mxu0 %v5051_v10  ;;  %v1203_v10 = vld [vmem:[%s6361_s6 + $0x10] sm:$0xff]  ;;  %v5101_v8 = vld [vmem:[#allocation8 + $0xe0] sm:$0xff]  }
  0xcb   :  { %4476 = vmatpush3.bf16.msra.mxu1 %v5052_v14  ;;  %4457 = vmatprep.subr.bf16.mxu0 %v5053_v18  ;;  %v4829_v14 = vpack.c.bf16 %v1204_v13, %v1203_v10  ;;  %v5103_v10 = vld [vmem:[#allocation8 + $0xf0] sm:$0xff]  }
  0xcc   :  { %4477 = vmatprep.subr.bf16.mxu1 %v5054_v19 }
  0xce   :  { %4458 = vmatpush3.bf16.msra.mxu0 %v5053_v18 }
  0xcf   :  { %4478 = vmatpush3.bf16.msra.mxu1 %v5054_v19  ;;  %4459 = vmatprep.subr.bf16.mxu0 %v5055_v20 }
  0xd0   :  { %4479 = vmatprep.subr.bf16.mxu1 %v5056_v21 }
  0xd2   :  { %4460 = vmatpush3.bf16.msra.mxu0 %v5055_v20 }
  0xd3   :  { %4480 = vmatpush3.bf16.msra.mxu1 %v5056_v21  ;;  %4485 = vmatprep.subr.bf16.mxu0 %v5057_v24 }
  0xd4   :  { %4505 = vmatprep.subr.bf16.mxu1 %v5058_v25 }
  0xd5   :  { %4462 = vmatmul.mubr.bf16.vlgmr.msra.gmra.mrb[0].mxu0 %v234_v26 }
  0xd6   :  { %4482 = vmatmul.mubr.bf16.vlgmr.msra.gmra.mrb[0].mxu1 %v210_v27  ;;  %4486 = vmatpush3.bf16.msra.mxu0 %v5057_v24 }
  0xd7   :  { %4506 = vmatpush3.bf16.msra.mxu1 %v5058_v25  ;;  %4487 = vmatprep.subr.bf16.mxu0 %v5059_v28 }
  0xd8   :  { %4507 = vmatprep.subr.bf16.mxu1 %v5060_v29  ;;  %4501 = vmatprep.mubr.bf16.mxu0 %v450_v34 }
  0xd9   :  { %4521 = vmatprep.mubr.bf16.mxu1 %v574_v37 }
  0xda   :  { %4488 = vmatpush3.bf16.msra.mxu0 %v5059_v28 }
  0xdb   :  { %4508 = vmatpush3.bf16.msra.mxu1 %v5060_v29  ;;  %4489 = vmatprep.subr.bf16.mxu0 %v5061_v33 }
  0xdc   :  { %4509 = vmatprep.subr.bf16.mxu1 %v5062_v36 }
  0xde   :  { %4490 = vmatpush3.bf16.msra.mxu0 %v5061_v33 }
  0xdf   :  { %4510 = vmatpush3.bf16.msra.mxu1 %v5062_v36  ;;  %4491 = vmatprep.subr.bf16.mxu0 %v5063_v38 }
  0xe0   :  { %4511 = vmatprep.subr.bf16.mxu1 %v5064_v39 }
  0xe2   :  { %4492 = vmatpush3.bf16.msra.mxu0 %v5063_v38 }
  0xe3   :  { %4512 = vmatpush3.bf16.msra.mxu1 %v5064_v39  ;;  %4493 = vmatprep.subr.bf16.mxu0 %v5065_v40 }
  0xe4   :  { %4513 = vmatprep.subr.bf16.mxu1 %v5066_v41 }
  0xe6   :  { %4494 = vmatpush3.bf16.msra.mxu0 %v5065_v40 }
  0xe7   :  { %4514 = vmatpush3.bf16.msra.mxu1 %v5066_v41  ;;  %4495 = vmatprep.subr.bf16.mxu0 %v5067_v42 }
  0xe8   :  { %4515 = vmatprep.subr.bf16.mxu1 %v5068_v43 }
  0xea   :  { %4496 = vmatpush3.bf16.msra.mxu0 %v5067_v42 }
  0xeb   :  { %4516 = vmatpush3.bf16.msra.mxu1 %v5068_v43  ;;  %4497 = vmatprep.subr.bf16.mxu0 %v5069_v44 }
  0xec   :  { %4517 = vmatprep.subr.bf16.mxu1 %v5070_v45 }
  0xee   :  { %4498 = vmatpush3.bf16.msra.mxu0 %v5069_v44  ;;  %v5081_v44 = vld [vmem:[#allocation8] sm:$0xff]  }
  0xef   :  { %4518 = vmatpush3.bf16.msra.mxu1 %v5070_v45  ;;  %4499 = vmatprep.subr.bf16.mxu0 %v5071_v46 }
  0xf0   :  { %4519 = vmatprep.subr.bf16.mxu1 %v5072_v47 }
  0xf2   :  { %4500 = vmatpush3.bf16.msra.mxu0 %v5071_v46  ;;  %v5082_v46 = vld [vmem:[#allocation8 + $0x8] sm:$0xff]  }
  0xf3   :  { %4520 = vmatpush3.bf16.msra.mxu1 %v5072_v47  ;;  %4525 = vmatprep.subr.bf16.mxu0 %v5527_v54  ;;  %v5083_v47 = vld [vmem:[#allocation8 + $0x10] sm:$0xff]  }
  0xf4   :  { %4825 = vmatprep.subr.bf16.mxu1 %v5529_v11 }
  0xf5   :  { %4502 = vmatmul.mubr.bf16.vlgmr.msra.gmra.mrb[4].mxu0 %v451_v50  ;;  %v5086_v50 = vld [vmem:[#allocation8 + $0x28] sm:$0xff]  }
  0xf6   :  { %4522 = vmatmul.mubr.bf16.vlgmr.msra.gmra.mrb[4].mxu1 %v575_v51  ;;  %4526 = vmatpush3.bf16.msra.mxu0 %v5073_v52  ;;  %v5087_v51 = vld [vmem:[#allocation8 + $0x30] sm:$0xff]   ;;  %v5088_v52 = vld [vmem:[#allocation8 + $0x38] sm:$0xff]  }
  0xf7   :  { %4527 = vmatprep.subr.bf16.mxu0 %v5527_v54  ;;  %4541 = vmatprep.mubr.msk.bf16.mxu0 %vm5528_vm0, %v5527_v54 }
  0xf8   :  { %4637 = vmatprep.mubr.msk.f32.mxu1 %vm5528_vm0, %v5527_v54  ;;  %4827 = vmatpush3.bf16.msra.mxu1 %v4826_v12  ;;  %v5104_v12 = vld [vmem:[#allocation8 + $0xf8] sm:$0xff]  }
  0xf9   :  { %4828 = vmatprep.subr.bf16.mxu1 %v5529_v11 }
  0xfa   :  { %4528 = vmatpush3.bf16.msra.mxu0 %v5074_v53 }
  0xfb   :  { %4529 = vmatprep.subr.bf16.mxu0 %v5527_v54 }
  0xfc   :  { %4830 = vmatpush3.bf16.msra.mxu1 %v4829_v14 }
  0xfd   :  { %4831 = vmatprep.subr.bf16.mxu1 %v5529_v11 }
  0xfe   :  { %4530 = vmatpush3.bf16.msra.mxu0 %v5075_v55 }
  0xff   :  { %4531 = vmatprep.subr.bf16.mxu0 %v5527_v54 }
 0x100   :  { %4833 = vmatpush3.bf16.msra.mxu1 %v4832_v17  ;;  %v1208_v17 = vld [vmem:[%s6361_s6 + $0x38] sm:$0xff] }
 0x101   :  { %4834 = vmatprep.subr.bf16.mxu1 %v5529_v11 }
 0x102   :  { %4532 = vmatpush3.bf16.msra.mxu0 %v5076_v56  ;;  %v5089_v56 = vld [vmem:[#allocation8 + $0x80] sm:$0xff]  }
 0x103   :  { %4533 = vmatprep.subr.bf16.mxu0 %v5527_v54 }
 0x106   :  { %4534 = vmatpush3.bf16.msra.mxu0 %v5077_v57 }
 0x107   :  { %4535 = vmatprep.subr.bf16.mxu0 %v5527_v54 }
 0x10a   :  { %4536 = vmatpush3.bf16.msra.mxu0 %v5078_v58  ;;  %v5090_v58 = vld [vmem:[#allocation8 + $0x88] sm:$0xff]  }
 0x10b   :  { %4537 = vmatprep.subr.bf16.mxu0 %v5527_v54 }
 0x10e   :  { %4538 = vmatpush3.bf16.msra.mxu0 %v5079_v59  ;;  %v5091_v59 = vld [vmem:[#allocation8 + $0x90] sm:$0xff]  }
 0x10f   :  { %4539 = vmatprep.subr.bf16.mxu0 %v5527_v54 }
 0x112   :  { %4540 = vmatpush3.bf16.msra.mxu0 %v5080_v60  ;;  %v5092_v60 = vld [vmem:[#allocation8 + $0x98] sm:$0xff]  }
 0x113   :  { %4545 = vmatprep.subr.bf16.mxu0 %v5527_v54 }
 0x1a8   :  { %v4463_v61 = vpop.f32.mrb[0].mxu0 }
 0x1a9   :  { %v4483_v62 = vpop.f32.mrb[0].mxu1  ;;  %v334_v63 = vpop.f32.mrb[1].mxu0 }
 0x1aa   :  { %v439_v0 = vadd.f32 %v4483_v62, %v4463_v61  ;;  %v430_v1 = vpop.f32.mrb[1].mxu1  ;;  %v4464_v2 = vpop.f32.mrb[2].mxu0  ;;  %v5093_v61 = vld [vmem:[#allocation8 + $0xa0] sm:$0xff]   ;;  %v5094_v62 = vld [vmem:[#allocation8 + $0xa8] sm:$0xff]  }
 0x1ab   :  { %v431_v3 = vadd.f32 %v430_v1, %v334_v63  ;;  %v4484_v4 = vpop.f32.mrb[2].mxu1  ;;  %v337_v5 = vpop.f32.mrb[3].mxu0  ;;  %v5095_v63 = vld [vmem:[#allocation8 + $0xb0] sm:$0xff]  }
 0x1ac   :  { %v433_v6 = vpop.f32.mrb[3].mxu1 }
 0x1ad   :  { %v434_v7 = vadd.f32 %v433_v6, %v337_v5  ;;  %v5098_v5 = vld [vmem:[#allocation8 + $0xc8] sm:$0xff]   ;;  %v5099_v6 = vld [vmem:[#allocation8 + $0xd0] sm:$0xff]  }
 0x1c8   :  { %v4503_v18 = vpop.f32.mrb[4].mxu0 }
 0x1c9   :  { %v567_v19 = vadd.f32 %v4503_v18, %v439_v0  ;;  %v4523_v20 = vpop.f32.mrb[4].mxu1  ;;  %v551_v21 = vpop.f32.mrb[5].mxu0  ;;  %v5096_v0 = vld [vmem:[#allocation8 + $0xb8] sm:$0xff]   ;;  %v4835_v18 = vpack.c.bf16 %v1208_v17, %v1207_v16  ;;  %v1339_v16 = vld [vmem:[#allocation10 + $0x68] sm:$0xff] }
 0x1ca   :  { %v565_v23 = vadd.f32 %v551_v21, %v431_v3  ;;  %v675_v24 = vpop.f32.mrb[5].mxu1  ;;  %v4504_v25 = vpop.f32.mrb[6].mxu0  ;;  %v5097_v3 = vld [vmem:[#allocation8 + $0xc0] sm:$0xff]  }
 0x1cb   :  { %v691_v26 = vadd.f32 %v4523_v20, %v567_v19  ;;  %v4524_v27 = vpop.f32.mrb[6].mxu1  ;;  %v554_v28 = vpop.f32.mrb[7].mxu0  ;;  %4836 = vmatpush3.bf16.msra.mxu1 %v4835_v18  ;;  %v1209_v19 = vld [vmem:[%s6361_s6 + $0x40] sm:$0xff]  ;;  %v1210_v20 = vld [vmem:[%s6361_s6 + $0x48] sm:$0xff]  ;;  %v1340_v18 = vld [vmem:[#allocation10 + $0x70] sm:$0xff] }
 0x1cc   :  { %v689_v29 = vadd.f32 %v675_v24, %v565_v23  ;;  %v566_v30 = vadd.f32 %v554_v28, %v434_v7  ;;  %v678_v31 = vpop.f32.mrb[7].mxu1  ;;  %v5100_v7 = vld [vmem:[#allocation8 + $0xd8] sm:$0xff]   ;;  %4837 = vmatprep.subr.bf16.mxu1 %v5529_v11  ;;  %v4838_v21 = vpack.c.bf16 %v1210_v20, %v1209_v19  ;;  %v1213_v25 = vld [vmem:[%s6361_s6 + $0x60] sm:$0xff]  ;;  %v1215_v28 = vld [vmem:[%s6361_s6 + $0x70] sm:$0xff] }
 0x1cd   :  { %v701_v32 = vadd.f32 %v3900_v22, %v691_v26  ;;  %v1212_v23 = vld [vmem:[%s6361_s6 + $0x58] sm:$0xff]  ;;  %v1214_v26 = vld [vmem:[%s6361_s6 + $0x68] sm:$0xff] }
 0x1ce   :  { %v699_v33 = vadd.f32 %v3900_v22, %v689_v29  ;;  %v690_v34 = vadd.f32 %v678_v31, %v566_v30  ;;  %v4844_v27 = vpack.c.bf16 %v1214_v26, %v1213_v25  ;;  %v1216_v29 = vld [vmem:[%s6361_s6 + $0x78] sm:$0xff]  ;;  %v1161_v31 = vlaneseq }
 0x1cf   :  { %vm704_vm1 = vcmp.gt.f32.partialorder %v701_v32, 0.0  ;;  %v707_v35 = vmul.f32 0.2, %v701_v32  ;;  %4839 = vmatpush3.bf16.msra.mxu1 %v4838_v21  ;;  %v4847_v30 = vpack.c.bf16 %v1216_v29, %v1215_v28  ;;  %v1341_v19 = vld [vmem:[#allocation10 + $0x78] sm:$0xff]  ;;  %v5530_v29 = vmov 1966171168  }
 0x1d0   :  { %vm702_vm2 = vcmp.gt.f32.partialorder %v699_v33, 0.0  ;;  %v705_v36 = vmul.f32 0.2, %v699_v33  ;;  %v700_v37 = vadd.f32 %v3900_v22, %v690_v34  ;;  %4840 = vmatprep.subr.bf16.mxu1 %v5529_v11  ;;  %v1211_v22 = vld [vmem:[%s6361_s6 + $0x50] sm:$0xff]  ;;  %v4871_v20 = vpack.c.bf16 %v1341_v19, %v1340_v18 }
 0x1d1   :  { %v710_v38 = vsel %vm704_vm1, %v701_v32, %v707_v35  ;;  %v4841_v24 = vpack.c.bf16 %v1212_v23, %v1211_v22  ;;  %v5954_v32 = vshrl.u32 %v1161_v31, 7 }
 0x1d2   :  { %714 = vst [vmem:[#allocation2 + $0x14] sm:$0x7] %v710_v38  ;;  %v708_v39 = vsel %vm702_vm2, %v699_v33, %v705_v36  ;;  %vm703_vm3 = vcmp.gt.f32.partialorder %v700_v37, 0.0  ;;  %v706_v40 = vmul.f32 0.2, %v700_v37 }
 0x1d3   :  { %711 = vst [vmem:[#allocation2 + $0x2] sm:$0xff] %v708_v39  ;;  %4842 = vmatpush3.bf16.msra.mxu1 %v4841_v24  ;;  %vm1166_vm4 = vcmp.lt.s32.totalorder %v5954_v32, 5  ;;  %vm1170_vm5 = vcmp.ge.s32.totalorder %v5954_v32, 6  ;;  %v5959_v33 = vadd.s32 8, %v5954_v32  ;;  %vm1867_vm12 = vcmp.ge.s32.totalorder %v5954_v32, 4 }
 0x1d4   :  { %v709_v41 = vsel %vm703_vm3, %v700_v37, %v706_v40  ;;  %4843 = vmatprep.subr.bf16.mxu1 %v5529_v11  ;;  %vm1176_vm6 = vmor %vm1166_vm4, %vm1170_vm5  ;;  %vm1868_vm13 = vcmp.lt.s32.totalorder %v5954_v32, 7  ;;  %vm1865_vm14 = vcmp.lt.s32.totalorder %v5954_v32, 3  ;;  %vm2691_vm2 = vcmp.lt.s32.totalorder %v5954_v32, 4 }
 0x1d5   :  { %712 = vst [vmem:[#allocation2 + $0xa] sm:$0x1] %v709_v41  ;;  %713 = vst [vmem:[#allocation2 + $0xc] sm:$0xfc] %v709_v41  ;;  %vm1173_vm7 = vcmp.lt.s32.totalorder %v5959_v33, 11  ;;  %vm2695_vm3 = vcmp.ge.s32.totalorder %v5954_v32, 7 }
 0x1d6   :  { %vm1869_vm15 = vmand %vm1867_vm12, %vm1868_vm13  ;;  %vm2705_vm5 = vcmask 1045504   ;;  %vm3126_vm12 = vsmask.f32 7424  ;;  %vm3661_vm13 = vsmask.f32 6400 }
 0x1d7   :  { %4845 = vmatpush3.bf16.msra.mxu1 %v4844_v27  ;;  %vm1870_vm1 = vmor %vm1865_vm14, %vm1869_vm15 }
 0x1d8   :  { %4846 = vmatprep.subr.bf16.mxu1 %v5529_v11  ;;  %vm2699_vm4 = vmor %vm2691_vm2, %vm2695_vm3 }
 0x1db   :  { %4848 = vmatpush3.bf16.msra.mxu1 %v4847_v30  ;;  %v1300_v30 = vunpack.c.l.s4 %v5530_v29  ;;  %v5121_v29 = vld [vmem:[#allocation11 + $0x80] sm:$0xff]  }
 0x1dc   :  { %v736_v42 = vld [vmem:[#allocation2 + $0x1] ss:$2 sm:$0xff]  ;;  %v738_v43 = vld [vmem:[#allocation2 + $0x11] ss:$2 sm:$0xf]  ;;  %4849 = vmatprep.subr.bf16.mxu1 %v5529_v11 }
 0x1dd   :  { %v739_v45 = vpack.c.bf16 %v738_v43, %v736_v42  ;;  %v715_v53 = vld [vmem:[#allocation2] ss:$2 sm:$0xff]  ;;  %v717_v55 = vld [vmem:[#allocation2 + $0x10] ss:$2 sm:$0xf]  ;;  %v1301_v31 = vunpack.c.0.s8 %v1300_v30 }
 0x1de   :  { %v718_v57 = vpack.c.bf16 %v717_v55, %v715_v53  ;;  %v936_v1 = vld [vmem:[#allocation2 + $0x2] ss:$2 sm:$0xff]  ;;  %v938_v2 = vld [vmem:[#allocation2 + $0x12] ss:$2 sm:$0xf] }
 0x1df   :  { %4542 = vmatmul.mubr.bf16.vlgmr.msra.gmra.mrb[8].mxu0 %v739_v45  ;;  %v939_v4 = vpack.c.bf16 %v938_v2, %v936_v1  ;;  %v1049_v13 = vld [vmem:[#allocation2 + $0x3] ss:$2 sm:$0xff]  ;;  %v1051_v14 = vld [vmem:[#allocation2 + $0x13] ss:$2 sm:$0xf] }
 0x1e0   :  { %4546 = vmatpush3.bf16.msra.mxu0 %v5081_v44  ;;  %4561 = vmatprep.mubr.msk.bf16.mxu0 %vm5528_vm0, %v5527_v54  ;;  %v1052_v15 = vpack.c.bf16 %v1051_v14, %v1049_v13  ;;  %v1330_v2 = vld [vmem:[#allocation10 + $0x20] sm:$0xff]  ;;  %v1337_v13 = vld [vmem:[#allocation10 + $0x58] sm:$0xff] }
 0x1e1   :  { %4547 = vmatprep.subr.bf16.mxu0 %v5527_v54 }
 0x1e4   :  { %4548 = vmatpush3.bf16.msra.mxu0 %v5082_v46 }
 0x1e5   :  { %4549 = vmatprep.subr.bf16.mxu0 %v5527_v54 }
 0x1e8   :  { %4550 = vmatpush3.bf16.msra.mxu0 %v5083_v47 }
 0x1e9   :  { %4551 = vmatprep.subr.bf16.mxu0 %v5527_v54 }
 0x1ec   :  { %4552 = vmatpush3.bf16.msra.mxu0 %v5084_v48 }
 0x1ed   :  { %4553 = vmatprep.subr.bf16.mxu0 %v5527_v54 }
 0x1f0   :  { %4554 = vmatpush3.bf16.msra.mxu0 %v5085_v49 }
 0x1f1   :  { %4555 = vmatprep.subr.bf16.mxu0 %v5527_v54 }
 0x1f4   :  { %4556 = vmatpush3.bf16.msra.mxu0 %v5086_v50 }
 0x1f5   :  { %4557 = vmatprep.subr.bf16.mxu0 %v5527_v54 }
 0x1f8   :  { %4558 = vmatpush3.bf16.msra.mxu0 %v5087_v51 }
 0x1f9   :  { %4559 = vmatprep.subr.bf16.mxu0 %v5527_v54 }
 0x1fc   :  { %4560 = vmatpush3.bf16.msra.mxu0 %v5088_v52 }
 0x1fd   :  { %4565 = vmatprep.subr.bf16.mxu0 %v5527_v54 }
 0x1ff   :  { %4562 = vmatmul.mubr.bf16.vlgmr.msra.gmra.mrb[8].mxu0 %v718_v57 }
 0x200   :  { %4566 = vmatpush3.bf16.msra.mxu0 %v5089_v56  ;;  %4581 = vmatprep.mubr.msk.bf16.mxu0 %vm5528_vm0, %v5527_v54 }
 0x201   :  { %4567 = vmatprep.subr.bf16.mxu0 %v5527_v54 }
 0x204   :  { %4568 = vmatpush3.bf16.msra.mxu0 %v5090_v58 }
 0x205   :  { %4569 = vmatprep.subr.bf16.mxu0 %v5527_v54 }
 0x208   :  { %4570 = vmatpush3.bf16.msra.mxu0 %v5091_v59 }
 0x209   :  { %4571 = vmatprep.subr.bf16.mxu0 %v5527_v54 }
 0x20c   :  { %4572 = vmatpush3.bf16.msra.mxu0 %v5092_v60  ;;  %v1326_v60 = vld [vmem:[#allocation10] sm:$0xff] }
 0x20d   :  { %4573 = vmatprep.subr.bf16.mxu0 %v5527_v54 }
 0x210   :  { %4574 = vmatpush3.bf16.msra.mxu0 %v5093_v61  ;;  %v1327_v61 = vld [vmem:[#allocation10 + $0x8] sm:$0xff] }
 0x211   :  { %4575 = vmatprep.subr.bf16.mxu0 %v5527_v54 }
 0x214   :  { %4576 = vmatpush3.bf16.msra.mxu0 %v5094_v62  ;;  %v4850_v62 = vpack.c.bf16 %v1327_v61, %v1326_v60  ;;  %v1888_v60 = vld [vmem:[#allocation13 + $0x10] sm:$0xff] }
 0x215   :  { %4577 = vmatprep.subr.bf16.mxu0 %v5527_v54 }
 0x218   :  { %4578 = vmatpush3.bf16.msra.mxu0 %v5095_v63  ;;  %v1328_v63 = vld [vmem:[#allocation10 + $0x10] sm:$0xff] }
 0x219   :  { %4579 = vmatprep.subr.bf16.mxu0 %v5527_v54 }
 0x21c   :  { %4580 = vmatpush3.bf16.msra.mxu0 %v5096_v0  ;;  %v1329_v0 = vld [vmem:[#allocation10 + $0x18] sm:$0xff] }
 0x21d   :  { %4585 = vmatprep.subr.bf16.mxu0 %v5527_v54  ;;  %v4853_v1 = vpack.c.bf16 %v1329_v0, %v1328_v63  ;;  %v1890_v0 = vld [vmem:[#allocation13 + $0x20] sm:$0xff] }
 0x21f   :  { %4582 = vmatmul.mubr.bf16.vlgmr.msra.gmra.mrb[8].mxu0 %v939_v4 }
 0x220   :  { %4586 = vmatpush3.bf16.msra.mxu0 %v5097_v3  ;;  %4601 = vmatprep.mubr.msk.bf16.mxu0 %vm5528_vm0, %v5527_v54  ;;  %v1331_v3 = vld [vmem:[#allocation10 + $0x28] sm:$0xff] }
 0x221   :  { %4587 = vmatprep.subr.bf16.mxu0 %v5527_v54  ;;  %v4856_v4 = vpack.c.bf16 %v1331_v3, %v1330_v2  ;;  %v1892_v3 = vld [vmem:[#allocation13 + $0x30] sm:$0xff] }
 0x224   :  { %4588 = vmatpush3.bf16.msra.mxu0 %v5098_v5  ;;  %v1332_v5 = vld [vmem:[#allocation10 + $0x30] sm:$0xff] }
 0x225   :  { %4589 = vmatprep.subr.bf16.mxu0 %v5527_v54 }
 0x228   :  { %4590 = vmatpush3.bf16.msra.mxu0 %v5099_v6  ;;  %v1333_v6 = vld [vmem:[#allocation10 + $0x38] sm:$0xff] }
 0x229   :  { %4591 = vmatprep.subr.bf16.mxu0 %v5527_v54 }
 0x22c   :  { %4592 = vmatpush3.bf16.msra.mxu0 %v5100_v7  ;;  %v4859_v7 = vpack.c.bf16 %v1333_v6, %v1332_v5  ;;  %v6014_v5 = vsub.s32 1, %v5954_v32 }
 0x22d   :  { %4593 = vmatprep.subr.bf16.mxu0 %v5527_v54 }
 0x230   :  { %4594 = vmatpush3.bf16.msra.mxu0 %v5101_v8  ;;  %v1334_v8 = vld [vmem:[#allocation10 + $0x40] sm:$0xff] }
 0x231   :  { %4595 = vmatprep.subr.bf16.mxu0 %v5527_v54 }
 0x234   :  { %4596 = vmatpush3.bf16.msra.mxu0 %v5102_v9  ;;  %v1335_v9 = vld [vmem:[#allocation10 + $0x48] sm:$0xff] }
 0x235   :  { %4597 = vmatprep.subr.bf16.mxu0 %v5527_v54 }
 0x238   :  { %4598 = vmatpush3.bf16.msra.mxu0 %v5103_v10  ;;  %v4862_v10 = vpack.c.bf16 %v1335_v9, %v1334_v8 }
 0x239   :  { %4599 = vmatprep.subr.bf16.mxu0 %v5527_v54 }
 0x23c   :  { %4600 = vmatpush3.bf16.msra.mxu0 %v5104_v12  ;;  %v1336_v12 = vld [vmem:[#allocation10 + $0x50] sm:$0xff] }
 0x23d   :  { %4873 = vmatprep.subr.bf16.mxu0 %v5529_v11  ;;  %v4865_v14 = vpack.c.bf16 %v1337_v13, %v1336_v12 }
 0x23f   :  { %4602 = vmatmul.mubr.bf16.vlgmr.msra.gmra.mrb[8].mxu0 %v1052_v15  ;;  %v1338_v15 = vld [vmem:[#allocation10 + $0x60] sm:$0xff] }
 0x240   :  { %4787 = vmatprep.mubr.msk.f32.mxu0 %vm5528_vm0, %v5527_v54  ;;  %v4868_v17 = vpack.c.bf16 %v1339_v16, %v1338_v15 }
 0x312   :  { %v1152_v34 = vpop.f32.mrb[8].mxu0 }
 0x313   :  { %v4603_v35 = vpop.f32.mrb[9].mxu0  ;;  %v5962_v36 = vsel %vm1176_vm6, %v1152_v34, 0.0  ;;  %v5986_v34 = vsub.s32 %v1301_v31, %v5954_v32  ;;  %v5122_v31 = vld [vmem:[#allocation11 + $0x88] sm:$0xff]  }
 0x314   :  { %v1155_v37 = vpop.f32.mrb[10].mxu0  ;;  %v1189_v42 = vmul.f32 %v5962_v36, %v5962_v36 }
 0x315   :  { %v5966_v38 = vsel %vm1173_vm7, %v1155_v37, 0.0  ;;  %v4604_v39 = vpop.f32.mrb[11].mxu0 }
 0x316   :  { %v1181_v40 = vsel %vm1180_vm8, %v5966_v38, 0.0  ;;  %v1190_v41 = vmul.f32 %v5966_v38, %v5966_v38 }
 0x317   :  { %v1182_v43 = vadd.f32 %v1181_v40, %v5962_v36  ;;  %v1295_v40 = vld [vmem:[%s6399_s26] sm:$0x1] }
 0x318   :  { %v1191_v44 = vsel %vm1180_vm8, %v1190_v41, 0.0 }
 0x319   :  { %v1183_v45 = vrot.slane %v1182_v43, 4  ;;  %v1192_v46 = vadd.f32 %v1191_v44, %v1189_v42 }
 0x31b   :  { %v1184_v47 = vadd.f32 %v1183_v45, %v1182_v43  ;;  %v1193_v48 = vrot.slane %v1192_v46, 4  ;;  %v1316_v43 = vld [vmem:[%s6360_s5] sm:$0x1]  ;;  %v5997_v45 = vsub.s32 0, %v5954_v32 }
 0x31d   :  { %v1185_v49 = vrot.slane %v1184_v47, 2  ;;  %v1194_v50 = vadd.f32 %v1193_v48, %v1192_v46  ;;  %v5105_v48 = vld [vmem:[#allocation11 + $0x40] sm:$0xff]  }
 0x31f   :  { %v1186_v51 = vadd.f32 %v1185_v49, %v1184_v47  ;;  %v1195_v52 = vrot.slane %v1194_v50, 2 }
 0x321   :  { %v1187_v53 = vrot.slane %v1186_v51, 1  ;;  %v1196_v55 = vadd.f32 %v1195_v52, %v1194_v50  ;;  %v5106_v50 = vld [vmem:[#allocation11 + $0x48] sm:$0xff]   ;;  %v5108_v52 = vld [vmem:[#allocation11 + $0x58] sm:$0xff]  }
 0x323   :  { %v1197_v56 = vrot.slane %v1196_v55, 1  ;;  %v1188_v57 = vadd.f32 %v1187_v53, %v1186_v51  ;;  %v5107_v51 = vld [vmem:[#allocation11 + $0x50] sm:$0xff]   ;;  %v5109_v53 = vld [vmem:[#allocation11 + $0x60] sm:$0xff]  }
 0x325   :  { %v1198_v58 = vadd.f32 %v1197_v56, %v1196_v55  ;;  %v5110_v55 = vld [vmem:[#allocation11 + $0x68] sm:$0xff]   ;;  %v5111_v56 = vld [vmem:[#allocation11 + $0x70] sm:$0xff]  }
 0x327   :  { %v1200_v59 = vsel %vm1199_vm9, %v1188_v57, %v1198_v58  ;;  %v5112_v57 = vld [vmem:[#allocation11 + $0x78] sm:$0xff]   ;;  %v1886_v58 = vld [vmem:[#allocation13] sm:$0xff] }
 0x328   :  { %4638 = vmatmul.mubr.f32.vlgmr.msra.gmra.mrb[8].mxu1 %v1200_v59  ;;  %v1887_v59 = vld [vmem:[#allocation13 + $0x8] sm:$0xff] }
 0x329   :  { %4672 = vmatprep.mubr.msk.f32.mxu1 %vm5528_vm0, %v5527_v54  ;;  %4851 = vmatpush3.bf16.msra.mxu1 %v4850_v62  ;;  %v4874_v61 = vpack.c.bf16 %v1887_v59, %v1886_v58  ;;  %v1889_v62 = vld [vmem:[#allocation13 + $0x18] sm:$0xff]  ;;  %v1895_v58 = vld [vmem:[#allocation13 + $0x48] sm:$0xff] }
 0x32a   :  { %4852 = vmatprep.subr.bf16.mxu1 %v5529_v11  ;;  %v4877_v63 = vpack.c.bf16 %v1889_v62, %v1888_v60  ;;  %v1896_v60 = vld [vmem:[#allocation13 + $0x50] sm:$0xff] }
 0x32b   :  { %4875 = vmatpush3.bf16.msra.mxu0 %v4874_v61  ;;  %v1897_v61 = vld [vmem:[#allocation13 + $0x58] sm:$0xff] }
 0x32c   :  { %4876 = vmatprep.subr.bf16.mxu0 %v5529_v11  ;;  %v4889_v62 = vpack.c.bf16 %v1897_v61, %v1896_v60 }
 0x32d   :  { %4854 = vmatpush3.bf16.msra.mxu1 %v4853_v1  ;;  %v1891_v1 = vld [vmem:[#allocation13 + $0x28] sm:$0xff] }
 0x32e   :  { %4855 = vmatprep.subr.bf16.mxu1 %v5529_v11  ;;  %v4880_v2 = vpack.c.bf16 %v1891_v1, %v1890_v0  ;;  %v1899_v0 = vld [vmem:[#allocation13 + $0x68] sm:$0xff] }
 0x32f   :  { %4878 = vmatpush3.bf16.msra.mxu0 %v4877_v63  ;;  %v1898_v63 = vld [vmem:[#allocation13 + $0x60] sm:$0xff] }
 0x330   :  { %4879 = vmatprep.subr.bf16.mxu0 %v5529_v11  ;;  %v4892_v1 = vpack.c.bf16 %v1899_v0, %v1898_v63 }
 0x331   :  { %4857 = vmatpush3.bf16.msra.mxu1 %v4856_v4  ;;  %v1893_v4 = vld [vmem:[#allocation13 + $0x38] sm:$0xff] }
 0x332   :  { %4858 = vmatprep.subr.bf16.mxu1 %v5529_v11  ;;  %v4883_v6 = vpack.c.bf16 %v1893_v4, %v1892_v3  ;;  %v1901_v3 = vld [vmem:[#allocation13 + $0x78] sm:$0xff] }
 0x333   :  { %4881 = vmatpush3.bf16.msra.mxu0 %v4880_v2  ;;  %v1900_v2 = vld [vmem:[#allocation13 + $0x70] sm:$0xff] }
 0x334   :  { %4882 = vmatprep.subr.bf16.mxu0 %v5529_v11  ;;  %v4895_v4 = vpack.c.bf16 %v1901_v3, %v1900_v2  ;;  %v1980_v2 = vld [vmem:[%s6364_s9] sm:$0x1] }
 0x335   :  { %4860 = vmatpush3.bf16.msra.mxu1 %v4859_v7 }
 0x336   :  { %4861 = vmatprep.subr.bf16.mxu1 %v5529_v11 }
 0x337   :  { %4884 = vmatpush3.bf16.msra.mxu0 %v4883_v6 }
 0x338   :  { %4885 = vmatprep.subr.bf16.mxu0 %v5529_v11 }
 0x339   :  { %4863 = vmatpush3.bf16.msra.mxu1 %v4862_v10 }
 0x33a   :  { %4864 = vmatprep.subr.bf16.mxu1 %v5529_v11 }
 0x33d   :  { %4866 = vmatpush3.bf16.msra.mxu1 %v4865_v14 }
 0x33e   :  { %4867 = vmatprep.subr.bf16.mxu1 %v5529_v11 }
 0x341   :  { %4869 = vmatpush3.bf16.msra.mxu1 %v4868_v17 }
 0x342   :  { %4870 = vmatprep.subr.bf16.mxu1 %v5529_v11 }
 0x345   :  { %4872 = vmatpush3.bf16.msra.mxu1 %v4871_v20 }
 0x346   :  { %4675 = vmatprep.subr.bf16.mxu1 %v5527_v54 }
 0x3fb   :  { %v1283_v21 = vpop.f32.mrb[8].mxu1 }
 0x3fc   :  { %v1288_v22 = vmul.f32 0.02, %v1283_v21  ;;  %v4639_v23 = vpop.f32.mrb[9].mxu1 }
 0x3fd   :  { %v5116_v23 = vld [vmem:[#allocation11 + $0x18] sm:$0xff]  }
 0x3fe   :  { %v1289_v24 = vmul.f32 %v1288_v22, %v1288_v22 }
 0x400   :  { %v1291_v25 = vrot.slane %v1289_v24, 7  ;;  %v5117_v24 = vld [vmem:[#allocation11 + $0x20] sm:$0xff]  }
 0x402   :  { %v1293_v26 = vsub.f32 %v1288_v22, %v1291_v25  ;;  %v5118_v25 = vld [vmem:[#allocation11 + $0x28] sm:$0xff]  }
 0x404   :  { %v1294_v27 = vmax.f32 %v1293_v26, 0.0  ;;  %v5119_v26 = vld [vmem:[#allocation11 + $0x30] sm:$0xff]  }
 0x406   :  { %v1296_v28 = vadd.f32 1e-05, %v1294_v27  ;;  %v5120_v27 = vld [vmem:[#allocation11 + $0x38] sm:$0xff]  }
 0x408   :  { %5297 = vrsqrt.f32 %v1296_v28 }
 0x412   :  { %v5298_v35 = vpop.eup %5297 }
 0x413   :  { %v1305_v37 = vrot.slane %v5298_v35, %v5986_v34  ;;  %v5123_v35 = vld [vmem:[#allocation11 + $0x90] sm:$0xff]  }
 0x415   :  { %v1306_v39 = vcombine.high %v1305_v37, %v1305_v37  ;;  %v5124_v37 = vld [vmem:[#allocation11 + $0x98] sm:$0xff]  }
 0x417   :  { %v1313_v41 = vrot.slane %v1306_v39, %v5986_v34  ;;  %v5125_v39 = vld [vmem:[#allocation11 + $0xa0] sm:$0xff]  }
 0x419   :  { %v1315_v42 = vmul.f32 %v1313_v41, %v1295_v40  ;;  %v5126_v40 = vld [vmem:[#allocation11 + $0xa8] sm:$0xff]   ;;  %v5127_v41 = vld [vmem:[#allocation11 + $0xb0] sm:$0xff]  }
 0x41b   :  { %v1317_v44 = vmul.f32 %v1315_v42, %v1288_v22  ;;  %v5115_v22 = vld [vmem:[#allocation11 + $0x10] sm:$0xff]  }
 0x41d   :  { %v1318_v46 = vsub.f32 %v1316_v43, %v1317_v44  ;;  %v5129_v44 = vld [vmem:[#allocation11 + $0xc0] sm:$0xff]  }
 0x41f   :  { %v1323_v47 = vrot.slane %v1318_v46, %v5997_v45 }
 0x421   :  { %v1325_v49 = vsel %vm1199_vm9, %v1315_v42, %v1323_v47  ;;  %v5128_v42 = vld [vmem:[#allocation11 + $0xb8] sm:$0xff]   ;;  %v5130_v47 = vld [vmem:[#allocation11 + $0xc8] sm:$0xff]  }
 0x422   :  { %4673 = vmatmul.mubr.f32.vlgmr.msra.gmra.mrb[10].mxu1 %v1325_v49  ;;  %v5132_v49 = vld [vmem:[#allocation11 + $0xd8] sm:$0xff]  }
 0x423   :  { %4676 = vmatpush3.bf16.msra.mxu1 %v5105_v48  ;;  %4691 = vmatprep.mubr.msk.bf16.mxu1 %vm5528_vm0, %v5527_v54  ;;  %v5131_v48 = vld [vmem:[#allocation11 + $0xd0] sm:$0xff]  }
 0x424   :  { %4677 = vmatprep.subr.bf16.mxu1 %v5527_v54 }
 0x427   :  { %4678 = vmatpush3.bf16.msra.mxu1 %v5106_v50  ;;  %v5133_v50 = vld [vmem:[#allocation11 + $0xe0] sm:$0xff]  }
 0x428   :  { %4679 = vmatprep.subr.bf16.mxu1 %v5527_v54 }
 0x42b   :  { %4680 = vmatpush3.bf16.msra.mxu1 %v5107_v51  ;;  %v6047_v51 = vld [vmem:[#allocation2 + $0x18] sm:$0xff] }
 0x42c   :  { %4681 = vmatprep.subr.bf16.mxu1 %v5527_v54 }
 0x42f   :  { %4682 = vmatpush3.bf16.msra.mxu1 %v5108_v52  ;;  %v5134_v52 = vld [vmem:[#allocation11 + $0xe8] sm:$0xff]  }
 0x430   :  { %4683 = vmatprep.subr.bf16.mxu1 %v5527_v54 }
 0x433   :  { %4684 = vmatpush3.bf16.msra.mxu1 %v5109_v53  ;;  %v5135_v53 = vld [vmem:[#allocation11 + $0xf0] sm:$0xff]  }
 0x434   :  { %4685 = vmatprep.subr.bf16.mxu1 %v5527_v54 }
 0x437   :  { %4686 = vmatpush3.bf16.msra.mxu1 %v5110_v55  ;;  %v5136_v55 = vld [vmem:[#allocation11 + $0xf8] sm:$0xff]  }
 0x438   :  { %4687 = vmatprep.subr.bf16.mxu1 %v5527_v54 }
 0x43b   :  { %4688 = vmatpush3.bf16.msra.mxu1 %v5111_v56 }
 0x43c   :  { %4689 = vmatprep.subr.bf16.mxu1 %v5527_v54 }
 0x43f   :  { %4690 = vmatpush3.bf16.msra.mxu1 %v5112_v57  ;;  %v1894_v57 = vld [vmem:[#allocation13 + $0x40] sm:$0xff] }
 0x440   :  { %4695 = vmatprep.subr.bf16.mxu1 %v5527_v54  ;;  %v4886_v59 = vpack.c.bf16 %v1895_v58, %v1894_v57 }
 0x442   :  { %4887 = vmatpush3.bf16.msra.mxu0 %v4886_v59 }
 0x443   :  { %4888 = vmatprep.subr.bf16.mxu0 %v5529_v11 }
 0x446   :  { %4890 = vmatpush3.bf16.msra.mxu0 %v4889_v62 }
 0x447   :  { %4891 = vmatprep.subr.bf16.mxu0 %v5529_v11 }
 0x44a   :  { %4893 = vmatpush3.bf16.msra.mxu0 %v4892_v1 }
 0x44b   :  { %4894 = vmatprep.subr.bf16.mxu0 %v5529_v11 }
 0x44e   :  { %4896 = vmatpush3.bf16.msra.mxu0 %v4895_v4 }
 0x44f   :  { %4897 = vmatprep.subr.bf16.mxu0 %v5529_v11 }
 0x4f5   :  { %v1408_v7 = vpop.f32.mrb[10].mxu1 }
 0x4f6   :  { %v1415_v8 = vrot.slane %v1408_v7, %v5997_v45  ;;  %v4674_v9 = vpop.f32.mrb[11].mxu1  ;;  %v1421_v13 = vrot.slane %v1408_v7, %v6014_v5 }
 0x4f8   :  { %v1416_v10 = vmul.f32 %v1415_v8, %v5962_v36  ;;  %v1417_v12 = vmul.f32 %v1415_v8, %v5966_v38  ;;  %v5113_v36 = vld [vmem:[#allocation11] sm:$0xff]   ;;  %v5114_v38 = vld [vmem:[#allocation11 + $0x8] sm:$0xff]  }
 0x4fa   :  { %v1422_v14 = vadd.f32 %v1421_v13, %v1416_v10  ;;  %v1423_v15 = vadd.f32 %v1421_v13, %v1417_v12 }
 0x4fc   :  { %vm1424_vm10 = vcmp.gt.f32.partialorder %v1422_v14, 0.0  ;;  %vm1425_vm11 = vcmp.gt.f32.partialorder %v1423_v15, 0.0  ;;  %v1426_v16 = vmul.f32 0.2, %v1422_v14  ;;  %v1427_v17 = vmul.f32 0.2, %v1423_v15 }
 0x4fe   :  { %v1428_v18 = vsel %vm1424_vm10, %v1422_v14, %v1426_v16  ;;  %v1429_v19 = vsel %vm1425_vm11, %v1423_v15, %v1427_v17  ;;  %vm3034_vm10 = vcmask 1042432   ;;  %vm3472_vm11 = vcmask 1046528  }
 0x4ff   :  { %1430 = vst [vmem:[#allocation3 + $0x2] sm:$0x1f] %v1428_v18  ;;  %1431 = vst [vmem:[#allocation3 + $0x4] sm:$0xc0] %v1428_v18 }
 0x500   :  { %1432 = vst [vmem:[#allocation3 + $0xc] sm:$0x7] %v1429_v19 }
 0x507   :  { %v1452_v20 = vld [vmem:[#allocation3 + $0x1] ss:$2 sm:$0xff]  ;;  %v1433_v28 = vld [vmem:[#allocation3] ss:$2 sm:$0xff] }
 0x508   :  { %v1453_v21 = vpack.c.bf16 %v1452_v20, %v1452_v20  ;;  %v1434_v30 = vpack.c.bf16 %v1433_v28, %v1433_v28  ;;  %v1648_v43 = vld [vmem:[#allocation3 + $0x2] ss:$2 sm:$0xff]  ;;  %v1757_v56 = vld [vmem:[#allocation3 + $0x3] ss:$2 sm:$0xff]  ;;  %v2014_v28 = vld [vmem:[#allocation14 + $0x18] sm:$0xff] }
 0x509   :  { %v1649_v46 = vpack.c.bf16 %v1648_v43, %v1648_v43 }
 0x50a   :  { %4692 = vmatmul.mubr.bf16.vlgmr.msra.gmra.mrb[12].mxu1 %v1453_v21 }
 0x50b   :  { %4696 = vmatpush3.bf16.msra.mxu1 %v5113_v36  ;;  %4711 = vmatprep.mubr.msk.bf16.mxu1 %vm5528_vm0, %v5527_v54 }
 0x50c   :  { %4697 = vmatprep.subr.bf16.mxu1 %v5527_v54 }
 0x50f   :  { %4698 = vmatpush3.bf16.msra.mxu1 %v5114_v38 }
 0x510   :  { %4699 = vmatprep.subr.bf16.mxu1 %v5527_v54 }
 0x513   :  { %4700 = vmatpush3.bf16.msra.mxu1 %v5115_v22 }
 0x514   :  { %4701 = vmatprep.subr.bf16.mxu1 %v5527_v54 }
 0x517   :  { %4702 = vmatpush3.bf16.msra.mxu1 %v5116_v23 }
 0x518   :  { %4703 = vmatprep.subr.bf16.mxu1 %v5527_v54 }
 0x51b   :  { %4704 = vmatpush3.bf16.msra.mxu1 %v5117_v24  ;;  %v2011_v24 = vld [vmem:[#allocation14] sm:$0xff] }
 0x51c   :  { %4705 = vmatprep.subr.bf16.mxu1 %v5527_v54 }
 0x51f   :  { %4706 = vmatpush3.bf16.msra.mxu1 %v5118_v25  ;;  %v2012_v25 = vld [vmem:[#allocation14 + $0x8] sm:$0xff] }
 0x520   :  { %4707 = vmatprep.subr.bf16.mxu1 %v5527_v54 }
 0x523   :  { %4708 = vmatpush3.bf16.msra.mxu1 %v5119_v26  ;;  %v4898_v26 = vpack.c.bf16 %v2012_v25, %v2011_v24  ;;  %v5160_v24 = vld [vmem:[%s6368_s13 + $0xf4] ss:$8 sps:$4 sm:$0xff]   ;;  %v5531_v25 = vmov 0  }
 0x524   :  { %4709 = vmatprep.subr.bf16.mxu1 %v5527_v54 }
 0x527   :  { %4710 = vmatpush3.bf16.msra.mxu1 %v5120_v27  ;;  %v2013_v27 = vld [vmem:[#allocation14 + $0x10] sm:$0xff] }
 0x528   :  { %4715 = vmatprep.subr.bf16.mxu1 %v5527_v54 }
 0x52a   :  { %4712 = vmatmul.mubr.bf16.vlgmr.msra.gmra.mrb[12].mxu1 %v1434_v30  ;;  %v2015_v30 = vld [vmem:[#allocation14 + $0x20] sm:$0xff] }
 0x52b   :  { %4716 = vmatpush3.bf16.msra.mxu1 %v5121_v29  ;;  %4731 = vmatprep.mubr.msk.bf16.mxu1 %vm5528_vm0, %v5527_v54  ;;  %v4901_v29 = vpack.c.bf16 %v2014_v28, %v2013_v27  ;;  %v5163_v27 = vld [vmem:[%s6368_s13 + $0x4] ss:$8 sps:$4 sm:$0xff]  }
 0x52c   :  { %4717 = vmatprep.subr.bf16.mxu1 %v5527_v54  ;;  %v2760_v28 = vld [vmem:[#allocation16 + $0x80] sm:$0xff] }
 0x52f   :  { %4718 = vmatpush3.bf16.msra.mxu1 %v5122_v31  ;;  %v2016_v31 = vld [vmem:[#allocation14 + $0x28] sm:$0xff] }
 0x530   :  { %4719 = vmatprep.subr.bf16.mxu1 %v5527_v54 }
 0x533   :  { %4720 = vmatpush3.bf16.msra.mxu1 %v5123_v35  ;;  %v4904_v35 = vpack.c.bf16 %v2016_v31, %v2015_v30  ;;  %v2744_v30 = vld [vmem:[#allocation16] sm:$0xff] }
 0x534   :  { %4721 = vmatprep.subr.bf16.mxu1 %v5527_v54 }
 0x537   :  { %4722 = vmatpush3.bf16.msra.mxu1 %v5124_v37  ;;  %v2017_v37 = vld [vmem:[#allocation14 + $0x30] sm:$0xff] }
 0x538   :  { %4723 = vmatprep.subr.bf16.mxu1 %v5527_v54 }
 0x53b   :  { %4724 = vmatpush3.bf16.msra.mxu1 %v5125_v39  ;;  %v2018_v39 = vld [vmem:[#allocation14 + $0x38] sm:$0xff] }
 0x53c   :  { %4725 = vmatprep.subr.bf16.mxu1 %v5527_v54 }
 0x53f   :  { %4726 = vmatpush3.bf16.msra.mxu1 %v5126_v40  ;;  %v4907_v40 = vpack.c.bf16 %v2018_v39, %v2017_v37  ;;  %v2762_v37 = vld [vmem:[#allocation16 + $0x90] sm:$0xff]  ;;  %v2763_v39 = vld [vmem:[#allocation16 + $0x98] sm:$0xff] }
 0x540   :  { %4727 = vmatprep.subr.bf16.mxu1 %v5527_v54 }
 0x543   :  { %4728 = vmatpush3.bf16.msra.mxu1 %v5127_v41  ;;  %v2019_v41 = vld [vmem:[#allocation14 + $0x40] sm:$0xff] }
 0x544   :  { %4729 = vmatprep.subr.bf16.mxu1 %v5527_v54 }
 0x547   :  { %4730 = vmatpush3.bf16.msra.mxu1 %v5128_v42  ;;  %v2020_v42 = vld [vmem:[#allocation14 + $0x48] sm:$0xff] }
 0x548   :  { %4735 = vmatprep.subr.bf16.mxu1 %v5527_v54  ;;  %v4910_v43 = vpack.c.bf16 %v2020_v42, %v2019_v41  ;;  %v4925_v41 = vpack.c.bf16 %v2763_v39, %v2762_v37  ;;  %v2746_v42 = vld [vmem:[#allocation16 + $0x10] sm:$0xff] }
 0x549   :  { %v5214_v37 = vld [vmem:[%s6368_s13 + $0x194] ss:$8 sps:$4 sm:$0xff]   ;;  %v5212_v39 = vld [vmem:[%s6368_s13 + $0x190] ss:$8 sps:$4 sm:$0xff]  }
 0x54a   :  { %4732 = vmatmul.mubr.bf16.vlgmr.msra.gmra.mrb[12].mxu1 %v1649_v46  ;;  %v2022_v46 = vld [vmem:[#allocation14 + $0x58] sm:$0xff] }
 0x54b   :  { %4736 = vmatpush3.bf16.msra.mxu1 %v5129_v44  ;;  %4751 = vmatprep.mubr.msk.bf16.mxu1 %vm5528_vm0, %v5527_v54  ;;  %v2021_v44 = vld [vmem:[#allocation14 + $0x50] sm:$0xff] }
 0x54c   :  { %4737 = vmatprep.subr.bf16.mxu1 %v5527_v54 }
 0x54f   :  { %4738 = vmatpush3.bf16.msra.mxu1 %v5130_v47  ;;  %v4913_v47 = vpack.c.bf16 %v2022_v46, %v2021_v44 }
 0x550   :  { %4739 = vmatprep.subr.bf16.mxu1 %v5527_v54 }
 0x553   :  { %4740 = vmatpush3.bf16.msra.mxu1 %v5131_v48  ;;  %v2023_v48 = vld [vmem:[#allocation14 + $0x60] sm:$0xff] }
 0x554   :  { %4741 = vmatprep.subr.bf16.mxu1 %v5527_v54  ;;  %v1758_v54 = vpack.c.bf16 %v1757_v56, %v1757_v56  ;;  %v5139_v56 = vld [vmem:[%s6368_s13 + $0x84] ss:$8 sps:$4 sm:$0xff]  }
 0x557   :  { %4742 = vmatpush3.bf16.msra.mxu1 %v5132_v49  ;;  %v2024_v49 = vld [vmem:[#allocation14 + $0x68] sm:$0xff] }
 0x558   :  { %4743 = vmatprep.subr.bf16.mxu1 %v6047_v51 }
 0x55b   :  { %4744 = vmatpush3.bf16.msra.mxu1 %v5133_v50  ;;  %v4916_v50 = vpack.c.bf16 %v2024_v49, %v2023_v48 }
 0x55c   :  { %4745 = vmatprep.subr.bf16.mxu1 %v6047_v51 }
 0x55f   :  { %4746 = vmatpush3.bf16.msra.mxu1 %v5134_v52  ;;  %v2025_v52 = vld [vmem:[#allocation14 + $0x70] sm:$0xff] }
 0x560   :  { %4747 = vmatprep.subr.bf16.mxu1 %v6047_v51 }
 0x563   :  { %4748 = vmatpush3.bf16.msra.mxu1 %v5135_v53  ;;  %v2026_v53 = vld [vmem:[#allocation14 + $0x78] sm:$0xff] }
 0x564   :  { %4749 = vmatprep.subr.bf16.mxu1 %v6047_v51 }
 0x567   :  { %4750 = vmatpush3.bf16.msra.mxu1 %v5136_v55  ;;  %v4919_v55 = vpack.c.bf16 %v2026_v53, %v2025_v52 }
 0x56a   :  { %4752 = vmatmul.mubr.bf16.vlgmr.msra.gmra.mrb[12].mxu1 %v1758_v54 }
 0x63d   :  { %v1858_v6 = vpop.f32.mrb[12].mxu1 }
 0x63e   :  { %v6060_v7 = vsel %vm1870_vm1, %v1858_v6, 0.0  ;;  %v4753_v8 = vpop.f32.mrb[13].mxu1  ;;  %v2001_v6 = vld [vmem:[%s6365_s10] sm:$0x1] }
 0x63f   :  { %v1872_v9 = vrot.slane %v6060_v7, 4  ;;  %v1878_v10 = vmul.f32 %v6060_v7, %v6060_v7  ;;  %v1861_v12 = vpop.f32.mrb[14].mxu1 }
 0x640   :  { %v4754_v13 = vpop.f32.mrb[15].mxu1  ;;  %v5137_v12 = vld [vmem:[%s6368_s13 + $0x80] ss:$8 sps:$4 sm:$0xff]  }
 0x641   :  { %v1873_v14 = vadd.f32 %v1872_v9, %v6060_v7  ;;  %v1879_v15 = vrot.slane %v1878_v10, 4  ;;  %v5142_v13 = vld [vmem:[%s6368_s13 + $0x94] ss:$8 sps:$4 sm:$0xff]  }
 0x643   :  { %v1874_v16 = vrot.slane %v1873_v14, 2  ;;  %v1880_v17 = vadd.f32 %v1879_v15, %v1878_v10  ;;  %v5140_v15 = vld [vmem:[%s6368_s13 + $0x90] ss:$8 sps:$4 sm:$0xff]  }
 0x645   :  { %v1875_v18 = vadd.f32 %v1874_v16, %v1873_v14  ;;  %v1881_v19 = vrot.slane %v1880_v17, 2  ;;  %v5145_v16 = vld [vmem:[%s6368_s13 + $0xa4] ss:$8 sps:$4 sm:$0xff]  }
 0x647   :  { %v1876_v20 = vrot.slane %v1875_v18, 1  ;;  %v1882_v36 = vadd.f32 %v1881_v19, %v1880_v17  ;;  %v5143_v17 = vld [vmem:[%s6368_s13 + $0xa0] ss:$8 sps:$4 sm:$0xff]   ;;  %v5146_v19 = vld [vmem:[%s6368_s13 + $0xb0] ss:$8 sps:$4 sm:$0xff]  }
 0x649   :  { %v1883_v21 = vrot.slane %v1882_v36, 1  ;;  %v1877_v38 = vadd.f32 %v1876_v20, %v1875_v18  ;;  %v5148_v18 = vld [vmem:[%s6368_s13 + $0xb4] ss:$8 sps:$4 sm:$0xff]   ;;  %v5151_v20 = vld [vmem:[%s6368_s13 + $0xc4] ss:$8 sps:$4 sm:$0xff]  }
 0x64b   :  { %v1884_v22 = vadd.f32 %v1883_v21, %v1882_v36  ;;  %v5149_v36 = vld [vmem:[%s6368_s13 + $0xc0] ss:$8 sps:$4 sm:$0xff]   ;;  %v5154_v21 = vld [vmem:[%s6368_s13 + $0xd4] ss:$8 sps:$4 sm:$0xff]  }
 0x64d   :  { %v1885_v23 = vsel %vm1199_vm9, %v1877_v38, %v1884_v22  ;;  %v5152_v38 = vld [vmem:[%s6368_s13 + $0xd0] ss:$8 sps:$4 sm:$0xff]   ;;  %v5155_v22 = vld [vmem:[%s6368_s13 + $0xe0] ss:$8 sps:$4 sm:$0xff]  }
 0x64e   :  { %4788 = vmatmul.mubr.f32.vlgmr.msra.gmra.mrb[12].mxu0 %v1885_v23  ;;  %v5157_v23 = vld [vmem:[%s6368_s13 + $0xe4] ss:$8 sps:$4 sm:$0xff]  }
 0x64f   :  { %4822 = vmatprep.mubr.msk.f32.mxu0 %vm5528_vm0, %v6047_v51  ;;  %4899 = vmatpush3.bf16.msra.mxu0 %v4898_v26  ;;  %v5158_v26 = vld [vmem:[%s6368_s13 + $0xf0] ss:$8 sps:$4 sm:$0xff]  }
 0x650   :  { %4900 = vmatprep.subr.bf16.mxu0 %v5529_v11 }
 0x653   :  { %4902 = vmatpush3.bf16.msra.mxu0 %v4901_v29  ;;  %v2761_v29 = vld [vmem:[#allocation16 + $0x88] sm:$0xff] }
 0x654   :  { %4903 = vmatprep.subr.bf16.mxu0 %v5529_v11  ;;  %v4921_v31 = vpack.c.bf16 %v2761_v29, %v2760_v28  ;;  %v5211_v28 = vld [vmem:[%s6368_s13 + $0x184] ss:$8 sps:$4 sm:$0xff]  }
 0x656   :  { %4922 = vmatprep.subr.bf16.mxu1 %v4921_v31  ;;  %v5209_v31 = vld [vmem:[%s6368_s13 + $0x180] ss:$8 sps:$4 sm:$0xff]  }
 0x657   :  { %4905 = vmatpush3.bf16.msra.mxu0 %v4904_v35  ;;  %v2745_v35 = vld [vmem:[#allocation16 + $0x8] sm:$0xff] }
 0x658   :  { %4906 = vmatprep.subr.bf16.mxu0 %v5529_v11 }
 0x65b   :  { %4908 = vmatpush3.bf16.msra.mxu0 %v4907_v40  ;;  %v4923_v40 = vpack.c.bf16 %v2745_v35, %v2744_v30 }
 0x65c   :  { %4909 = vmatprep.subr.bf16.mxu0 %v5529_v11 }
 0x65d   :  { %4924 = vmatpush3.bf16.msra.mxu1 %v4923_v40  ;;  %v5217_v40 = vld [vmem:[%s6368_s13 + $0x1a4] ss:$8 sps:$4 sm:$0xff]  }
 0x65e   :  { %4926 = vmatprep.subr.bf16.mxu1 %v4925_v41  ;;  %v5215_v41 = vld [vmem:[%s6368_s13 + $0x1a0] ss:$8 sps:$4 sm:$0xff]  }
 0x65f   :  { %4911 = vmatpush3.bf16.msra.mxu0 %v4910_v43  ;;  %v2747_v43 = vld [vmem:[#allocation16 + $0x18] sm:$0xff] }
 0x660   :  { %4912 = vmatprep.subr.bf16.mxu0 %v5529_v11  ;;  %v4927_v44 = vpack.c.bf16 %v2747_v43, %v2746_v42  ;;  %v5220_v42 = vld [vmem:[%s6368_s13 + $0x1b4] ss:$8 sps:$4 sm:$0xff]   ;;  %v5223_v43 = vld [vmem:[%s6368_s13 + $0x1c4] ss:$8 sps:$4 sm:$0xff]  }
 0x662   :  { %4928 = vmatpush3.bf16.msra.mxu1 %v4927_v44  ;;  %v5221_v44 = vld [vmem:[%s6368_s13 + $0x1c0] ss:$8 sps:$4 sm:$0xff]  }
 0x663   :  { %4914 = vmatpush3.bf16.msra.mxu0 %v4913_v47 }
 0x664   :  { %4915 = vmatprep.subr.bf16.mxu0 %v5529_v11 }
 0x667   :  { %4917 = vmatpush3.bf16.msra.mxu0 %v4916_v50 }
 0x668   :  { %4918 = vmatprep.subr.bf16.mxu0 %v5529_v11 }
 0x66b   :  { %4920 = vmatpush3.bf16.msra.mxu0 %v4919_v55 }
 0x66c   :  { %2231 = vmatprep.subr.bf16.mxu0 %v5139_v56  ;;  %v5161_v56 = vld [vmem:[%s6368_s13] ss:$8 sps:$4 sm:$0xff]  }
 0x721   :  { %v1968_v54 = vpop.f32.mrb[12].mxu0 }
 0x722   :  { %v1973_v57 = vmul.f32 0.055555556, %v1968_v54  ;;  %v4789_v58 = vpop.f32.mrb[13].mxu0 }
 0x724   :  { %v1974_v59 = vmul.f32 %v1973_v57, %v1973_v57 }
 0x726   :  { %v1976_v60 = vrot.slane %v1974_v59, 7  ;;  %v5166_v59 = vld [vmem:[%s6368_s13 + $0x14] ss:$8 sps:$4 sm:$0xff]  }
 0x728   :  { %v1978_v61 = vsub.f32 %v1973_v57, %v1976_v60  ;;  %v5169_v60 = vld [vmem:[%s6368_s13 + $0x24] ss:$8 sps:$4 sm:$0xff]  }
 0x72a   :  { %v1979_v62 = vmax.f32 %v1978_v61, 0.0  ;;  %v5167_v61 = vld [vmem:[%s6368_s13 + $0x20] ss:$8 sps:$4 sm:$0xff]  }
 0x72c   :  { %v1981_v63 = vadd.f32 1e-05, %v1979_v62  ;;  %v5172_v62 = vld [vmem:[%s6368_s13 + $0x34] ss:$8 sps:$4 sm:$0xff]  }
 0x72e   :  { %5299 = vrsqrt.f32 %v1981_v63  ;;  %v5170_v63 = vld [vmem:[%s6368_s13 + $0x30] ss:$8 sps:$4 sm:$0xff]  }
 0x738   :  { %v5300_v0 = vpop.eup %5299 }
 0x739   :  { %v1990_v11 = vrot.slane %v5300_v0, %v5986_v34  ;;  %v5175_v0 = vld [vmem:[%s6368_s13 + $0x44] ss:$8 sps:$4 sm:$0xff]  }
 0x73b   :  { %v1991_v1 = vcombine.high %v1990_v11, %v1990_v11  ;;  %v5173_v11 = vld [vmem:[%s6368_s13 + $0x40] ss:$8 sps:$4 sm:$0xff]  }
 0x73d   :  { %v1998_v3 = vrot.slane %v1991_v1, %v5986_v34  ;;  %v5178_v1 = vld [vmem:[%s6368_s13 + $0x54] ss:$8 sps:$4 sm:$0xff]  }
 0x73f   :  { %v2000_v4 = vmul.f32 %v1998_v3, %v1980_v2  ;;  %v5176_v2 = vld [vmem:[%s6368_s13 + $0x50] ss:$8 sps:$4 sm:$0xff]   ;;  %v5181_v3 = vld [vmem:[%s6368_s13 + $0x64] ss:$8 sps:$4 sm:$0xff]  }
 0x741   :  { %v2002_v8 = vmul.f32 %v2000_v4, %v1973_v57 }
 0x743   :  { %v2003_v9 = vsub.f32 %v2001_v6, %v2002_v8  ;;  %v5184_v6 = vld [vmem:[%s6368_s13 + $0x74] ss:$8 sps:$4 sm:$0xff]   ;;  %v5182_v8 = vld [vmem:[%s6368_s13 + $0x70] ss:$8 sps:$4 sm:$0xff]  }
 0x745   :  { %v2008_v10 = vrot.slane %v2003_v9, %v5997_v45  ;;  %v5187_v9 = vld [vmem:[%s6368_s13 + $0x104] ss:$8 sps:$4 sm:$0xff]  }
 0x747   :  { %v2010_v14 = vsel %vm1199_vm9, %v2000_v4, %v2008_v10  ;;  %v5179_v4 = vld [vmem:[%s6368_s13 + $0x60] ss:$8 sps:$4 sm:$0xff]  }
 0x748   :  { %4823 = vmatmul.mubr.f32.vlgmr.msra.gmra.mrb[14].mxu0 %v2010_v14 }
 0x749   :  { %2232 = vmatpush1.bf16.msra.mxu0 %v5137_v12  ;;  %2263 = vmatprep.mubr.bf16.mxu0 %v5531_v25 }
 0x74a   :  { %2233 = vmatprep.subr.bf16.mxu0 %v5142_v13  ;;  %v5185_v13 = vld [vmem:[%s6368_s13 + $0x100] ss:$8 sps:$4 sm:$0xff]  }
 0x74d   :  { %2234 = vmatpush1.bf16.msra.mxu0 %v5140_v15  ;;  %v5190_v15 = vld [vmem:[%s6368_s13 + $0x114] ss:$8 sps:$4 sm:$0xff]  }
 0x74e   :  { %2235 = vmatprep.subr.bf16.mxu0 %v5145_v16  ;;  %v5188_v16 = vld [vmem:[%s6368_s13 + $0x110] ss:$8 sps:$4 sm:$0xff]  }
 0x751   :  { %2236 = vmatpush1.bf16.msra.mxu0 %v5143_v17  ;;  %v5193_v17 = vld [vmem:[%s6368_s13 + $0x124] ss:$8 sps:$4 sm:$0xff]  }
 0x752   :  { %2237 = vmatprep.subr.bf16.mxu0 %v5148_v18  ;;  %v5191_v18 = vld [vmem:[%s6368_s13 + $0x120] ss:$8 sps:$4 sm:$0xff]  }
 0x755   :  { %2238 = vmatpush1.bf16.msra.mxu0 %v5146_v19  ;;  %v5196_v19 = vld [vmem:[%s6368_s13 + $0x134] ss:$8 sps:$4 sm:$0xff]  }
 0x756   :  { %2239 = vmatprep.subr.bf16.mxu0 %v5151_v20  ;;  %v5194_v20 = vld [vmem:[%s6368_s13 + $0x130] ss:$8 sps:$4 sm:$0xff]  }
 0x759   :  { %2240 = vmatpush1.bf16.msra.mxu0 %v5149_v36  ;;  %v5199_v36 = vld [vmem:[%s6368_s13 + $0x144] ss:$8 sps:$4 sm:$0xff]  }
 0x75a   :  { %2241 = vmatprep.subr.bf16.mxu0 %v5154_v21  ;;  %v5197_v21 = vld [vmem:[%s6368_s13 + $0x140] ss:$8 sps:$4 sm:$0xff]  }
 0x75d   :  { %2242 = vmatpush1.bf16.msra.mxu0 %v5152_v38  ;;  %v5202_v38 = vld [vmem:[%s6368_s13 + $0x154] ss:$8 sps:$4 sm:$0xff]  }
 0x75e   :  { %2243 = vmatprep.subr.bf16.mxu0 %v5157_v23  ;;  %v5205_v23 = vld [vmem:[%s6368_s13 + $0x164] ss:$8 sps:$4 sm:$0xff]  }
 0x761   :  { %2244 = vmatpush1.bf16.msra.mxu0 %v5155_v22  ;;  %v5200_v22 = vld [vmem:[%s6368_s13 + $0x150] ss:$8 sps:$4 sm:$0xff]  }
 0x762   :  { %2245 = vmatprep.subr.bf16.mxu0 %v5160_v24  ;;  %v5203_v24 = vld [vmem:[%s6368_s13 + $0x160] ss:$8 sps:$4 sm:$0xff]  }
 0x765   :  { %2246 = vmatpush1.bf16.msra.mxu0 %v5158_v26  ;;  %v5208_v26 = vld [vmem:[%s6368_s13 + $0x174] ss:$8 sps:$4 sm:$0xff]  }
 0x766   :  { %2354 = vmatprep.subr.bf16.mxu0 %v5163_v27  ;;  %v5206_v27 = vld [vmem:[%s6368_s13 + $0x170] ss:$8 sps:$4 sm:$0xff]  }
 0x81b   :  { %v2093_v46 = vpop.f32.mrb[14].mxu0 }
 0x81c   :  { %v2100_v47 = vrot.slane %v2093_v46, %v5997_v45  ;;  %v4824_v48 = vpop.f32.mrb[15].mxu0  ;;  %v2105_v50 = vrot.slane %v2093_v46, %v6014_v5  ;;  %v5226_v46 = vld [vmem:[%s6368_s13 + $0x1d4] ss:$8 sps:$4 sm:$0xff]  }
 0x81d   :  { %v5229_v48 = vld [vmem:[%s6368_s13 + $0x1e4] ss:$8 sps:$4 sm:$0xff]  }
 0x81e   :  { %v2101_v49 = vmul.f32 %v2100_v47, %v6060_v7  ;;  %v5164_v7 = vld [vmem:[%s6368_s13 + $0x10] ss:$8 sps:$4 sm:$0xff]  }
 0x81f   :  { %v5224_v47 = vld [vmem:[%s6368_s13 + $0x1d0] ss:$8 sps:$4 sm:$0xff]  }
 0x820   :  { %v2106_v52 = vadd.f32 %v2105_v50, %v2101_v49  ;;  %v5227_v49 = vld [vmem:[%s6368_s13 + $0x1e0] ss:$8 sps:$4 sm:$0xff]   ;;  %v5232_v50 = vld [vmem:[%s6368_s13 + $0x1f4] ss:$8 sps:$4 sm:$0xff]  }
 0x822   :  { %vm2107_vm0 = vcmp.gt.f32.partialorder %v2106_v52, 0.0  ;;  %v2108_v53 = vmul.f32 0.2, %v2106_v52 }
 0x824   :  { %v2109_v55 = vsel %vm2107_vm0, %v2106_v52, %v2108_v53  ;;  %v5230_v52 = vld [vmem:[%s6368_s13 + $0x1f0] ss:$8 sps:$4 sm:$0xff]  }
 0x825   :  { %2110 = vst [vmem:[#allocation4 + $0x2] ss:$7 sps:$4 sm:$0x77] %v2109_v55  }
 0x82c   :  { %v2131_v54 = vld [vmem:[#allocation4 + $0x1] sm:$0xff]  ;;  %v2132_v57 = vld [vmem:[#allocation4 + $0x9] sm:$0x3f] }
 0x82d   :  { %v2133_v58 = vpack.c.bf16 %v2132_v57, %v2131_v54  ;;  %v2112_v10 = vld [vmem:[#allocation4] sm:$0xff]  ;;  %v2113_v12 = vld [vmem:[#allocation4 + $0x8] sm:$0x3f]  ;;  %v2765_v57 = vld [vmem:[#allocation16 + $0xa8] sm:$0xff] }
 0x82e   :  { %v2114_v14 = vpack.c.bf16 %v2113_v12, %v2112_v10  ;;  %v2397_v29 = vld [vmem:[#allocation4 + $0x2] sm:$0xff]  ;;  %v2398_v30 = vld [vmem:[#allocation4 + $0xa] sm:$0x3f]  ;;  %v2770_v10 = vld [vmem:[#allocation16 + $0xd0] sm:$0xff] }
 0x82f   :  { %2264 = vmatmul.mubr.bf16.vlgmr.msra.gmra.mrb[16].mxu0 %v2133_v58  ;;  %v2399_v35 = vpack.c.bf16 %v2398_v30, %v2397_v29  ;;  %v2544_v53 = vld [vmem:[#allocation4 + $0x3] sm:$0xff]  ;;  %v2545_v55 = vld [vmem:[#allocation4 + $0xb] sm:$0x3f] }
 0x830   :  { %2355 = vmatpush1.bf16.msra.mxu0 %v5161_v56  ;;  %2386 = vmatprep.mubr.bf16.mxu0 %v5531_v25  ;;  %v2546_v56 = vpack.c.bf16 %v2545_v55, %v2544_v53  ;;  %v2764_v54 = vld [vmem:[#allocation16 + $0xa0] sm:$0xff]  ;;  %v2771_v12 = vld [vmem:[#allocation16 + $0xd8] sm:$0xff] }
 0x831   :  { %2356 = vmatprep.subr.bf16.mxu0 %v5166_v59  ;;  %v4929_v58 = vpack.c.bf16 %v2765_v57, %v2764_v54  ;;  %v2748_v59 = vld [vmem:[#allocation16 + $0x20] sm:$0xff] }
 0x833   :  { %4930 = vmatprep.subr.bf16.mxu1 %v4929_v58 }
 0x834   :  { %2357 = vmatpush1.bf16.msra.mxu0 %v5164_v7  ;;  %v2749_v7 = vld [vmem:[#allocation16 + $0x28] sm:$0xff] }
 0x835   :  { %2358 = vmatprep.subr.bf16.mxu0 %v5169_v60  ;;  %v4931_v60 = vpack.c.bf16 %v2749_v7, %v2748_v59 }
 0x837   :  { %4932 = vmatpush3.bf16.msra.mxu1 %v4931_v60 }
 0x838   :  { %2359 = vmatpush1.bf16.msra.mxu0 %v5167_v61  ;;  %v2766_v61 = vld [vmem:[#allocation16 + $0xb0] sm:$0xff] }
 0x839   :  { %2360 = vmatprep.subr.bf16.mxu0 %v5172_v62  ;;  %v2767_v62 = vld [vmem:[#allocation16 + $0xb8] sm:$0xff] }
 0x83c   :  { %2361 = vmatpush1.bf16.msra.mxu0 %v5170_v63  ;;  %v4933_v63 = vpack.c.bf16 %v2767_v62, %v2766_v61 }
 0x83d   :  { %2362 = vmatprep.subr.bf16.mxu0 %v5175_v0  ;;  %v2750_v0 = vld [vmem:[#allocation16 + $0x30] sm:$0xff] }
 0x83e   :  { %4934 = vmatprep.subr.bf16.mxu1 %v4933_v63 }
 0x840   :  { %2363 = vmatpush1.bf16.msra.mxu0 %v5173_v11  ;;  %v2751_v11 = vld [vmem:[#allocation16 + $0x38] sm:$0xff] }
 0x841   :  { %2364 = vmatprep.subr.bf16.mxu0 %v5178_v1  ;;  %v4935_v1 = vpack.c.bf16 %v2751_v11, %v2750_v0 }
 0x843   :  { %4936 = vmatpush3.bf16.msra.mxu1 %v4935_v1 }
 0x844   :  { %2365 = vmatpush1.bf16.msra.mxu0 %v5176_v2  ;;  %v2768_v2 = vld [vmem:[#allocation16 + $0xc0] sm:$0xff] }
 0x845   :  { %2366 = vmatprep.subr.bf16.mxu0 %v5181_v3  ;;  %v2769_v3 = vld [vmem:[#allocation16 + $0xc8] sm:$0xff] }
 0x848   :  { %2367 = vmatpush1.bf16.msra.mxu0 %v5179_v4  ;;  %v4937_v4 = vpack.c.bf16 %v2769_v3, %v2768_v2 }
 0x849   :  { %2368 = vmatprep.subr.bf16.mxu0 %v5184_v6  ;;  %v2752_v6 = vld [vmem:[#allocation16 + $0x40] sm:$0xff] }
 0x84a   :  { %4938 = vmatprep.subr.bf16.mxu1 %v4937_v4 }
 0x84c   :  { %2369 = vmatpush1.bf16.msra.mxu0 %v5182_v8  ;;  %v2753_v8 = vld [vmem:[#allocation16 + $0x48] sm:$0xff] }
 0x84d   :  { %2497 = vmatprep.subr.bf16.mxu0 %v5187_v9  ;;  %v4939_v9 = vpack.c.bf16 %v2753_v8, %v2752_v6 }
 0x84f   :  { %2387 = vmatmul.mubr.bf16.vlgmr.msra.gmra.mrb[16].mxu0 %v2114_v14  ;;  %4940 = vmatpush3.bf16.msra.mxu1 %v4939_v9  ;;  %v2754_v14 = vld [vmem:[#allocation16 + $0x50] sm:$0xff] }
 0x850   :  { %2498 = vmatpush1.bf16.msra.mxu0 %v5185_v13  ;;  %2529 = vmatprep.mubr.bf16.mxu0 %v5531_v25  ;;  %v4941_v13 = vpack.c.bf16 %v2771_v12, %v2770_v10 }
 0x851   :  { %2499 = vmatprep.subr.bf16.mxu0 %v5190_v15  ;;  %v2755_v15 = vld [vmem:[#allocation16 + $0x58] sm:$0xff] }
 0x852   :  { %4942 = vmatprep.subr.bf16.mxu1 %v4941_v13 }
 0x854   :  { %2500 = vmatpush1.bf16.msra.mxu0 %v5188_v16  ;;  %v4943_v16 = vpack.c.bf16 %v2755_v15, %v2754_v14  ;;  %v2886_v15 = vld [vmem:[#allocation17 + $0x8] sm:$0xff] }
 0x855   :  { %2501 = vmatprep.subr.bf16.mxu0 %v5193_v17  ;;  %v2772_v17 = vld [vmem:[#allocation16 + $0xe0] sm:$0xff] }
 0x856   :  { %4944 = vmatpush3.bf16.msra.mxu1 %v4943_v16  ;;  %v2888_v16 = vld [vmem:[#allocation17 + $0x18] sm:$0xff] }
 0x858   :  { %2502 = vmatpush1.bf16.msra.mxu0 %v5191_v18  ;;  %v2773_v18 = vld [vmem:[#allocation16 + $0xe8] sm:$0xff] }
 0x859   :  { %2503 = vmatprep.subr.bf16.mxu0 %v5196_v19  ;;  %v4945_v19 = vpack.c.bf16 %v2773_v18, %v2772_v17  ;;  %v4953_v17 = vpack.c.bf16 %v2888_v16, %v2886_v15  ;;  %v2885_v18 = vld [vmem:[#allocation17] sm:$0xff] }
 0x85b   :  { %4946 = vmatprep.subr.bf16.mxu1 %v4945_v19  ;;  %v2887_v19 = vld [vmem:[#allocation17 + $0x10] sm:$0xff] }
 0x85c   :  { %2504 = vmatpush1.bf16.msra.mxu0 %v5194_v20  ;;  %v2756_v20 = vld [vmem:[#allocation16 + $0x60] sm:$0xff] }
 0x85d   :  { %2505 = vmatprep.subr.bf16.mxu0 %v5199_v36  ;;  %v2757_v36 = vld [vmem:[#allocation16 + $0x68] sm:$0xff] }
 0x860   :  { %2506 = vmatpush1.bf16.msra.mxu0 %v5197_v21  ;;  %v2774_v21 = vld [vmem:[#allocation16 + $0xf0] sm:$0xff] }
 0x861   :  { %2507 = vmatprep.subr.bf16.mxu0 %v5202_v38  ;;  %v4947_v38 = vpack.c.bf16 %v2757_v36, %v2756_v20  ;;  %v4955_v20 = vpack.c.bf16 %v2887_v19, %v2885_v18  ;;  %v2890_v36 = vld [vmem:[#allocation17 + $0x28] sm:$0xff] }
 0x863   :  { %4948 = vmatpush3.bf16.msra.mxu1 %v4947_v38 }
 0x864   :  { %2508 = vmatpush1.bf16.msra.mxu0 %v5200_v22  ;;  %v2775_v22 = vld [vmem:[#allocation16 + $0xf8] sm:$0xff] }
 0x865   :  { %2509 = vmatprep.subr.bf16.mxu0 %v5205_v23  ;;  %v2758_v23 = vld [vmem:[#allocation16 + $0x70] sm:$0xff] }
 0x868   :  { %2510 = vmatpush1.bf16.msra.mxu0 %v5203_v24  ;;  %v2759_v24 = vld [vmem:[#allocation16 + $0x78] sm:$0xff] }
 0x869   :  { %2511 = vmatprep.subr.bf16.mxu0 %v5208_v26  ;;  %v4949_v26 = vpack.c.bf16 %v2775_v22, %v2774_v21  ;;  %v2892_v21 = vld [vmem:[#allocation17 + $0x38] sm:$0xff]  ;;  %v2889_v22 = vld [vmem:[#allocation17 + $0x20] sm:$0xff] }
 0x86a   :  { %v4957_v38 = vpack.c.bf16 %v2892_v21, %v2890_v36  ;;  %v2854_v36 = vld [vmem:[%s6369_s14] sm:$0x1] }
 0x86b   :  { %4950 = vmatprep.subr.bf16.mxu1 %v4949_v26  ;;  %v2894_v26 = vld [vmem:[#allocation17 + $0x48] sm:$0xff] }
 0x86c   :  { %2512 = vmatpush1.bf16.msra.mxu0 %v5206_v27  ;;  %v4951_v27 = vpack.c.bf16 %v2759_v24, %v2758_v23  ;;  %v2891_v23 = vld [vmem:[#allocation17 + $0x30] sm:$0xff] }
 0x86d   :  { %2644 = vmatprep.subr.bf16.mxu0 %v5211_v28  ;;  %v4959_v24 = vpack.c.bf16 %v2891_v23, %v2889_v22  ;;  %v2875_v22 = vld [vmem:[%s6370_s15] sm:$0x1] }
 0x86e   :  { %4952 = vmatpush3.bf16.msra.mxu1 %v4951_v27  ;;  %v2896_v27 = vld [vmem:[#allocation17 + $0x58] sm:$0xff] }
 0x86f   :  { %2530 = vmatmul.mubr.bf16.vlgmr.msra.gmra.mrb[16].mxu0 %v2399_v35  ;;  %4954 = vmatprep.subr.bf16.mxu1 %v4953_v17 }
 0x870   :  { %2645 = vmatpush1.bf16.msra.mxu0 %v5209_v31  ;;  %2676 = vmatprep.mubr.bf16.mxu0 %v5531_v25  ;;  %v5218_v25 = vld [vmem:[%s6368_s13 + $0x1b0] ss:$8 sps:$4 sm:$0xff]  }
 0x871   :  { %2646 = vmatprep.subr.bf16.mxu0 %v5214_v37 }
 0x874   :  { %2647 = vmatpush1.bf16.msra.mxu0 %v5212_v39 }
 0x875   :  { %2648 = vmatprep.subr.bf16.mxu0 %v5217_v40 }
 0x878   :  { %2649 = vmatpush1.bf16.msra.mxu0 %v5215_v41 }
 0x879   :  { %2650 = vmatprep.subr.bf16.mxu0 %v5220_v42 }
 0x87c   :  { %2651 = vmatpush1.bf16.msra.mxu0 %v5218_v25 }
 0x87d   :  { %2652 = vmatprep.subr.bf16.mxu0 %v5223_v43 }
 0x880   :  { %2653 = vmatpush1.bf16.msra.mxu0 %v5221_v44 }
 0x881   :  { %2654 = vmatprep.subr.bf16.mxu0 %v5226_v46 }
 0x884   :  { %2655 = vmatpush1.bf16.msra.mxu0 %v5224_v47 }
 0x885   :  { %2656 = vmatprep.subr.bf16.mxu0 %v5229_v48 }
 0x888   :  { %2657 = vmatpush1.bf16.msra.mxu0 %v5227_v49 }
 0x889   :  { %2658 = vmatprep.subr.bf16.mxu0 %v5232_v50 }
 0x88c   :  { %2659 = vmatpush1.bf16.msra.mxu0 %v5230_v52 }
 0x88f   :  { %2677 = vmatmul.mubr.bf16.vlgmr.msra.gmra.mrb[16].mxu0 %v2546_v56 }
 0x962   :  { %v2678_v28 = vpop.f32.mrb[16].mxu0 }
 0x963   :  { %v2680_v29 = vpop.f32.mrb[17].mxu0  ;;  %v6287_v30 = vsel %vm2699_vm4, %v2678_v28, 0.0  ;;  %v4961_v28 = vpack.c.bf16 %v2896_v27, %v2894_v26 }
 0x964   :  { %v2682_v31 = vpop.f32.mrb[18].mxu0  ;;  %v6289_v35 = vsel %vm2699_vm4, %v2680_v29, 0.0  ;;  %v2722_v42 = vmul.f32 %v6287_v30, %v6287_v30  ;;  %v2895_v29 = vld [vmem:[#allocation17 + $0x50] sm:$0xff] }
 0x965   :  { %v6293_v37 = vsel %vm1173_vm7, %v2682_v31, 0.0  ;;  %v2684_v39 = vpop.f32.mrb[19].mxu0  ;;  %v2723_v46 = vmul.f32 %v6289_v35, %v6289_v35 }
 0x966   :  { %v2706_v40 = vsel %vm2705_vm5, %v6293_v37, 0.0  ;;  %v2724_v32 = vmul.f32 %v6293_v37, %v6293_v37  ;;  %v6301_v41 = vsel %vm1173_vm7, %v2684_v39, 0.0  ;;  %v2898_v39 = vld [vmem:[#allocation17 + $0x68] sm:$0xff] }
 0x967   :  { %v2707_v25 = vadd.f32 %v2706_v40, %v6287_v30  ;;  %v2714_v43 = vsel %vm2705_vm5, %v6301_v41, 0.0  ;;  %v2725_v44 = vmul.f32 %v6301_v41, %v6301_v41  ;;  %v2900_v40 = vld [vmem:[#allocation17 + $0x78] sm:$0xff] }
 0x968   :  { %v2726_v47 = vsel %vm2705_vm5, %v2724_v32, 0.0  ;;  %v2715_v33 = vadd.f32 %v2714_v43, %v6289_v35  ;;  %v4965_v32 = vpack.c.bf16 %v2900_v40, %v2898_v39  ;;  %v5241_v39 = vld [vmem:[#allocation19 + $0x150] sm:$0xff]  }
 0x969   :  { %v2708_v48 = vrot.slane %v2707_v25, 4  ;;  %v2727_v49 = vadd.f32 %v2726_v47, %v2722_v42  ;;  %v2734_v50 = vsel %vm2705_vm5, %v2725_v44, 0.0  ;;  %v2897_v42 = vld [vmem:[#allocation17 + $0x60] sm:$0xff]  ;;  %v2902_v44 = vld [vmem:[#allocation17 + $0x88] sm:$0xff]  ;;  %v5242_v40 = vld [vmem:[#allocation19 + $0x110] sm:$0xff]  }
 0x96a   :  { %v2716_v52 = vrot.slane %v2715_v33, 4  ;;  %v2735_v53 = vadd.f32 %v2734_v50, %v2723_v46  ;;  %v2904_v46 = vld [vmem:[#allocation17 + $0x98] sm:$0xff]  ;;  %v2906_v50 = vld [vmem:[#allocation17 + $0xa8] sm:$0xff] }
 0x96b   :  { %v2709_v55 = vadd.f32 %v2708_v48, %v2707_v25  ;;  %v2728_v56 = vrot.slane %v2727_v49, 4  ;;  %v2899_v25 = vld [vmem:[#allocation17 + $0x70] sm:$0xff]  ;;  %v4969_v47 = vpack.c.bf16 %v2904_v46, %v2902_v44  ;;  %v5247_v44 = vld [vmem:[#allocation19 + $0xd8] sm:$0xff]  }
 0x96c   :  { %v2717_v54 = vadd.f32 %v2716_v52, %v2715_v33  ;;  %v2736_v57 = vrot.slane %v2735_v53, 4  ;;  %v4967_v43 = vpack.c.bf16 %v2899_v25, %v2897_v42  ;;  %v2901_v33 = vld [vmem:[#allocation17 + $0x80] sm:$0xff]  ;;  %v2903_v48 = vld [vmem:[#allocation17 + $0x90] sm:$0xff]  ;;  %v2908_v52 = vld [vmem:[#allocation17 + $0xb8] sm:$0xff] }
 0x96d   :  { %v2710_v58 = vrot.slane %v2709_v55, 2  ;;  %v2729_v59 = vadd.f32 %v2728_v56, %v2727_v49  ;;  %v4971_v49 = vpack.c.bf16 %v2903_v48, %v2901_v33  ;;  %v2907_v56 = vld [vmem:[#allocation17 + $0xb0] sm:$0xff]  ;;  %v5245_v25 = vld [vmem:[#allocation19 + $0x158] sm:$0xff]   ;;  %v5250_v33 = vld [vmem:[#allocation19 + $0x120] sm:$0xff]  }
 0x96e   :  { %v2718_v7 = vrot.slane %v2717_v54, 2  ;;  %v2737_v60 = vadd.f32 %v2736_v57, %v2735_v53  ;;  %v4973_v53 = vpack.c.bf16 %v2908_v52, %v2906_v50  ;;  %v2910_v57 = vld [vmem:[#allocation17 + $0xc8] sm:$0xff]  ;;  %v5244_v42 = vld [vmem:[#allocation19 + $0x90] sm:$0xff]   ;;  %v5248_v46 = vld [vmem:[#allocation19 + $0x98] sm:$0xff]  }
 0x96f   :  { %v2711_v61 = vadd.f32 %v2710_v58, %v2709_v55  ;;  %v2730_v62 = vrot.slane %v2729_v59, 2  ;;  %v2905_v55 = vld [vmem:[#allocation17 + $0xa0] sm:$0xff]  ;;  %v2912_v58 = vld [vmem:[#allocation17 + $0xd8] sm:$0xff]  ;;  %v5253_v50 = vld [vmem:[#allocation19 + $0x168] sm:$0xff]  }
 0x970   :  { %v2719_v63 = vadd.f32 %v2718_v7, %v2717_v54  ;;  %v2738_v0 = vrot.slane %v2737_v60, 2  ;;  %v4975_v54 = vpack.c.bf16 %v2907_v56, %v2905_v55  ;;  %v2909_v7 = vld [vmem:[#allocation17 + $0xc0] sm:$0xff]  ;;  %v5254_v52 = vld [vmem:[#allocation19 + $0x128] sm:$0xff]   ;;  %v5257_v55 = vld [vmem:[#allocation19 + $0x170] sm:$0xff]  }
 0x971   :  { %v2731_v11 = vadd.f32 %v2730_v62, %v2729_v59  ;;  %v2712_v3 = vrot.slane %v2711_v61, 1  ;;  %v4977_v59 = vpack.c.bf16 %v2912_v58, %v2910_v57  ;;  %v2914_v62 = vld [vmem:[#allocation17 + $0xe8] sm:$0xff]  ;;  %v5251_v48 = vld [vmem:[#allocation19 + $0xe0] sm:$0xff]   ;;  %v5259_v57 = vld [vmem:[#allocation19 + $0xf0] sm:$0xff]  }
 0x972   :  { %v2720_v1 = vrot.slane %v2719_v63, 1  ;;  %v2739_v2 = vadd.f32 %v2738_v0, %v2737_v60  ;;  %v2911_v60 = vld [vmem:[#allocation17 + $0xd0] sm:$0xff]  ;;  %v5256_v56 = vld [vmem:[#allocation19 + $0xa8] sm:$0xff]   ;;  %v5261_v58 = vld [vmem:[#allocation19 + $0x178] sm:$0xff]  }
 0x973   :  { %v2732_v4 = vrot.slane %v2731_v11, 1  ;;  %v2713_v12 = vadd.f32 %v2712_v3, %v2711_v61  ;;  %v4979_v61 = vpack.c.bf16 %v2911_v60, %v2909_v7  ;;  %v5233_v3 = vld [vmem:[#allocation19 + $0x140] sm:$0xff]   ;;  %v5262_v7 = vld [vmem:[#allocation19 + $0x138] sm:$0xff]  }
 0x974   :  { %v2740_v6 = vrot.slane %v2739_v2, 1  ;;  %v2721_v9 = vadd.f32 %v2720_v1, %v2719_v63  ;;  %v2916_v63 = vld [vmem:[#allocation17 + $0xf8] sm:$0xff]  ;;  %v2915_v1 = vld [vmem:[#allocation17 + $0xf0] sm:$0xff]  ;;  %4401 = vmatprep.subr.bf16.mxu0 %v5233_v3 }
 0x975   :  { %v2733_v8 = vadd.f32 %v2732_v4, %v2731_v11  ;;  %v4981_v0 = vpack.c.bf16 %v2916_v63, %v2914_v62  ;;  %v2913_v11 = vld [vmem:[#allocation17 + $0xe0] sm:$0xff]  ;;  %v5263_v60 = vld [vmem:[#allocation19 + $0xf8] sm:$0xff]  }
 0x976   :  { %v2741_v10 = vadd.f32 %v2740_v6, %v2739_v2  ;;  %v4983_v2 = vpack.c.bf16 %v2915_v1, %v2913_v11  ;;  %v5234_v4 = vld [vmem:[#allocation19 + $0x100] sm:$0xff]  }
 0x977   :  { %v2742_v14 = vsel %vm1199_vm9, %v2713_v12, %v2733_v8  ;;  %v5235_v6 = vld [vmem:[#allocation19 + $0xc0] sm:$0xff]   ;;  %4402 = vmatpush3.bf16.msra.mxu0 %v5234_v4 }
 0x978   :  { %v2743_v13 = vsel %vm1199_vm9, %v2721_v9, %v2741_v10  ;;  %v5265_v62 = vld [vmem:[#allocation19 + $0x40] sm:$0xff]  }
 0x979   :  { %2840 = vmatprep.mubr.f32.mxu1 %v2743_v13 }
 0x97a   :  { %2841 = vmatmul.mubr.f32.vlgmr.msra.gmra.mrb[16].mxu1 %v2742_v14 }
 0x97b   :  { %2981 = vmatprep.mubr.f32.mxu1 %v6047_v51  ;;  %4956 = vmatpush1.bf16.msra.mxu1 %v4955_v20  ;;  %v2893_v51 = vld [vmem:[#allocation17 + $0x40] sm:$0xff] }
 0x97c   :  { %4958 = vmatprep.subr.bf16.mxu1 %v4957_v38  ;;  %v4963_v31 = vpack.c.bf16 %v2895_v29, %v2893_v51  ;;  %v5237_v51 = vld [vmem:[#allocation19 + $0x148] sm:$0xff]  }
 0x97d   :  { %v5238_v29 = vld [vmem:[#allocation19 + $0x108] sm:$0xff]   ;;  %4403 = vmatprep.subr.bf16.mxu0 %v5237_v51 }
 0x97e   :  { %4404 = vmatpush3.bf16.msra.mxu0 %v5238_v29 }
 0x97f   :  { %4960 = vmatpush1.bf16.msra.mxu1 %v4959_v24  ;;  %4405 = vmatprep.subr.bf16.mxu0 %v5241_v39 }
 0x980   :  { %4962 = vmatprep.subr.bf16.mxu1 %v4961_v28  ;;  %v5236_v28 = vld [vmem:[#allocation19 + $0x80] sm:$0xff]  }
 0x982   :  { %4406 = vmatpush3.bf16.msra.mxu0 %v5242_v40 }
 0x983   :  { %4964 = vmatpush1.bf16.msra.mxu1 %v4963_v31  ;;  %v5239_v31 = vld [vmem:[#allocation19 + $0xc8] sm:$0xff]   ;;  %4407 = vmatprep.subr.bf16.mxu0 %v5245_v25 }
 0x984   :  { %4966 = vmatprep.subr.bf16.mxu1 %v4965_v32  ;;  %v5243_v32 = vld [vmem:[#allocation19 + $0xd0] sm:$0xff]  }
 0x987   :  { %4968 = vmatpush1.bf16.msra.mxu1 %v4967_v43  ;;  %v5246_v43 = vld [vmem:[#allocation19 + $0x118] sm:$0xff]  }
 0x988   :  { %4970 = vmatprep.subr.bf16.mxu1 %v4969_v47  ;;  %4408 = vmatpush3.bf16.msra.mxu0 %v5246_v43  ;;  %v5249_v47 = vld [vmem:[#allocation19 + $0x160] sm:$0xff]  }
 0x989   :  { %4409 = vmatprep.subr.bf16.mxu0 %v5249_v47 }
 0x98b   :  { %4972 = vmatpush1.bf16.msra.mxu1 %v4971_v49  ;;  %v5252_v49 = vld [vmem:[#allocation19 + $0xa0] sm:$0xff]  }
 0x98c   :  { %4974 = vmatprep.subr.bf16.mxu1 %v4973_v53  ;;  %4410 = vmatpush3.bf16.msra.mxu0 %v5250_v33  ;;  %v5255_v53 = vld [vmem:[#allocation19 + $0xe8] sm:$0xff]  }
 0x98d   :  { %4411 = vmatprep.subr.bf16.mxu0 %v5253_v50 }
 0x98f   :  { %4976 = vmatpush1.bf16.msra.mxu1 %v4975_v54  ;;  %v5258_v54 = vld [vmem:[#allocation19 + $0x130] sm:$0xff]  }
 0x990   :  { %4978 = vmatprep.subr.bf16.mxu1 %v4977_v59  ;;  %4412 = vmatpush3.bf16.msra.mxu0 %v5254_v52  ;;  %v5260_v59 = vld [vmem:[#allocation19 + $0xb0] sm:$0xff]  }
 0x991   :  { %4413 = vmatprep.subr.bf16.mxu0 %v5257_v55 }
 0x993   :  { %4980 = vmatpush1.bf16.msra.mxu1 %v4979_v61  ;;  %v5264_v61 = vld [vmem:[#allocation19 + $0xb8] sm:$0xff]  }
 0x994   :  { %4982 = vmatprep.subr.bf16.mxu1 %v4981_v0  ;;  %4414 = vmatpush3.bf16.msra.mxu0 %v5258_v54 }
 0x995   :  { %4415 = vmatprep.subr.bf16.mxu0 %v5261_v58 }
 0x997   :  { %4984 = vmatpush1.bf16.msra.mxu1 %v4983_v2 }
 0x998   :  { %4357 = vmatprep.subr.bf16.mxu1 %v5235_v6  ;;  %4416 = vmatpush3.bf16.msra.mxu0 %v5262_v7 }
 0xa4d   :  { %v4354_v8 = vpop.f32.mrb[16].mxu1 }
 0xa4e   :  { %v4355_v9 = vpop.f32.mrb[17].mxu1 }
 0xa4f   :  { %v4356_v10 = vadd.f32 %v4355_v9, %v4354_v8 }
 0xa51   :  { %v2847_v12 = vmul.f32 0.03125, %v4356_v10 }
 0xa53   :  { %v2848_v13 = vmul.f32 %v2847_v12, %v2847_v12 }
 0xa55   :  { %v2850_v14 = vrot.slane %v2848_v13, 7 }
 0xa57   :  { %v2852_v15 = vsub.f32 %v2847_v12, %v2850_v14 }
 0xa59   :  { %v2853_v16 = vmax.f32 %v2852_v15, 0.0 }
 0xa5b   :  { %v2855_v17 = vadd.f32 1e-05, %v2853_v16 }
 0xa5d   :  { %5301 = vrsqrt.f32 %v2855_v17 }
 0xa67   :  { %v5302_v18 = vpop.eup %5301 }
 0xa68   :  { %v2864_v19 = vrot.slane %v5302_v18, %v5986_v34 }
 0xa6a   :  { %v2865_v20 = vcombine.high %v2864_v19, %v2864_v19 }
 0xa6c   :  { %v2872_v21 = vrot.slane %v2865_v20, %v5986_v34  ;;  %v5240_v34 = vld [vmem:[#allocation19 + $0x88] sm:$0xff]  }
 0xa6e   :  { %v2874_v38 = vmul.f32 %v2872_v21, %v2854_v36 }
 0xa70   :  { %v2876_v23 = vmul.f32 %v2874_v38, %v2847_v12 }
 0xa72   :  { %v2877_v24 = vsub.f32 %v2875_v22, %v2876_v23  ;;  %v3430_v23 = vld [vmem:[#allocation5 + $0x28] sm:$0x3] }
 0xa74   :  { %v2882_v26 = vrot.slane %v2877_v24, %v5997_v45  ;;  %v3088_v24 = vld [vmem:[#allocation5 + $0x28] sm:$0x1] }
 0xa75   :  { %v3092_v29 = vpack.c.bf16 %v3088_v24, %v3088_v24 }
 0xa76   :  { %v2884_v27 = vsel %vm1199_vm9, %v2874_v38, %v2882_v26  ;;  %v3429_v26 = vld [vmem:[#allocation5 + $0x20] sm:$0x3] }
 0xa77   :  { %2982 = vmatmul.mubr.f32.vlgmr.msra.gmra.mrb[18].mxu1 %v2884_v27  ;;  %v3087_v27 = vld [vmem:[#allocation5 + $0x20] sm:$0x1]  ;;  %v3433_v40 = vpack.c.bf16 %v3429_v26, %v3429_v26  ;;  %v5280_v26 = vld [vmem:[#allocation19 + $0x38] sm:$0xff]  }
 0xa78   :  { %4358 = vmatpush3.bf16.msra.mxu1 %v5236_v28  ;;  %v3434_v28 = vpack.c.bf16 %v3430_v23, %v3430_v23 }
 0xa79   :  { %4359 = vmatprep.subr.bf16.mxu1 %v5239_v31  ;;  %v3474_v50 = vrot.slane %v3433_v40, 1  ;;  %v5283_v40 = vld [vmem:[#allocation19 + $0x1c8] sm:$0xff]  }
 0xa7a   :  { %v3477_v47 = vrot.slane %v3434_v28, 1 }
 0xa7c   :  { %4360 = vmatpush3.bf16.msra.mxu1 %v5240_v34 }
 0xa7d   :  { %4361 = vmatprep.subr.bf16.mxu1 %v5243_v32 }
 0xa80   :  { %4362 = vmatpush3.bf16.msra.mxu1 %v5244_v42  ;;  %v3091_v42 = vpack.c.bf16 %v3087_v27, %v3087_v27  ;;  %v5281_v27 = vld [vmem:[#allocation19 + $0x1c0] sm:$0xff]  }
 0xa81   :  { %4363 = vmatprep.subr.bf16.mxu1 %v5247_v44 }
 0xa84   :  { %4364 = vmatpush3.bf16.msra.mxu1 %v5248_v46 }
 0xa85   :  { %4365 = vmatprep.subr.bf16.mxu1 %v5251_v48  ;;  %v3147_v48 = vshll.u32 %v3092_v29, 16 }
 0xa88   :  { %4366 = vmatpush3.bf16.msra.mxu1 %v5252_v49 }
 0xa89   :  { %4367 = vmatprep.subr.bf16.mxu1 %v5255_v53  ;;  %v3135_v53 = vshll.u32 %v3091_v42, 16  ;;  %v5284_v42 = vld [vmem:[#allocation19 + $0x188] sm:$0xff]  }
 0xa8c   :  { %4368 = vmatpush3.bf16.msra.mxu1 %v5256_v56 }
 0xa8d   :  { %4369 = vmatprep.subr.bf16.mxu1 %v5259_v57 }
 0xa90   :  { %4370 = vmatpush3.bf16.msra.mxu1 %v5260_v59 }
 0xa91   :  { %4371 = vmatprep.subr.bf16.mxu1 %v5263_v60  ;;  %v3149_v60 = vrot.slane %v3147_v48, 1  ;;  %v3622_v48 = vld [vmem:[#allocation5 + $0x20] sm:$0x7] }
 0xa94   :  { %4372 = vmatpush3.bf16.msra.mxu1 %v5264_v61 }
 0xa95   :  { %4379 = vmatprep.subr.bf16.mxu1 %v5265_v62 }
 0xb4a   :  { %v2983_v63 = vpop.f32.mrb[18].mxu1 }
 0xb4b   :  { %v2991_v0 = vrot.slane %v2983_v63, %v5997_v45  ;;  %v2985_v11 = vpop.f32.mrb[19].mxu1  ;;  %v3003_v4 = vrot.slane %v2983_v63, %v6014_v5  ;;  %v3137_v63 = vrot.slane %v3135_v53, 1  ;;  %v3626_v53 = vpack.c.bf16 %v3622_v48, %v3622_v48 }
 0xb4c   :  { %v2995_v1 = vrot.slane %v2985_v11, %v5997_v45  ;;  %v3007_v9 = vrot.slane %v2985_v11, %v6014_v5 }
 0xb4d   :  { %v2996_v2 = vmul.f32 %v2991_v0, %v6287_v30  ;;  %v2998_v3 = vmul.f32 %v2991_v0, %v6293_v37 }
 0xb4e   :  { %v2997_v6 = vmul.f32 %v2995_v1, %v6289_v35  ;;  %v2999_v8 = vmul.f32 %v2995_v1, %v6301_v41  ;;  %v5266_v1 = vld [vmem:[#allocation19] sm:$0xff]  }
 0xb4f   :  { %v3008_v10 = vadd.f32 %v3003_v4, %v2996_v2  ;;  %v3010_v12 = vadd.f32 %v3003_v4, %v2998_v3  ;;  %v5267_v3 = vld [vmem:[#allocation19 + $0x48] sm:$0xff]  }
 0xb50   :  { %v3009_v13 = vadd.f32 %v3007_v9, %v2997_v6  ;;  %v3011_v14 = vadd.f32 %v3007_v9, %v2999_v8  ;;  %v5268_v8 = vld [vmem:[#allocation19 + $0x8] sm:$0xff]   ;;  %v5269_v9 = vld [vmem:[#allocation19 + $0x50] sm:$0xff]  }
 0xb51   :  { %vm3012_vm6 = vcmp.gt.f32.partialorder %v3008_v10, 0.0  ;;  %vm3014_vm7 = vcmp.gt.f32.partialorder %v3010_v12, 0.0  ;;  %v3016_v15 = vmul.f32 0.2, %v3008_v10  ;;  %v3018_v45 = vmul.f32 0.2, %v3010_v12 }
 0xb52   :  { %vm3013_vm8 = vcmp.gt.f32.partialorder %v3009_v13, 0.0  ;;  %vm3015_vm9 = vcmp.gt.f32.partialorder %v3011_v14, 0.0  ;;  %v3017_v30 = vmul.f32 0.2, %v3009_v13  ;;  %v3019_v37 = vmul.f32 0.2, %v3011_v14 }
 0xb53   :  { %v3020_v16 = vsel %vm3012_vm6, %v3008_v10, %v3016_v15  ;;  %v3022_v17 = vsel %vm3014_vm7, %v3010_v12, %v3018_v45  ;;  %v5270_v10 = vld [vmem:[#allocation19 + $0x10] sm:$0xff]   ;;  %v5271_v12 = vld [vmem:[#allocation19 + $0x58] sm:$0xff]   ;;  %v5274_v15 = vld [vmem:[#allocation19 + $0x20] sm:$0xff]  }
 0xb54   :  { %v3026_v35 = vrot.slane %v3020_v16, 6  ;;  %v3035_v18 = vrot.slane %v3020_v16, 5  ;;  %v3036_v41 = vrot.slane %v3022_v17, 5  ;;  %v3021_v19 = vsel %vm3013_vm8, %v3009_v13, %v3017_v30  ;;  %v5272_v13 = vld [vmem:[#allocation19 + $0x18] sm:$0xff]  }
 0xb55   :  { %v3023_v5 = vsel %vm3015_vm9, %v3011_v14, %v3019_v37  ;;  %v3027_v20 = vrot.slane %v3021_v19, 6  ;;  %v3038_v36 = vrot.slane %v3021_v19, 5  ;;  %v5273_v14 = vld [vmem:[#allocation19 + $0x60] sm:$0xff]   ;;  %v3623_v30 = vld [vmem:[#allocation5 + $0x28] sm:$0x7]  ;;  %v5275_v37 = vld [vmem:[#allocation19 + $0x68] sm:$0xff]  }
 0xb56   :  { %3030 = vst [vmem:[#allocation5] sm:$0x3c] %v3026_v35  ;;  %v3037_v21 = vsel %vm3034_vm10, %v3035_v18, %v3036_v41  ;;  %v3039_v38 = vrot.slane %v3023_v5, 5  ;;  %v3627_v17 = vpack.c.bf16 %v3623_v30, %v3623_v30  ;;  %v5276_v35 = vld [vmem:[#allocation19 + $0x28] sm:$0xff]   ;;  %v5277_v18 = vld [vmem:[#allocation19 + $0x70] sm:$0xff]  }
 0xb57   :  { %3043 = vst [vmem:[#allocation5 + $0x10] sm:$0x3c] %v3037_v21  ;;  %3031 = vst [vmem:[#allocation5 + $0x8] sm:$0x3c] %v3027_v20  ;;  %v5279_v21 = vld [vmem:[#allocation19 + $0x78] sm:$0xff]  }
 0xb58   :  { %v3040_v22 = vsel %vm3034_vm10, %v3038_v36, %v3039_v38  ;;  %v3688_v5 = vshrl.u32 %v3627_v17, 16  ;;  %v3691_v20 = vshll.u32 %v3627_v17, 16  ;;  %v5278_v36 = vld [vmem:[#allocation19 + $0x30] sm:$0xff]  }
 0xb59   :  { %3044 = vst [vmem:[#allocation5 + $0x18] sm:$0x3c] %v3040_v22 }
 0xb5a   :  { %v3690_v23 = vrot.slane %v3688_v5, 1  ;;  %v3693_v24 = vrot.slane %v3691_v20, 2 }
 0xb5c   :  { %v3694_v29 = vor.u32 %v3693_v24, %v3690_v23  ;;  %v4141_v24 = vld [vmem:[%s6374_s19] ss:$0 sm:$0xff] }
 0xb5d   :  { %v3427_v51 = vld [vmem:[#allocation5] sm:$0xfc] }
 0xb5e   :  { %v3083_v31 = vld [vmem:[#allocation5] sm:$0xfe]  ;;  %v3428_v34 = vld [vmem:[#allocation5 + $0x8] sm:$0xfc]  ;;  %v6336_v39 = vld [vmem:[#allocation5 + $0x10] sm:$0xff] }
 0xb5f   :  { %v3084_v32 = vld [vmem:[#allocation5 + $0x8] sm:$0xfe]  ;;  %v3431_v25 = vpack.c.bf16 %v6336_v39, %v3427_v51  ;;  %v3089_v43 = vpack.c.bf16 %v6336_v39, %v3083_v31  ;;  %v3045_v28 = vld [vmem:[#allocation5] sm:$0xff]  ;;  %v5282_v31 = vld [vmem:[#allocation19 + $0x180] sm:$0xff]  }
 0xb60   :  { %v3086_v44 = vld [vmem:[#allocation5 + $0x18] sm:$0xff]  ;;  %v3046_v11 = vld [vmem:[#allocation5 + $0x8] sm:$0xff] }
 0xb61   :  { %v3432_v46 = vpack.c.bf16 %v3086_v44, %v3428_v34  ;;  %v3090_v33 = vpack.c.bf16 %v3086_v44, %v3084_v32  ;;  %v3473_v49 = vrot.slane %v3431_v25, 1  ;;  %v3130_v52 = vshll.u32 %v3089_v43, 16  ;;  %v3621_v45 = vld [vmem:[#allocation5 + $0x8] sm:$0xf8]  ;;  %v5285_v25 = vld [vmem:[#allocation19 + $0x1d0] sm:$0xff]  }
 0xb62   :  { %v3128_v54 = vshrl.u32 %v3089_v43, 16  ;;  %v3050_v6 = vpack.c.bf16 %v3086_v44, %v3046_v11  ;;  %v3625_v16 = vpack.c.bf16 %v3086_v44, %v3621_v45  ;;  %v3049_v34 = vpack.c.bf16 %v6336_v39, %v3045_v28  ;;  %v5286_v43 = vld [vmem:[#allocation19 + $0x190] sm:$0xff]   ;;  %v5287_v44 = vld [vmem:[#allocation19 + $0x1d8] sm:$0xff]  }
 0xb63   :  { %v3476_v55 = vrot.slane %v3432_v46, 1  ;;  %v3142_v56 = vshll.u32 %v3090_v33, 16  ;;  %v3132_v57 = vrot.slane %v3130_v52, 1  ;;  %v3140_v59 = vshrl.u32 %v3090_v33, 16  ;;  %v5288_v46 = vld [vmem:[#allocation19 + $0x198] sm:$0xff]  }
 0xb64   :  { %v3475_v61 = vsel %vm3472_vm11, %v3473_v49, %v3474_v50  ;;  %v3680_v41 = vshrl.u32 %v3625_v16, 16  ;;  %v3683_v19 = vshll.u32 %v3625_v16, 16  ;;  %v3620_v33 = vld [vmem:[#allocation5] sm:$0xf8]  ;;  %v5290_v49 = vld [vmem:[#allocation19 + $0x1a0] sm:$0xff]   ;;  %v5291_v50 = vld [vmem:[#allocation19 + $0x1e8] sm:$0xff]  }
 0xb65   :  { %v3478_v58 = vsel %vm3472_vm11, %v3476_v55, %v3477_v47  ;;  %v3144_v7 = vrot.slane %v3142_v56, 1  ;;  %v3133_v62 = vor.u32 %v3132_v57, %v3128_v54  ;;  %v5289_v47 = vld [vmem:[#allocation19 + $0x1e0] sm:$0xff]   ;;  %v3624_v52 = vpack.c.bf16 %v6336_v39, %v3620_v33  ;;  %v5292_v55 = vld [vmem:[#allocation19 + $0x1a8] sm:$0xff]   ;;  %v5293_v56 = vld [vmem:[#allocation19 + $0x1f0] sm:$0xff]  }
 0xb66   :  { %3609 = vmatprep.mubr.bf16.mxu0 %v3478_v58  ;;  %v3682_v38 = vrot.slane %v3680_v41, 1  ;;  %v3685_v22 = vrot.slane %v3683_v19, 2  ;;  %v3671_v58 = vshrl.u32 %v3626_v53, 16  ;;  %v5296_v11 = vld [vmem:[#allocation19 + $0x1b8] sm:$0xff]  }
 0xb67   :  { %3610 = vmatmul.mubr.bf16.vlgmr.msra.gmra.mrb[20].mxu0 %v3475_v61  ;;  %v3145_v0 = vor.u32 %v3144_v7, %v3140_v59  ;;  %v3138_v4 = vsel %vm3126_vm12, %v3133_v62, %v3137_v63  ;;  %v3663_v54 = vshrl.u32 %v3624_v52, 16  ;;  %v3666_v57 = vshll.u32 %v3624_v52, 16  ;;  %v5294_v7 = vld [vmem:[#allocation19 + $0x1b0] sm:$0xff]  }
 0xb68   :  { %v3686_v51 = vor.u32 %v3685_v22, %v3682_v38  ;;  %v3674_v59 = vshll.u32 %v3626_v53, 16  ;;  %v3673_v63 = vrot.slane %v3671_v58, 1 }
 0xb69   :  { %v3150_v2 = vsel %vm3126_vm12, %v3145_v0, %v3149_v60  ;;  %v5295_v60 = vld [vmem:[#allocation19 + $0x1f8] sm:$0xff]   ;;  %v3665_v61 = vrot.slane %v3663_v54, 1  ;;  %v3668_v62 = vrot.slane %v3666_v57, 2 }
 0xb6a   :  { %3281 = vmatprep.mubr.bf16.mxu1 %v3150_v2  ;;  %v3695_v32 = vsel %vm3661_vm13, %v3686_v51, %v3694_v29  ;;  %v3676_v0 = vrot.slane %v3674_v59, 2 }
 0xb6b   :  { %3282 = vmatmul.mubr.bf16.vlgmr.msra.gmra.mrb[20].mxu1 %v3138_v4  ;;  %v3669_v39 = vor.u32 %v3668_v62, %v3665_v61 }
 0xb6c   :  { %4380 = vmatpush3.bf16.msra.mxu1 %v5266_v1  ;;  %3418 = vmatprep.mubr.bf16.mxu1 %v3050_v6  ;;  %v3677_v1 = vor.u32 %v3676_v0, %v3673_v63 }
 0xb6d   :  { %4381 = vmatprep.subr.bf16.mxu1 %v5267_v3 }
 0xb6e   :  { %v3678_v2 = vsel %vm3661_vm13, %v3669_v39, %v3677_v1 }
 0xb70   :  { %4382 = vmatpush3.bf16.msra.mxu1 %v5268_v8 }
 0xb71   :  { %4383 = vmatprep.subr.bf16.mxu1 %v5269_v9 }
 0xb74   :  { %4384 = vmatpush3.bf16.msra.mxu1 %v5270_v10 }
 0xb75   :  { %4385 = vmatprep.subr.bf16.mxu1 %v5271_v12 }
 0xb78   :  { %4386 = vmatpush3.bf16.msra.mxu1 %v5272_v13 }
 0xb79   :  { %4387 = vmatprep.subr.bf16.mxu1 %v5273_v14 }
 0xb7c   :  { %4388 = vmatpush3.bf16.msra.mxu1 %v5274_v15 }
 0xb7d   :  { %4389 = vmatprep.subr.bf16.mxu1 %v5275_v37 }
 0xb80   :  { %4390 = vmatpush3.bf16.msra.mxu1 %v5276_v35 }
 0xb81   :  { %4391 = vmatprep.subr.bf16.mxu1 %v5277_v18 }
 0xb84   :  { %4392 = vmatpush3.bf16.msra.mxu1 %v5278_v36 }
 0xb85   :  { %4393 = vmatprep.subr.bf16.mxu1 %v5279_v21 }
 0xb88   :  { %4394 = vmatpush3.bf16.msra.mxu1 %v5280_v26 }
 0xb89   :  { %4423 = vmatprep.subr.bf16.mxu1 %v5281_v27 }
 0xb8b   :  { %3419 = vmatmul.mubr.bf16.vlgmr.msra.gmra.mrb[24].mxu1 %v3049_v34 }
 0xb8c   :  { %4424 = vmatpush3.bf16.msra.mxu1 %v5282_v31  ;;  %3826 = vmatprep.mubr.bf16.mxu1 %v3695_v32 }
 0xb8d   :  { %4425 = vmatprep.subr.bf16.mxu1 %v5283_v40 }
 0xb90   :  { %4426 = vmatpush3.bf16.msra.mxu1 %v5284_v42 }
 0xb91   :  { %4427 = vmatprep.subr.bf16.mxu1 %v5285_v25 }
 0xb94   :  { %4428 = vmatpush3.bf16.msra.mxu1 %v5286_v43 }
 0xb95   :  { %4429 = vmatprep.subr.bf16.mxu1 %v5287_v44 }
 0xb98   :  { %4430 = vmatpush3.bf16.msra.mxu1 %v5288_v46 }
 0xb99   :  { %4431 = vmatprep.subr.bf16.mxu1 %v5289_v47 }
 0xb9c   :  { %4432 = vmatpush3.bf16.msra.mxu1 %v5290_v49 }
 0xb9d   :  { %4433 = vmatprep.subr.bf16.mxu1 %v5291_v50 }
 0xba0   :  { %4434 = vmatpush3.bf16.msra.mxu1 %v5292_v55 }
 0xba1   :  { %4435 = vmatprep.subr.bf16.mxu1 %v5293_v56 }
 0xba4   :  { %4436 = vmatpush3.bf16.msra.mxu1 %v5294_v7 }
 0xba5   :  { %4437 = vmatprep.subr.bf16.mxu1 %v5295_v60 }
 0xba8   :  { %4438 = vmatpush3.bf16.msra.mxu1 %v5296_v11 }
 0xbab   :  { %3827 = vmatmul.mubr.bf16.vlgmr.msra.gmra.mrb[28].mxu1 %v3678_v2 }
 0xc3a   :  { %v4417_v3 = vpop.f32.mrb[20].mxu0 }
 0xc3b   :  { %v4418_v4 = vpop.f32.mrb[21].mxu0 }
 0xc3c   :  { %v4419_v6 = vadd.f32 %v4418_v4, %v4417_v3  ;;  %v4420_v8 = vpop.f32.mrb[22].mxu0 }
 0xc3d   :  { %v4421_v9 = vpop.f32.mrb[23].mxu0 }
 0xc3e   :  { %v4422_v10 = vadd.f32 %v4421_v9, %v4420_v8  ;;  %v4373_v12 = vpop.f32.mrb[20].mxu1 }
 0xc3f   :  { %v4374_v13 = vpop.f32.mrb[21].mxu1 }
 0xc40   :  { %v4375_v14 = vadd.f32 %v4374_v13, %v4373_v12  ;;  %v4376_v15 = vpop.f32.mrb[22].mxu1 }
 0xc41   :  { %v4377_v45 = vpop.f32.mrb[23].mxu1 }
 0xc42   :  { %v4378_v30 = vadd.f32 %v4377_v45, %v4376_v15 }
 0xc5e   :  { %v4395_v37 = vpop.f32.mrb[24].mxu1 }
 0xc5f   :  { %v4396_v16 = vpop.f32.mrb[25].mxu1 }
 0xc60   :  { %v4397_v17 = vadd.f32 %v4396_v16, %v4395_v37  ;;  %v4398_v35 = vpop.f32.mrb[26].mxu1 }
 0xc61   :  { %v4399_v18 = vpop.f32.mrb[27].mxu1 }
 0xc62   :  { %v3421_v41 = vadd.f32 %v4397_v17, %v4375_v14  ;;  %v4400_v19 = vadd.f32 %v4399_v18, %v4398_v35 }
 0xc64   :  { %v3424_v5 = vadd.f32 %v4400_v19, %v4378_v30  ;;  %v3618_v20 = vadd.f32 %v4419_v6, %v3421_v41 }
 0xc66   :  { %v3619_v36 = vadd.f32 %v4422_v10, %v3424_v5 }
 0xc7e   :  { %v4439_v21 = vpop.f32.mrb[28].mxu1 }
 0xc7f   :  { %v4440_v38 = vpop.f32.mrb[29].mxu1 }
 0xc80   :  { %v4441_v22 = vadd.f32 %v4440_v38, %v4439_v21  ;;  %v4442_v23 = vpop.f32.mrb[30].mxu1 }
 0xc81   :  { %v4443_v26 = vpop.f32.mrb[31].mxu1 }
 0xc82   :  { %v3835_v27 = vadd.f32 %v4441_v22, %v3618_v20  ;;  %v4444_v28 = vadd.f32 %v4443_v26, %v4442_v23 }
 0xc84   :  { %v3844_v51 = vadd.f32 %v4141_v24, %v3835_v27  ;;  %v3836_v29 = vadd.f32 %v4444_v28, %v3619_v36 }
 0xc86   :  { %3846 = vst [vmem:[%s6400_s30] sm:$0xff] %v3844_v51  ;;  %v3845_v31 = vadd.f32 %v4141_v24, %v3836_v29 }
 0xc88   :  { %3847 = vst [vmem:[%s6400_s30 + $0x8] sm:$0xff] %v3845_v31 }
 0xc89   :  { %3852 = vsyncpa [#allocation7], 1 }
 0xc8a   :  { %3853 = vsyncpa [#allocation9], 1 }
 0xc8b   :  { %3854 = vsyncpa [#allocation12], 1 }
 0xc8c   :  { %3855 = vsyncpa [#allocation15], 1 }
 0xc8d   :  { %3856 = vsyncpa [#allocation18], 1 }

</bundles_post_ra>
